<compile_context>
chip_gen: v5e
topology: v5e:2x2
jax: 0.10.0
libtpu: 0.0.40
codegen_flags: <defaults>
</compile_context>

<pallas_src>
import functools

import jax
import jax.numpy as jnp
from jax.experimental import pallas as pl
from jax.experimental.pallas import tpu as pltpu

# Tap offsets of a 3x3 SAME convolution, in (kh, kw) row-major order.
_TAPS = tuple((dh, dw) for dh in (-1, 0, 1) for dw in (-1, 0, 1))
_CIN_PAD = 16  # per-tap channel stride: bf16 sublane-tile (16) aligned


# ----------------------------------------------------------------------------
# Fused kernel: the whole MiDaS-style forward for one batch element.
# ----------------------------------------------------------------------------
def _make_fused_kernel(H, W, feats):
    P = H * W

    def shift(x, k):
        # out[:, p] = x[:, p + k]  (circular lane roll; wrapped lanes are
        # zeroed by the border masks / coefficients derived below).
        if k == 0:
            return x
        return pltpu.roll(x, (-k) % P, axis=1)

    def kernel(x_ref, rc_ref, w1_ref, w2_ref, w3_ref, w4_ref, blob_ref,
               o_ref, taps_ref):
        row = rc_ref[0:1, :]                       # (1, P) int32
        col = rc_ref[1:2, :]                       # (1, P) int32

        # In-kernel geometry: per-tap border-validity masks (f32 so the mask
        # multiply is a plain f32 VPU op on every chip generation).
        tap_mask = []
        for dh, dw in _TAPS:
            valid = ((row + dh >= 0) & (row + dh < H) &
                     (col + dw >= 0) & (col + dw < W))
            tap_mask.append(valid.astype(jnp.float32))         # (1, P)

        def conv3x3_relu(xin, w_ref, bias):
            # xin: (Cin, P) f32; w_ref: (Cout, 9*Cin) bf16; bias: (Cout, 1) f32
            cin = xin.shape[0]
            k = 9 * cin
            # Stage all 9 masked taps into one (9*Cin, P) bf16 scratch slab.
            for t, (dh, dw) in enumerate(_TAPS):
                tap = shift(xin, dh * W + dw) * tap_mask[t]
                taps_ref[t * cin:(t + 1) * cin, :] = tap.astype(jnp.bfloat16)
            # Single packed-K MXU GEMM, f32 accumulation.
            acc = jnp.dot(w_ref[...], taps_ref[0:k, :],
                          preferred_element_type=jnp.float32)
            return jnp.maximum(acc + bias, 0.0)

        # Fused "take even rows/cols, then bilinear x2 upsample (half-pixel
        # centers, edge clamp)" as a separable linear operator; coefficients
        # are generated in-kernel and are zero wherever a roll wrapped.
        even_c = (col & 1) == 0
        even_r = (row & 1) == 0
        cc0 = jnp.where(col == 0, 1.0, jnp.where(even_c, 0.75, 0.0))
        cc1 = jnp.where(even_c & (col >= 2), 0.25, 0.0)
        cc2 = jnp.where(~even_c, jnp.where(col == W - 1, 1.0, 0.75), 0.0)
        cc3 = jnp.where((~even_c) & (col <= W - 3), 0.25, 0.0)
        rc0 = jnp.where(row == 0, 1.0, jnp.where(even_r, 0.75, 0.0))
        rc1 = jnp.where(even_r & (row >= 2), 0.25, 0.0)
        rc2 = jnp.where(~even_r, jnp.where(row == H - 1, 1.0, 0.75), 0.0)
        rc3 = jnp.where((~even_r) & (row <= H - 3), 0.25, 0.0)

        def down_up(y):
            t = (cc0 * y + cc1 * shift(y, -2)
                 + cc2 * shift(y, -1) + cc3 * shift(y, 1))
            return (rc0 * t + rc1 * shift(t, -2 * W)
                    + rc2 * shift(t, -W) + rc3 * shift(t, W))

        # Consolidated bias / head blob (one tiny resident tile).
        b1 = blob_ref[0:feats, 0:1]
        b2 = blob_ref[0:2 * feats, 1:2]
        b3 = blob_ref[0:feats, 2:3]
        b4 = blob_ref[0:feats, 3:4]
        w5 = blob_ref[0:feats, 4:5]
        b5 = blob_ref[0:1, 5:6]

        x = x_ref[0]                                  # (16, P) f32 (padded C)
        h = conv3x3_relu(x, w1_ref, b1)               # (16, P) encoder conv1
        h = conv3x3_relu(h, w2_ref, b2)               # (32, P) encoder conv2
        h = down_up(h)                                # (32, P) stride2 + up x2
        h = conv3x3_relu(h, w3_ref, b3)               # (16, P) decoder conv
        h = conv3x3_relu(h, w4_ref, b4)               # (16, P) head conv

        # Fused 1x1 non-negative depth head; writes one lane-dense (1, P) row.
        head = jnp.sum(w5 * h, axis=0, keepdims=True) + b5
        o_ref[0] = jnp.maximum(head, 0.0)

    return kernel


# ----------------------------------------------------------------------------
# Synthetic, deterministically-initialized MiDaS-style parameters.
# ----------------------------------------------------------------------------
def init_params(key, c_in=3, feats=16):
    ks = jax.random.split(key, 5)

    def conv_init(k, kh, kw, ci, co):
        scale = 1.0 / jnp.sqrt(kh * kw * ci)
        wgt = jax.random.normal(k, (kh, kw, ci, co), jnp.float32) * scale
        return wgt, jnp.zeros((co,), jnp.float32)

    p = {}
    p["w1"], p["b1"] = conv_init(ks[0], 3, 3, c_in, feats)        # conv1
    p["w2"], p["b2"] = conv_init(ks[1], 3, 3, feats, 2 * feats)   # conv2 (s2)
    p["w3"], p["b3"] = conv_init(ks[2], 3, 3, 2 * feats, feats)   # decoder
    p["w4"], p["b4"] = conv_init(ks[3], 3, 3, feats, feats)       # head conv
    p["w5"], p["b5"] = conv_init(ks[4], 1, 1, feats, 1)           # depth head
    return p


def _pack_conv(w, cin_pad=None):
    # (KH, KW, Cin, Cout) -> (Cout, KH*KW*Cin_pad) bf16, tap-major K ordering
    # matching _TAPS and the kernel's per-tap staging stride.
    kh, kw, ci, co = w.shape
    cp = ci if cin_pad is None else cin_pad
    wt = jnp.transpose(w, (3, 0, 1, 2)).reshape(co, kh * kw, ci)
    if cp != ci:
        wt = jnp.pad(wt, ((0, 0), (0, 0), (0, cp - ci)))
    return wt.reshape(co, kh * kw * cp).astype(jnp.bfloat16)


def _param_blob(params, feats):
    # Columns: 0:b1 1:b2 2:b3 3:b4 4:w5(head weights) 5:b5.
    blob = jnp.zeros((2 * feats, 8), jnp.float32)
    blob = blob.at[:feats, 0].set(params["b1"])
    blob = blob.at[:2 * feats, 1].set(params["b2"])
    blob = blob.at[:feats, 2].set(params["b3"])
    blob = blob.at[:feats, 3].set(params["b4"])
    blob = blob.at[:feats, 4].set(params["w5"].reshape(feats))
    blob = blob.at[0, 5].set(params["b5"][0])
    return blob


# ----------------------------------------------------------------------------
# Forward wrapper.
# ----------------------------------------------------------------------------
def midas_forward(params, x_nchw, feats=16):
    """x_nchw: (B, 3, H, W) float32  ->  prediction (B, H, W) float32."""
    B, C, H, W = x_nchw.shape
    assert H % 2 == 0 and W % 2 == 0, "H and W must be even"
    assert C <= _CIN_PAD
    P = H * W

    # NCHW -> (B, C, H*W); zero-pad channels to the bf16-tile-aligned stride
    # so every per-tap scratch block starts on a 16-sublane boundary.
    x_flat = x_nchw.reshape(B, C, P)
    if C < _CIN_PAD:
        x_flat = jnp.pad(x_flat, ((0, 0), (0, _CIN_PAD - C), (0, 0)))

    # Compact (2, P) int32 row/col map; all masks and resize coefficients are
    # derived from it inside the kernel with cheap compares.
    p = jnp.arange(P, dtype=jnp.int32)
    rowcol = jnp.stack([p // W, p % W], axis=0)

    # Host-prepacked bf16 conv weights (tap-major packed K) + bias/head blob.
    w1 = _pack_conv(params["w1"], cin_pad=_CIN_PAD)   # (16, 144)
    w2 = _pack_conv(params["w2"])                     # (32, 144)
    w3 = _pack_conv(params["w3"])                     # (16, 288)
    w4 = _pack_conv(params["w4"])                     # (16, 144)
    blob = _param_blob(params, feats)                 # (32, 8)

    def resident(arr):
        return pl.BlockSpec(arr.shape, lambda b: (0, 0))

    k_max = 9 * 2 * feats  # largest packed K (conv3: Cin=32 -> 288 rows)

    out = pl.pallas_call(
        _make_fused_kernel(H, W, feats),
        out_shape=jax.ShapeDtypeStruct((B, 1, P), jnp.float32),
        grid=(B,),
        in_specs=[
            pl.BlockSpec((1, _CIN_PAD, P), lambda b: (b, 0, 0)),
            resident(rowcol),
            resident(w1), resident(w2), resident(w3), resident(w4),
            resident(blob),
        ],
        out_specs=pl.BlockSpec((1, 1, P), lambda b: (b, 0, 0)),
        scratch_shapes=[pltpu.VMEM((k_max, P), jnp.bfloat16)],
        compiler_params=pltpu.CompilerParams(
            dimension_semantics=("parallel",),
            vmem_limit_bytes=32 * 1024 * 1024),
    )(x_flat, rowcol, w1, w2, w3, w4, blob)

    return out.reshape(B, H, W)


if __name__ == "__main__":
    key = jax.random.PRNGKey(0)
    k_params, k_x = jax.random.split(key)

    B, C, H, W = 2, 3, 16, 16
    params = init_params(k_params)
    x = jax.random.normal(k_x, (B, C, H, W), jnp.float32)

    fwd = jax.jit(functools.partial(midas_forward, params))
    pred = fwd(x)
    jax.block_until_ready(pred)

    assert pred.shape == (B, H, W), pred.shape
    assert pred.dtype == jnp.float32
    assert bool(jnp.all(jnp.isfinite(pred)))
    assert bool(jnp.all(pred >= 0.0))   # non_negative head (final ReLU)
    print("KERNEL_OK")
</pallas_src>

<mosaic_0001>
module attributes {stable_mosaic.version = 11 : i64} {
  func.func @kernel(%arg0: i32, %arg1: memref<1x16x256xf32, #tpu.memory_space<vmem>>, %arg2: memref<2x256xi32, #tpu.memory_space<vmem>>, %arg3: memref<16x144xbf16, #tpu.memory_space<vmem>>, %arg4: memref<32x144xbf16, #tpu.memory_space<vmem>>, %arg5: memref<16x288xbf16, #tpu.memory_space<vmem>>, %arg6: memref<16x144xbf16, #tpu.memory_space<vmem>>, %arg7: memref<32x8xf32, #tpu.memory_space<vmem>>, %arg8: memref<1x1x256xf32, #tpu.memory_space<vmem>>, %arg9: memref<288x256xbf16, #tpu.memory_space<vmem>>) attributes {dimension_semantics = [#tpu.dimension_semantics<parallel>], iteration_bounds = array<i64: 2>, scalar_prefetch = 0 : i64, scratch_operands = 1 : i64, tpu.core_type = #tpu.core_type<tc>, window_params = [{transform_indices = @transform_0, window_bounds = array<i64: 1, 16, 256>}, {pipeline_mode = #tpu.pipeline_mode<synchronous>, transform_indices = @transform_1, window_bounds = array<i64: 2, 256>}, {pipeline_mode = #tpu.pipeline_mode<synchronous>, transform_indices = @transform_2, window_bounds = array<i64: 16, 144>}, {pipeline_mode = #tpu.pipeline_mode<synchronous>, transform_indices = @transform_3, window_bounds = array<i64: 32, 144>}, {pipeline_mode = #tpu.pipeline_mode<synchronous>, transform_indices = @transform_4, window_bounds = array<i64: 16, 288>}, {pipeline_mode = #tpu.pipeline_mode<synchronous>, transform_indices = @transform_5, window_bounds = array<i64: 16, 144>}, {pipeline_mode = #tpu.pipeline_mode<synchronous>, transform_indices = @transform_6, window_bounds = array<i64: 32, 8>}, {transform_indices = @transform_7, window_bounds = array<i64: 1, 1, 256>}]} {
    %c0 = arith.constant 0 : index
    %c0_0 = arith.constant 0 : index
    %0 = vector.load %arg2[%c0, %c0_0] : memref<2x256xi32, #tpu.memory_space<vmem>>, vector<1x256xi32>
    %c1 = arith.constant 1 : index
    %c0_1 = arith.constant 0 : index
    %1 = vector.load %arg2[%c1, %c0_1] : memref<2x256xi32, #tpu.memory_space<vmem>>, vector<1x256xi32>
    %c-1_i32 = arith.constant -1 : i32
    %2 = vector.broadcast %c-1_i32 : i32 to vector<1x256xi32>
    %3 = arith.addi %0, %2 : vector<1x256xi32>
    %c0_i32 = arith.constant 0 : i32
    %4 = vector.broadcast %c0_i32 : i32 to vector<1x256xi32>
    %5 = arith.cmpi sge, %3, %4 : vector<1x256xi32>
    %c-1_i32_2 = arith.constant -1 : i32
    %6 = vector.broadcast %c-1_i32_2 : i32 to vector<1x256xi32>
    %7 = arith.addi %0, %6 : vector<1x256xi32>
    %c16_i32 = arith.constant 16 : i32
    %8 = vector.broadcast %c16_i32 : i32 to vector<1x256xi32>
    %9 = arith.cmpi slt, %7, %8 : vector<1x256xi32>
    %10 = arith.andi %5, %9 : vector<1x256xi1>
    %c-1_i32_3 = arith.constant -1 : i32
    %11 = vector.broadcast %c-1_i32_3 : i32 to vector<1x256xi32>
    %12 = arith.addi %1, %11 : vector<1x256xi32>
    %c0_i32_4 = arith.constant 0 : i32
    %13 = vector.broadcast %c0_i32_4 : i32 to vector<1x256xi32>
    %14 = arith.cmpi sge, %12, %13 : vector<1x256xi32>
    %15 = arith.andi %10, %14 : vector<1x256xi1>
    %c-1_i32_5 = arith.constant -1 : i32
    %16 = vector.broadcast %c-1_i32_5 : i32 to vector<1x256xi32>
    %17 = arith.addi %1, %16 : vector<1x256xi32>
    %c16_i32_6 = arith.constant 16 : i32
    %18 = vector.broadcast %c16_i32_6 : i32 to vector<1x256xi32>
    %19 = arith.cmpi slt, %17, %18 : vector<1x256xi32>
    %20 = arith.andi %15, %19 : vector<1x256xi1>
    %21 = arith.extui %20 : vector<1x256xi1> to vector<1x256xi32>
    %22 = arith.sitofp %21 : vector<1x256xi32> to vector<1x256xf32>
    %c-1_i32_7 = arith.constant -1 : i32
    %23 = vector.broadcast %c-1_i32_7 : i32 to vector<1x256xi32>
    %24 = arith.addi %0, %23 : vector<1x256xi32>
    %c0_i32_8 = arith.constant 0 : i32
    %25 = vector.broadcast %c0_i32_8 : i32 to vector<1x256xi32>
    %26 = arith.cmpi sge, %24, %25 : vector<1x256xi32>
    %c-1_i32_9 = arith.constant -1 : i32
    %27 = vector.broadcast %c-1_i32_9 : i32 to vector<1x256xi32>
    %28 = arith.addi %0, %27 : vector<1x256xi32>
    %c16_i32_10 = arith.constant 16 : i32
    %29 = vector.broadcast %c16_i32_10 : i32 to vector<1x256xi32>
    %30 = arith.cmpi slt, %28, %29 : vector<1x256xi32>
    %31 = arith.andi %26, %30 : vector<1x256xi1>
    %c0_i32_11 = arith.constant 0 : i32
    %32 = vector.broadcast %c0_i32_11 : i32 to vector<1x256xi32>
    %33 = arith.addi %1, %32 : vector<1x256xi32>
    %c0_i32_12 = arith.constant 0 : i32
    %34 = vector.broadcast %c0_i32_12 : i32 to vector<1x256xi32>
    %35 = arith.cmpi sge, %33, %34 : vector<1x256xi32>
    %36 = arith.andi %31, %35 : vector<1x256xi1>
    %c0_i32_13 = arith.constant 0 : i32
    %37 = vector.broadcast %c0_i32_13 : i32 to vector<1x256xi32>
    %38 = arith.addi %1, %37 : vector<1x256xi32>
    %c16_i32_14 = arith.constant 16 : i32
    %39 = vector.broadcast %c16_i32_14 : i32 to vector<1x256xi32>
    %40 = arith.cmpi slt, %38, %39 : vector<1x256xi32>
    %41 = arith.andi %36, %40 : vector<1x256xi1>
    %42 = arith.extui %41 : vector<1x256xi1> to vector<1x256xi32>
    %43 = arith.sitofp %42 : vector<1x256xi32> to vector<1x256xf32>
    %c-1_i32_15 = arith.constant -1 : i32
    %44 = vector.broadcast %c-1_i32_15 : i32 to vector<1x256xi32>
    %45 = arith.addi %0, %44 : vector<1x256xi32>
    %c0_i32_16 = arith.constant 0 : i32
    %46 = vector.broadcast %c0_i32_16 : i32 to vector<1x256xi32>
    %47 = arith.cmpi sge, %45, %46 : vector<1x256xi32>
    %c-1_i32_17 = arith.constant -1 : i32
    %48 = vector.broadcast %c-1_i32_17 : i32 to vector<1x256xi32>
    %49 = arith.addi %0, %48 : vector<1x256xi32>
    %c16_i32_18 = arith.constant 16 : i32
    %50 = vector.broadcast %c16_i32_18 : i32 to vector<1x256xi32>
    %51 = arith.cmpi slt, %49, %50 : vector<1x256xi32>
    %52 = arith.andi %47, %51 : vector<1x256xi1>
    %c1_i32 = arith.constant 1 : i32
    %53 = vector.broadcast %c1_i32 : i32 to vector<1x256xi32>
    %54 = arith.addi %1, %53 : vector<1x256xi32>
    %c0_i32_19 = arith.constant 0 : i32
    %55 = vector.broadcast %c0_i32_19 : i32 to vector<1x256xi32>
    %56 = arith.cmpi sge, %54, %55 : vector<1x256xi32>
    %57 = arith.andi %52, %56 : vector<1x256xi1>
    %c1_i32_20 = arith.constant 1 : i32
    %58 = vector.broadcast %c1_i32_20 : i32 to vector<1x256xi32>
    %59 = arith.addi %1, %58 : vector<1x256xi32>
    %c16_i32_21 = arith.constant 16 : i32
    %60 = vector.broadcast %c16_i32_21 : i32 to vector<1x256xi32>
    %61 = arith.cmpi slt, %59, %60 : vector<1x256xi32>
    %62 = arith.andi %57, %61 : vector<1x256xi1>
    %63 = arith.extui %62 : vector<1x256xi1> to vector<1x256xi32>
    %64 = arith.sitofp %63 : vector<1x256xi32> to vector<1x256xf32>
    %c0_i32_22 = arith.constant 0 : i32
    %65 = vector.broadcast %c0_i32_22 : i32 to vector<1x256xi32>
    %66 = arith.addi %0, %65 : vector<1x256xi32>
    %c0_i32_23 = arith.constant 0 : i32
    %67 = vector.broadcast %c0_i32_23 : i32 to vector<1x256xi32>
    %68 = arith.cmpi sge, %66, %67 : vector<1x256xi32>
    %c0_i32_24 = arith.constant 0 : i32
    %69 = vector.broadcast %c0_i32_24 : i32 to vector<1x256xi32>
    %70 = arith.addi %0, %69 : vector<1x256xi32>
    %c16_i32_25 = arith.constant 16 : i32
    %71 = vector.broadcast %c16_i32_25 : i32 to vector<1x256xi32>
    %72 = arith.cmpi slt, %70, %71 : vector<1x256xi32>
    %73 = arith.andi %68, %72 : vector<1x256xi1>
    %c-1_i32_26 = arith.constant -1 : i32
    %74 = vector.broadcast %c-1_i32_26 : i32 to vector<1x256xi32>
    %75 = arith.addi %1, %74 : vector<1x256xi32>
    %c0_i32_27 = arith.constant 0 : i32
    %76 = vector.broadcast %c0_i32_27 : i32 to vector<1x256xi32>
    %77 = arith.cmpi sge, %75, %76 : vector<1x256xi32>
    %78 = arith.andi %73, %77 : vector<1x256xi1>
    %c-1_i32_28 = arith.constant -1 : i32
    %79 = vector.broadcast %c-1_i32_28 : i32 to vector<1x256xi32>
    %80 = arith.addi %1, %79 : vector<1x256xi32>
    %c16_i32_29 = arith.constant 16 : i32
    %81 = vector.broadcast %c16_i32_29 : i32 to vector<1x256xi32>
    %82 = arith.cmpi slt, %80, %81 : vector<1x256xi32>
    %83 = arith.andi %78, %82 : vector<1x256xi1>
    %84 = arith.extui %83 : vector<1x256xi1> to vector<1x256xi32>
    %85 = arith.sitofp %84 : vector<1x256xi32> to vector<1x256xf32>
    %c0_i32_30 = arith.constant 0 : i32
    %86 = vector.broadcast %c0_i32_30 : i32 to vector<1x256xi32>
    %87 = arith.addi %0, %86 : vector<1x256xi32>
    %c0_i32_31 = arith.constant 0 : i32
    %88 = vector.broadcast %c0_i32_31 : i32 to vector<1x256xi32>
    %89 = arith.cmpi sge, %87, %88 : vector<1x256xi32>
    %c0_i32_32 = arith.constant 0 : i32
    %90 = vector.broadcast %c0_i32_32 : i32 to vector<1x256xi32>
    %91 = arith.addi %0, %90 : vector<1x256xi32>
    %c16_i32_33 = arith.constant 16 : i32
    %92 = vector.broadcast %c16_i32_33 : i32 to vector<1x256xi32>
    %93 = arith.cmpi slt, %91, %92 : vector<1x256xi32>
    %94 = arith.andi %89, %93 : vector<1x256xi1>
    %c0_i32_34 = arith.constant 0 : i32
    %95 = vector.broadcast %c0_i32_34 : i32 to vector<1x256xi32>
    %96 = arith.addi %1, %95 : vector<1x256xi32>
    %c0_i32_35 = arith.constant 0 : i32
    %97 = vector.broadcast %c0_i32_35 : i32 to vector<1x256xi32>
    %98 = arith.cmpi sge, %96, %97 : vector<1x256xi32>
    %99 = arith.andi %94, %98 : vector<1x256xi1>
    %c0_i32_36 = arith.constant 0 : i32
    %100 = vector.broadcast %c0_i32_36 : i32 to vector<1x256xi32>
    %101 = arith.addi %1, %100 : vector<1x256xi32>
    %c16_i32_37 = arith.constant 16 : i32
    %102 = vector.broadcast %c16_i32_37 : i32 to vector<1x256xi32>
    %103 = arith.cmpi slt, %101, %102 : vector<1x256xi32>
    %104 = arith.andi %99, %103 : vector<1x256xi1>
    %105 = arith.extui %104 : vector<1x256xi1> to vector<1x256xi32>
    %106 = arith.sitofp %105 : vector<1x256xi32> to vector<1x256xf32>
    %c0_i32_38 = arith.constant 0 : i32
    %107 = vector.broadcast %c0_i32_38 : i32 to vector<1x256xi32>
    %108 = arith.addi %0, %107 : vector<1x256xi32>
    %c0_i32_39 = arith.constant 0 : i32
    %109 = vector.broadcast %c0_i32_39 : i32 to vector<1x256xi32>
    %110 = arith.cmpi sge, %108, %109 : vector<1x256xi32>
    %c0_i32_40 = arith.constant 0 : i32
    %111 = vector.broadcast %c0_i32_40 : i32 to vector<1x256xi32>
    %112 = arith.addi %0, %111 : vector<1x256xi32>
    %c16_i32_41 = arith.constant 16 : i32
    %113 = vector.broadcast %c16_i32_41 : i32 to vector<1x256xi32>
    %114 = arith.cmpi slt, %112, %113 : vector<1x256xi32>
    %115 = arith.andi %110, %114 : vector<1x256xi1>
    %c1_i32_42 = arith.constant 1 : i32
    %116 = vector.broadcast %c1_i32_42 : i32 to vector<1x256xi32>
    %117 = arith.addi %1, %116 : vector<1x256xi32>
    %c0_i32_43 = arith.constant 0 : i32
    %118 = vector.broadcast %c0_i32_43 : i32 to vector<1x256xi32>
    %119 = arith.cmpi sge, %117, %118 : vector<1x256xi32>
    %120 = arith.andi %115, %119 : vector<1x256xi1>
    %c1_i32_44 = arith.constant 1 : i32
    %121 = vector.broadcast %c1_i32_44 : i32 to vector<1x256xi32>
    %122 = arith.addi %1, %121 : vector<1x256xi32>
    %c16_i32_45 = arith.constant 16 : i32
    %123 = vector.broadcast %c16_i32_45 : i32 to vector<1x256xi32>
    %124 = arith.cmpi slt, %122, %123 : vector<1x256xi32>
    %125 = arith.andi %120, %124 : vector<1x256xi1>
    %126 = arith.extui %125 : vector<1x256xi1> to vector<1x256xi32>
    %127 = arith.sitofp %126 : vector<1x256xi32> to vector<1x256xf32>
    %c1_i32_46 = arith.constant 1 : i32
    %128 = vector.broadcast %c1_i32_46 : i32 to vector<1x256xi32>
    %129 = arith.addi %0, %128 : vector<1x256xi32>
    %c0_i32_47 = arith.constant 0 : i32
    %130 = vector.broadcast %c0_i32_47 : i32 to vector<1x256xi32>
    %131 = arith.cmpi sge, %129, %130 : vector<1x256xi32>
    %c1_i32_48 = arith.constant 1 : i32
    %132 = vector.broadcast %c1_i32_48 : i32 to vector<1x256xi32>
    %133 = arith.addi %0, %132 : vector<1x256xi32>
    %c16_i32_49 = arith.constant 16 : i32
    %134 = vector.broadcast %c16_i32_49 : i32 to vector<1x256xi32>
    %135 = arith.cmpi slt, %133, %134 : vector<1x256xi32>
    %136 = arith.andi %131, %135 : vector<1x256xi1>
    %c-1_i32_50 = arith.constant -1 : i32
    %137 = vector.broadcast %c-1_i32_50 : i32 to vector<1x256xi32>
    %138 = arith.addi %1, %137 : vector<1x256xi32>
    %c0_i32_51 = arith.constant 0 : i32
    %139 = vector.broadcast %c0_i32_51 : i32 to vector<1x256xi32>
    %140 = arith.cmpi sge, %138, %139 : vector<1x256xi32>
    %141 = arith.andi %136, %140 : vector<1x256xi1>
    %c-1_i32_52 = arith.constant -1 : i32
    %142 = vector.broadcast %c-1_i32_52 : i32 to vector<1x256xi32>
    %143 = arith.addi %1, %142 : vector<1x256xi32>
    %c16_i32_53 = arith.constant 16 : i32
    %144 = vector.broadcast %c16_i32_53 : i32 to vector<1x256xi32>
    %145 = arith.cmpi slt, %143, %144 : vector<1x256xi32>
    %146 = arith.andi %141, %145 : vector<1x256xi1>
    %147 = arith.extui %146 : vector<1x256xi1> to vector<1x256xi32>
    %148 = arith.sitofp %147 : vector<1x256xi32> to vector<1x256xf32>
    %c1_i32_54 = arith.constant 1 : i32
    %149 = vector.broadcast %c1_i32_54 : i32 to vector<1x256xi32>
    %150 = arith.addi %0, %149 : vector<1x256xi32>
    %c0_i32_55 = arith.constant 0 : i32
    %151 = vector.broadcast %c0_i32_55 : i32 to vector<1x256xi32>
    %152 = arith.cmpi sge, %150, %151 : vector<1x256xi32>
    %c1_i32_56 = arith.constant 1 : i32
    %153 = vector.broadcast %c1_i32_56 : i32 to vector<1x256xi32>
    %154 = arith.addi %0, %153 : vector<1x256xi32>
    %c16_i32_57 = arith.constant 16 : i32
    %155 = vector.broadcast %c16_i32_57 : i32 to vector<1x256xi32>
    %156 = arith.cmpi slt, %154, %155 : vector<1x256xi32>
    %157 = arith.andi %152, %156 : vector<1x256xi1>
    %c0_i32_58 = arith.constant 0 : i32
    %158 = vector.broadcast %c0_i32_58 : i32 to vector<1x256xi32>
    %159 = arith.addi %1, %158 : vector<1x256xi32>
    %c0_i32_59 = arith.constant 0 : i32
    %160 = vector.broadcast %c0_i32_59 : i32 to vector<1x256xi32>
    %161 = arith.cmpi sge, %159, %160 : vector<1x256xi32>
    %162 = arith.andi %157, %161 : vector<1x256xi1>
    %c0_i32_60 = arith.constant 0 : i32
    %163 = vector.broadcast %c0_i32_60 : i32 to vector<1x256xi32>
    %164 = arith.addi %1, %163 : vector<1x256xi32>
    %c16_i32_61 = arith.constant 16 : i32
    %165 = vector.broadcast %c16_i32_61 : i32 to vector<1x256xi32>
    %166 = arith.cmpi slt, %164, %165 : vector<1x256xi32>
    %167 = arith.andi %162, %166 : vector<1x256xi1>
    %168 = arith.extui %167 : vector<1x256xi1> to vector<1x256xi32>
    %169 = arith.sitofp %168 : vector<1x256xi32> to vector<1x256xf32>
    %c1_i32_62 = arith.constant 1 : i32
    %170 = vector.broadcast %c1_i32_62 : i32 to vector<1x256xi32>
    %171 = arith.addi %0, %170 : vector<1x256xi32>
    %c0_i32_63 = arith.constant 0 : i32
    %172 = vector.broadcast %c0_i32_63 : i32 to vector<1x256xi32>
    %173 = arith.cmpi sge, %171, %172 : vector<1x256xi32>
    %c1_i32_64 = arith.constant 1 : i32
    %174 = vector.broadcast %c1_i32_64 : i32 to vector<1x256xi32>
    %175 = arith.addi %0, %174 : vector<1x256xi32>
    %c16_i32_65 = arith.constant 16 : i32
    %176 = vector.broadcast %c16_i32_65 : i32 to vector<1x256xi32>
    %177 = arith.cmpi slt, %175, %176 : vector<1x256xi32>
    %178 = arith.andi %173, %177 : vector<1x256xi1>
    %c1_i32_66 = arith.constant 1 : i32
    %179 = vector.broadcast %c1_i32_66 : i32 to vector<1x256xi32>
    %180 = arith.addi %1, %179 : vector<1x256xi32>
    %c0_i32_67 = arith.constant 0 : i32
    %181 = vector.broadcast %c0_i32_67 : i32 to vector<1x256xi32>
    %182 = arith.cmpi sge, %180, %181 : vector<1x256xi32>
    %183 = arith.andi %178, %182 : vector<1x256xi1>
    %c1_i32_68 = arith.constant 1 : i32
    %184 = vector.broadcast %c1_i32_68 : i32 to vector<1x256xi32>
    %185 = arith.addi %1, %184 : vector<1x256xi32>
    %c16_i32_69 = arith.constant 16 : i32
    %186 = vector.broadcast %c16_i32_69 : i32 to vector<1x256xi32>
    %187 = arith.cmpi slt, %185, %186 : vector<1x256xi32>
    %188 = arith.andi %183, %187 : vector<1x256xi1>
    %189 = arith.extui %188 : vector<1x256xi1> to vector<1x256xi32>
    %190 = arith.sitofp %189 : vector<1x256xi32> to vector<1x256xf32>
    %c1_i32_70 = arith.constant 1 : i32
    %191 = vector.broadcast %c1_i32_70 : i32 to vector<1x256xi32>
    %192 = arith.andi %1, %191 : vector<1x256xi32>
    %c0_i32_71 = arith.constant 0 : i32
    %193 = vector.broadcast %c0_i32_71 : i32 to vector<1x256xi32>
    %194 = arith.cmpi eq, %192, %193 : vector<1x256xi32>
    %c1_i32_72 = arith.constant 1 : i32
    %195 = vector.broadcast %c1_i32_72 : i32 to vector<1x256xi32>
    %196 = arith.andi %0, %195 : vector<1x256xi32>
    %c0_i32_73 = arith.constant 0 : i32
    %197 = vector.broadcast %c0_i32_73 : i32 to vector<1x256xi32>
    %198 = arith.cmpi eq, %196, %197 : vector<1x256xi32>
    %c0_i32_74 = arith.constant 0 : i32
    %199 = vector.broadcast %c0_i32_74 : i32 to vector<1x256xi32>
    %200 = arith.cmpi eq, %1, %199 : vector<1x256xi32>
    %cst = arith.constant 7.500000e-01 : f32
    %cst_75 = arith.constant 0.000000e+00 : f32
    %201 = vector.broadcast %cst : f32 to vector<1x256xf32>
    %202 = vector.broadcast %cst_75 : f32 to vector<1x256xf32>
    %203 = arith.select %194, %201, %202 : vector<1x256xi1>, vector<1x256xf32>
    %cst_76 = arith.constant 1.000000e+00 : f32
    %204 = vector.broadcast %cst_76 : f32 to vector<1x256xf32>
    %205 = arith.select %200, %204, %203 : vector<1x256xi1>, vector<1x256xf32>
    %c2_i32 = arith.constant 2 : i32
    %206 = vector.broadcast %c2_i32 : i32 to vector<1x256xi32>
    %207 = arith.cmpi sge, %1, %206 : vector<1x256xi32>
    %208 = arith.andi %194, %207 : vector<1x256xi1>
    %cst_77 = arith.constant 2.500000e-01 : f32
    %cst_78 = arith.constant 0.000000e+00 : f32
    %209 = vector.broadcast %cst_77 : f32 to vector<1x256xf32>
    %210 = vector.broadcast %cst_78 : f32 to vector<1x256xf32>
    %211 = arith.select %208, %209, %210 : vector<1x256xi1>, vector<1x256xf32>
    %cst_79 = arith.constant dense<true> : vector<1x256xi1>
    %212 = arith.xori %194, %cst_79 : vector<1x256xi1>
    %c15_i32 = arith.constant 15 : i32
    %213 = vector.broadcast %c15_i32 : i32 to vector<1x256xi32>
    %214 = arith.cmpi eq, %1, %213 : vector<1x256xi32>
    %cst_80 = arith.constant 1.000000e+00 : f32
    %cst_81 = arith.constant 7.500000e-01 : f32
    %215 = vector.broadcast %cst_80 : f32 to vector<1x256xf32>
    %216 = vector.broadcast %cst_81 : f32 to vector<1x256xf32>
    %217 = arith.select %214, %215, %216 : vector<1x256xi1>, vector<1x256xf32>
    %cst_82 = arith.constant 0.000000e+00 : f32
    %218 = vector.broadcast %cst_82 : f32 to vector<1x256xf32>
    %219 = arith.select %212, %217, %218 : vector<1x256xi1>, vector<1x256xf32>
    %cst_83 = arith.constant dense<true> : vector<1x256xi1>
    %220 = arith.xori %194, %cst_83 : vector<1x256xi1>
    %c13_i32 = arith.constant 13 : i32
    %221 = vector.broadcast %c13_i32 : i32 to vector<1x256xi32>
    %222 = arith.cmpi sle, %1, %221 : vector<1x256xi32>
    %223 = arith.andi %220, %222 : vector<1x256xi1>
    %cst_84 = arith.constant 2.500000e-01 : f32
    %cst_85 = arith.constant 0.000000e+00 : f32
    %224 = vector.broadcast %cst_84 : f32 to vector<1x256xf32>
    %225 = vector.broadcast %cst_85 : f32 to vector<1x256xf32>
    %226 = arith.select %223, %224, %225 : vector<1x256xi1>, vector<1x256xf32>
    %c0_i32_86 = arith.constant 0 : i32
    %227 = vector.broadcast %c0_i32_86 : i32 to vector<1x256xi32>
    %228 = arith.cmpi eq, %0, %227 : vector<1x256xi32>
    %cst_87 = arith.constant 7.500000e-01 : f32
    %cst_88 = arith.constant 0.000000e+00 : f32
    %229 = vector.broadcast %cst_87 : f32 to vector<1x256xf32>
    %230 = vector.broadcast %cst_88 : f32 to vector<1x256xf32>
    %231 = arith.select %198, %229, %230 : vector<1x256xi1>, vector<1x256xf32>
    %cst_89 = arith.constant 1.000000e+00 : f32
    %232 = vector.broadcast %cst_89 : f32 to vector<1x256xf32>
    %233 = arith.select %228, %232, %231 : vector<1x256xi1>, vector<1x256xf32>
    %c2_i32_90 = arith.constant 2 : i32
    %234 = vector.broadcast %c2_i32_90 : i32 to vector<1x256xi32>
    %235 = arith.cmpi sge, %0, %234 : vector<1x256xi32>
    %236 = arith.andi %198, %235 : vector<1x256xi1>
    %cst_91 = arith.constant 2.500000e-01 : f32
    %cst_92 = arith.constant 0.000000e+00 : f32
    %237 = vector.broadcast %cst_91 : f32 to vector<1x256xf32>
    %238 = vector.broadcast %cst_92 : f32 to vector<1x256xf32>
    %239 = arith.select %236, %237, %238 : vector<1x256xi1>, vector<1x256xf32>
    %cst_93 = arith.constant dense<true> : vector<1x256xi1>
    %240 = arith.xori %198, %cst_93 : vector<1x256xi1>
    %c15_i32_94 = arith.constant 15 : i32
    %241 = vector.broadcast %c15_i32_94 : i32 to vector<1x256xi32>
    %242 = arith.cmpi eq, %0, %241 : vector<1x256xi32>
    %cst_95 = arith.constant 1.000000e+00 : f32
    %cst_96 = arith.constant 7.500000e-01 : f32
    %243 = vector.broadcast %cst_95 : f32 to vector<1x256xf32>
    %244 = vector.broadcast %cst_96 : f32 to vector<1x256xf32>
    %245 = arith.select %242, %243, %244 : vector<1x256xi1>, vector<1x256xf32>
    %cst_97 = arith.constant 0.000000e+00 : f32
    %246 = vector.broadcast %cst_97 : f32 to vector<1x256xf32>
    %247 = arith.select %240, %245, %246 : vector<1x256xi1>, vector<1x256xf32>
    %cst_98 = arith.constant dense<true> : vector<1x256xi1>
    %248 = arith.xori %198, %cst_98 : vector<1x256xi1>
    %c13_i32_99 = arith.constant 13 : i32
    %249 = vector.broadcast %c13_i32_99 : i32 to vector<1x256xi32>
    %250 = arith.cmpi sle, %0, %249 : vector<1x256xi32>
    %251 = arith.andi %248, %250 : vector<1x256xi1>
    %cst_100 = arith.constant 2.500000e-01 : f32
    %cst_101 = arith.constant 0.000000e+00 : f32
    %252 = vector.broadcast %cst_100 : f32 to vector<1x256xf32>
    %253 = vector.broadcast %cst_101 : f32 to vector<1x256xf32>
    %254 = arith.select %251, %252, %253 : vector<1x256xi1>, vector<1x256xf32>
    %c0_102 = arith.constant 0 : index
    %c0_103 = arith.constant 0 : index
    %255 = vector.load %arg7[%c0_102, %c0_103] : memref<32x8xf32, #tpu.memory_space<vmem>>, vector<16x1xf32>
    %c0_104 = arith.constant 0 : index
    %c1_105 = arith.constant 1 : index
    %256 = vector.load %arg7[%c0_104, %c1_105] : memref<32x8xf32, #tpu.memory_space<vmem>>, vector<32x1xf32>
    %c0_106 = arith.constant 0 : index
    %c2 = arith.constant 2 : index
    %257 = vector.load %arg7[%c0_106, %c2] : memref<32x8xf32, #tpu.memory_space<vmem>>, vector<16x1xf32>
    %c0_107 = arith.constant 0 : index
    %c3 = arith.constant 3 : index
    %258 = vector.load %arg7[%c0_107, %c3] : memref<32x8xf32, #tpu.memory_space<vmem>>, vector<16x1xf32>
    %c0_108 = arith.constant 0 : index
    %c4 = arith.constant 4 : index
    %259 = vector.load %arg7[%c0_108, %c4] : memref<32x8xf32, #tpu.memory_space<vmem>>, vector<16x1xf32>
    %c0_109 = arith.constant 0 : index
    %c5 = arith.constant 5 : index
    %260 = vector.load %arg7[%c0_109, %c5] : memref<32x8xf32, #tpu.memory_space<vmem>>, vector<1x1xf32>
    %c0_110 = arith.constant 0 : index
    %c0_111 = arith.constant 0 : index
    %c0_112 = arith.constant 0 : index
    %261 = vector.load %arg1[%c0_110, %c0_111, %c0_112] : memref<1x16x256xf32, #tpu.memory_space<vmem>>, vector<1x16x256xf32>
    %262 = vector.shape_cast %261 : vector<1x16x256xf32> to vector<16x256xf32>
    %c17_i32 = arith.constant 17 : i32
    %263 = tpu.dynamic_rotate %262 by %c17_i32 dim 1 : vector<16x256xf32>, i32 -> vector<16x256xf32>
    %264 = vector.broadcast %22 : vector<1x256xf32> to vector<16x256xf32>
    %265 = arith.mulf %263, %264 : vector<16x256xf32>
    %266 = arith.truncf %265 : vector<16x256xf32> to vector<16x256xbf16>
    %c0_113 = arith.constant 0 : index
    %c0_114 = arith.constant 0 : index
    %267 = vector.load %arg9[%c0_113, %c0_114] : memref<288x256xbf16, #tpu.memory_space<vmem>>, vector<16x256xbf16>
    tpu.vector_store %arg9[%c0_113, %c0_114], %266 {strides = array<i32>} : memref<288x256xbf16, #tpu.memory_space<vmem>>, vector<16x256xbf16>,
    %c16_i32_115 = arith.constant 16 : i32
    %268 = tpu.dynamic_rotate %262 by %c16_i32_115 dim 1 : vector<16x256xf32>, i32 -> vector<16x256xf32>
    %269 = vector.broadcast %43 : vector<1x256xf32> to vector<16x256xf32>
    %270 = arith.mulf %268, %269 : vector<16x256xf32>
    %271 = arith.truncf %270 : vector<16x256xf32> to vector<16x256xbf16>
    %c16 = arith.constant 16 : index
    %c0_116 = arith.constant 0 : index
    %272 = vector.load %arg9[%c16, %c0_116] : memref<288x256xbf16, #tpu.memory_space<vmem>>, vector<16x256xbf16>
    tpu.vector_store %arg9[%c16, %c0_116], %271 {strides = array<i32>} : memref<288x256xbf16, #tpu.memory_space<vmem>>, vector<16x256xbf16>,
    %c15_i32_117 = arith.constant 15 : i32
    %273 = tpu.dynamic_rotate %262 by %c15_i32_117 dim 1 : vector<16x256xf32>, i32 -> vector<16x256xf32>
    %274 = vector.broadcast %64 : vector<1x256xf32> to vector<16x256xf32>
    %275 = arith.mulf %273, %274 : vector<16x256xf32>
    %276 = arith.truncf %275 : vector<16x256xf32> to vector<16x256xbf16>
    %c32 = arith.constant 32 : index
    %c0_118 = arith.constant 0 : index
    %277 = vector.load %arg9[%c32, %c0_118] : memref<288x256xbf16, #tpu.memory_space<vmem>>, vector<16x256xbf16>
    tpu.vector_store %arg9[%c32, %c0_118], %276 {strides = array<i32>} : memref<288x256xbf16, #tpu.memory_space<vmem>>, vector<16x256xbf16>,
    %c1_i32_119 = arith.constant 1 : i32
    %278 = tpu.dynamic_rotate %262 by %c1_i32_119 dim 1 : vector<16x256xf32>, i32 -> vector<16x256xf32>
    %279 = vector.broadcast %85 : vector<1x256xf32> to vector<16x256xf32>
    %280 = arith.mulf %278, %279 : vector<16x256xf32>
    %281 = arith.truncf %280 : vector<16x256xf32> to vector<16x256xbf16>
    %c48 = arith.constant 48 : index
    %c0_120 = arith.constant 0 : index
    %282 = vector.load %arg9[%c48, %c0_120] : memref<288x256xbf16, #tpu.memory_space<vmem>>, vector<16x256xbf16>
    tpu.vector_store %arg9[%c48, %c0_120], %281 {strides = array<i32>} : memref<288x256xbf16, #tpu.memory_space<vmem>>, vector<16x256xbf16>,
    %283 = vector.broadcast %106 : vector<1x256xf32> to vector<16x256xf32>
    %284 = arith.mulf %262, %283 : vector<16x256xf32>
    %285 = arith.truncf %284 : vector<16x256xf32> to vector<16x256xbf16>
    %c64 = arith.constant 64 : index
    %c0_121 = arith.constant 0 : index
    %286 = vector.load %arg9[%c64, %c0_121] : memref<288x256xbf16, #tpu.memory_space<vmem>>, vector<16x256xbf16>
    tpu.vector_store %arg9[%c64, %c0_121], %285 {strides = array<i32>} : memref<288x256xbf16, #tpu.memory_space<vmem>>, vector<16x256xbf16>,
    %c255_i32 = arith.constant 255 : i32
    %287 = tpu.dynamic_rotate %262 by %c255_i32 dim 1 : vector<16x256xf32>, i32 -> vector<16x256xf32>
    %288 = vector.broadcast %127 : vector<1x256xf32> to vector<16x256xf32>
    %289 = arith.mulf %287, %288 : vector<16x256xf32>
    %290 = arith.truncf %289 : vector<16x256xf32> to vector<16x256xbf16>
    %c80 = arith.constant 80 : index
    %c0_122 = arith.constant 0 : index
    %291 = vector.load %arg9[%c80, %c0_122] : memref<288x256xbf16, #tpu.memory_space<vmem>>, vector<16x256xbf16>
    tpu.vector_store %arg9[%c80, %c0_122], %290 {strides = array<i32>} : memref<288x256xbf16, #tpu.memory_space<vmem>>, vector<16x256xbf16>,
    %c241_i32 = arith.constant 241 : i32
    %292 = tpu.dynamic_rotate %262 by %c241_i32 dim 1 : vector<16x256xf32>, i32 -> vector<16x256xf32>
    %293 = vector.broadcast %148 : vector<1x256xf32> to vector<16x256xf32>
    %294 = arith.mulf %292, %293 : vector<16x256xf32>
    %295 = arith.truncf %294 : vector<16x256xf32> to vector<16x256xbf16>
    %c96 = arith.constant 96 : index
    %c0_123 = arith.constant 0 : index
    %296 = vector.load %arg9[%c96, %c0_123] : memref<288x256xbf16, #tpu.memory_space<vmem>>, vector<16x256xbf16>
    tpu.vector_store %arg9[%c96, %c0_123], %295 {strides = array<i32>} : memref<288x256xbf16, #tpu.memory_space<vmem>>, vector<16x256xbf16>,
    %c240_i32 = arith.constant 240 : i32
    %297 = tpu.dynamic_rotate %262 by %c240_i32 dim 1 : vector<16x256xf32>, i32 -> vector<16x256xf32>
    %298 = vector.broadcast %169 : vector<1x256xf32> to vector<16x256xf32>
    %299 = arith.mulf %297, %298 : vector<16x256xf32>
    %300 = arith.truncf %299 : vector<16x256xf32> to vector<16x256xbf16>
    %c112 = arith.constant 112 : index
    %c0_124 = arith.constant 0 : index
    %301 = vector.load %arg9[%c112, %c0_124] : memref<288x256xbf16, #tpu.memory_space<vmem>>, vector<16x256xbf16>
    tpu.vector_store %arg9[%c112, %c0_124], %300 {strides = array<i32>} : memref<288x256xbf16, #tpu.memory_space<vmem>>, vector<16x256xbf16>,
    %c239_i32 = arith.constant 239 : i32
    %302 = tpu.dynamic_rotate %262 by %c239_i32 dim 1 : vector<16x256xf32>, i32 -> vector<16x256xf32>
    %303 = vector.broadcast %190 : vector<1x256xf32> to vector<16x256xf32>
    %304 = arith.mulf %302, %303 : vector<16x256xf32>
    %305 = arith.truncf %304 : vector<16x256xf32> to vector<16x256xbf16>
    %c128 = arith.constant 128 : index
    %c0_125 = arith.constant 0 : index
    %306 = vector.load %arg9[%c128, %c0_125] : memref<288x256xbf16, #tpu.memory_space<vmem>>, vector<16x256xbf16>
    tpu.vector_store %arg9[%c128, %c0_125], %305 {strides = array<i32>} : memref<288x256xbf16, #tpu.memory_space<vmem>>, vector<16x256xbf16>,
    %c0_126 = arith.constant 0 : index
    %c0_127 = arith.constant 0 : index
    %307 = vector.load %arg3[%c0_126, %c0_127] : memref<16x144xbf16, #tpu.memory_space<vmem>>, vector<16x144xbf16>
    %c0_128 = arith.constant 0 : index
    %c0_129 = arith.constant 0 : index
    %308 = vector.load %arg9[%c0_128, %c0_129] : memref<288x256xbf16, #tpu.memory_space<vmem>>, vector<144x256xbf16>
    %cst_130 = arith.constant dense<0.000000e+00> : vector<16x256xf32>
    %309 = tpu.matmul %307, %308, %cst_130 {dimension_numbers = #tpu.dot_dimension_numbers<[1], [0], [0], [1], [0, 0, 1, 1], [], []>} : vector<16x144xbf16>, vector<144x256xbf16>, vector<16x256xf32> -> vector<16x256xf32>
    %310 = vector.broadcast %255 : vector<16x1xf32> to vector<16x256xf32>
    %311 = arith.addf %309, %310 : vector<16x256xf32>
    %cst_131 = arith.constant 0.000000e+00 : f32
    %312 = vector.broadcast %cst_131 : f32 to vector<16x256xf32>
    %313 = arith.maximumf %311, %312 : vector<16x256xf32>
    %c17_i32_132 = arith.constant 17 : i32
    %314 = tpu.dynamic_rotate %313 by %c17_i32_132 dim 1 : vector<16x256xf32>, i32 -> vector<16x256xf32>
    %315 = vector.broadcast %22 : vector<1x256xf32> to vector<16x256xf32>
    %316 = arith.mulf %314, %315 : vector<16x256xf32>
    %317 = arith.truncf %316 : vector<16x256xf32> to vector<16x256xbf16>
    %c0_133 = arith.constant 0 : index
    %c0_134 = arith.constant 0 : index
    %318 = vector.load %arg9[%c0_133, %c0_134] : memref<288x256xbf16, #tpu.memory_space<vmem>>, vector<16x256xbf16>
    tpu.vector_store %arg9[%c0_133, %c0_134], %317 {strides = array<i32>} : memref<288x256xbf16, #tpu.memory_space<vmem>>, vector<16x256xbf16>,
    %c16_i32_135 = arith.constant 16 : i32
    %319 = tpu.dynamic_rotate %313 by %c16_i32_135 dim 1 : vector<16x256xf32>, i32 -> vector<16x256xf32>
    %320 = vector.broadcast %43 : vector<1x256xf32> to vector<16x256xf32>
    %321 = arith.mulf %319, %320 : vector<16x256xf32>
    %322 = arith.truncf %321 : vector<16x256xf32> to vector<16x256xbf16>
    %c16_136 = arith.constant 16 : index
    %c0_137 = arith.constant 0 : index
    %323 = vector.load %arg9[%c16_136, %c0_137] : memref<288x256xbf16, #tpu.memory_space<vmem>>, vector<16x256xbf16>
    tpu.vector_store %arg9[%c16_136, %c0_137], %322 {strides = array<i32>} : memref<288x256xbf16, #tpu.memory_space<vmem>>, vector<16x256xbf16>,
    %c15_i32_138 = arith.constant 15 : i32
    %324 = tpu.dynamic_rotate %313 by %c15_i32_138 dim 1 : vector<16x256xf32>, i32 -> vector<16x256xf32>
    %325 = vector.broadcast %64 : vector<1x256xf32> to vector<16x256xf32>
    %326 = arith.mulf %324, %325 : vector<16x256xf32>
    %327 = arith.truncf %326 : vector<16x256xf32> to vector<16x256xbf16>
    %c32_139 = arith.constant 32 : index
    %c0_140 = arith.constant 0 : index
    %328 = vector.load %arg9[%c32_139, %c0_140] : memref<288x256xbf16, #tpu.memory_space<vmem>>, vector<16x256xbf16>
    tpu.vector_store %arg9[%c32_139, %c0_140], %327 {strides = array<i32>} : memref<288x256xbf16, #tpu.memory_space<vmem>>, vector<16x256xbf16>,
    %c1_i32_141 = arith.constant 1 : i32
    %329 = tpu.dynamic_rotate %313 by %c1_i32_141 dim 1 : vector<16x256xf32>, i32 -> vector<16x256xf32>
    %330 = vector.broadcast %85 : vector<1x256xf32> to vector<16x256xf32>
    %331 = arith.mulf %329, %330 : vector<16x256xf32>
    %332 = arith.truncf %331 : vector<16x256xf32> to vector<16x256xbf16>
    %c48_142 = arith.constant 48 : index
    %c0_143 = arith.constant 0 : index
    %333 = vector.load %arg9[%c48_142, %c0_143] : memref<288x256xbf16, #tpu.memory_space<vmem>>, vector<16x256xbf16>
    tpu.vector_store %arg9[%c48_142, %c0_143], %332 {strides = array<i32>} : memref<288x256xbf16, #tpu.memory_space<vmem>>, vector<16x256xbf16>,
    %334 = vector.broadcast %106 : vector<1x256xf32> to vector<16x256xf32>
    %335 = arith.mulf %313, %334 : vector<16x256xf32>
    %336 = arith.truncf %335 : vector<16x256xf32> to vector<16x256xbf16>
    %c64_144 = arith.constant 64 : index
    %c0_145 = arith.constant 0 : index
    %337 = vector.load %arg9[%c64_144, %c0_145] : memref<288x256xbf16, #tpu.memory_space<vmem>>, vector<16x256xbf16>
    tpu.vector_store %arg9[%c64_144, %c0_145], %336 {strides = array<i32>} : memref<288x256xbf16, #tpu.memory_space<vmem>>, vector<16x256xbf16>,
    %c255_i32_146 = arith.constant 255 : i32
    %338 = tpu.dynamic_rotate %313 by %c255_i32_146 dim 1 : vector<16x256xf32>, i32 -> vector<16x256xf32>
    %339 = vector.broadcast %127 : vector<1x256xf32> to vector<16x256xf32>
    %340 = arith.mulf %338, %339 : vector<16x256xf32>
    %341 = arith.truncf %340 : vector<16x256xf32> to vector<16x256xbf16>
    %c80_147 = arith.constant 80 : index
    %c0_148 = arith.constant 0 : index
    %342 = vector.load %arg9[%c80_147, %c0_148] : memref<288x256xbf16, #tpu.memory_space<vmem>>, vector<16x256xbf16>
    tpu.vector_store %arg9[%c80_147, %c0_148], %341 {strides = array<i32>} : memref<288x256xbf16, #tpu.memory_space<vmem>>, vector<16x256xbf16>,
    %c241_i32_149 = arith.constant 241 : i32
    %343 = tpu.dynamic_rotate %313 by %c241_i32_149 dim 1 : vector<16x256xf32>, i32 -> vector<16x256xf32>
    %344 = vector.broadcast %148 : vector<1x256xf32> to vector<16x256xf32>
    %345 = arith.mulf %343, %344 : vector<16x256xf32>
    %346 = arith.truncf %345 : vector<16x256xf32> to vector<16x256xbf16>
    %c96_150 = arith.constant 96 : index
    %c0_151 = arith.constant 0 : index
    %347 = vector.load %arg9[%c96_150, %c0_151] : memref<288x256xbf16, #tpu.memory_space<vmem>>, vector<16x256xbf16>
    tpu.vector_store %arg9[%c96_150, %c0_151], %346 {strides = array<i32>} : memref<288x256xbf16, #tpu.memory_space<vmem>>, vector<16x256xbf16>,
    %c240_i32_152 = arith.constant 240 : i32
    %348 = tpu.dynamic_rotate %313 by %c240_i32_152 dim 1 : vector<16x256xf32>, i32 -> vector<16x256xf32>
    %349 = vector.broadcast %169 : vector<1x256xf32> to vector<16x256xf32>
    %350 = arith.mulf %348, %349 : vector<16x256xf32>
    %351 = arith.truncf %350 : vector<16x256xf32> to vector<16x256xbf16>
    %c112_153 = arith.constant 112 : index
    %c0_154 = arith.constant 0 : index
    %352 = vector.load %arg9[%c112_153, %c0_154] : memref<288x256xbf16, #tpu.memory_space<vmem>>, vector<16x256xbf16>
    tpu.vector_store %arg9[%c112_153, %c0_154], %351 {strides = array<i32>} : memref<288x256xbf16, #tpu.memory_space<vmem>>, vector<16x256xbf16>,
    %c239_i32_155 = arith.constant 239 : i32
    %353 = tpu.dynamic_rotate %313 by %c239_i32_155 dim 1 : vector<16x256xf32>, i32 -> vector<16x256xf32>
    %354 = vector.broadcast %190 : vector<1x256xf32> to vector<16x256xf32>
    %355 = arith.mulf %353, %354 : vector<16x256xf32>
    %356 = arith.truncf %355 : vector<16x256xf32> to vector<16x256xbf16>
    %c128_156 = arith.constant 128 : index
    %c0_157 = arith.constant 0 : index
    %357 = vector.load %arg9[%c128_156, %c0_157] : memref<288x256xbf16, #tpu.memory_space<vmem>>, vector<16x256xbf16>
    tpu.vector_store %arg9[%c128_156, %c0_157], %356 {strides = array<i32>} : memref<288x256xbf16, #tpu.memory_space<vmem>>, vector<16x256xbf16>,
    %c0_158 = arith.constant 0 : index
    %c0_159 = arith.constant 0 : index
    %358 = vector.load %arg4[%c0_158, %c0_159] : memref<32x144xbf16, #tpu.memory_space<vmem>>, vector<32x144xbf16>
    %c0_160 = arith.constant 0 : index
    %c0_161 = arith.constant 0 : index
    %359 = vector.load %arg9[%c0_160, %c0_161] : memref<288x256xbf16, #tpu.memory_space<vmem>>, vector<144x256xbf16>
    %cst_162 = arith.constant dense<0.000000e+00> : vector<32x256xf32>
    %360 = tpu.matmul %358, %359, %cst_162 {dimension_numbers = #tpu.dot_dimension_numbers<[1], [0], [0], [1], [0, 0, 1, 1], [], []>} : vector<32x144xbf16>, vector<144x256xbf16>, vector<32x256xf32> -> vector<32x256xf32>
    %361 = vector.broadcast %256 : vector<32x1xf32> to vector<32x256xf32>
    %362 = arith.addf %360, %361 : vector<32x256xf32>
    %cst_163 = arith.constant 0.000000e+00 : f32
    %363 = vector.broadcast %cst_163 : f32 to vector<32x256xf32>
    %364 = arith.maximumf %362, %363 : vector<32x256xf32>
    %365 = vector.broadcast %205 : vector<1x256xf32> to vector<32x256xf32>
    %366 = arith.mulf %365, %364 : vector<32x256xf32>
    %c2_i32_164 = arith.constant 2 : i32
    %367 = tpu.dynamic_rotate %364 by %c2_i32_164 dim 1 : vector<32x256xf32>, i32 -> vector<32x256xf32>
    %368 = vector.broadcast %211 : vector<1x256xf32> to vector<32x256xf32>
    %369 = arith.mulf %368, %367 : vector<32x256xf32>
    %370 = arith.addf %366, %369 : vector<32x256xf32>
    %c1_i32_165 = arith.constant 1 : i32
    %371 = tpu.dynamic_rotate %364 by %c1_i32_165 dim 1 : vector<32x256xf32>, i32 -> vector<32x256xf32>
    %372 = vector.broadcast %219 : vector<1x256xf32> to vector<32x256xf32>
    %373 = arith.mulf %372, %371 : vector<32x256xf32>
    %374 = arith.addf %370, %373 : vector<32x256xf32>
    %c255_i32_166 = arith.constant 255 : i32
    %375 = tpu.dynamic_rotate %364 by %c255_i32_166 dim 1 : vector<32x256xf32>, i32 -> vector<32x256xf32>
    %376 = vector.broadcast %226 : vector<1x256xf32> to vector<32x256xf32>
    %377 = arith.mulf %376, %375 : vector<32x256xf32>
    %378 = arith.addf %374, %377 : vector<32x256xf32>
    %379 = vector.broadcast %233 : vector<1x256xf32> to vector<32x256xf32>
    %380 = arith.mulf %379, %378 : vector<32x256xf32>
    %c32_i32 = arith.constant 32 : i32
    %381 = tpu.dynamic_rotate %378 by %c32_i32 dim 1 : vector<32x256xf32>, i32 -> vector<32x256xf32>
    %382 = vector.broadcast %239 : vector<1x256xf32> to vector<32x256xf32>
    %383 = arith.mulf %382, %381 : vector<32x256xf32>
    %384 = arith.addf %380, %383 : vector<32x256xf32>
    %c16_i32_167 = arith.constant 16 : i32
    %385 = tpu.dynamic_rotate %378 by %c16_i32_167 dim 1 : vector<32x256xf32>, i32 -> vector<32x256xf32>
    %386 = vector.broadcast %247 : vector<1x256xf32> to vector<32x256xf32>
    %387 = arith.mulf %386, %385 : vector<32x256xf32>
    %388 = arith.addf %384, %387 : vector<32x256xf32>
    %c240_i32_168 = arith.constant 240 : i32
    %389 = tpu.dynamic_rotate %378 by %c240_i32_168 dim 1 : vector<32x256xf32>, i32 -> vector<32x256xf32>
    %390 = vector.broadcast %254 : vector<1x256xf32> to vector<32x256xf32>
    %391 = arith.mulf %390, %389 : vector<32x256xf32>
    %392 = arith.addf %388, %391 : vector<32x256xf32>
    %c17_i32_169 = arith.constant 17 : i32
    %393 = tpu.dynamic_rotate %392 by %c17_i32_169 dim 1 : vector<32x256xf32>, i32 -> vector<32x256xf32>
    %394 = vector.broadcast %22 : vector<1x256xf32> to vector<32x256xf32>
    %395 = arith.mulf %393, %394 : vector<32x256xf32>
    %396 = arith.truncf %395 : vector<32x256xf32> to vector<32x256xbf16>
    %c0_170 = arith.constant 0 : index
    %c0_171 = arith.constant 0 : index
    %397 = vector.load %arg9[%c0_170, %c0_171] : memref<288x256xbf16, #tpu.memory_space<vmem>>, vector<32x256xbf16>
    tpu.vector_store %arg9[%c0_170, %c0_171], %396 {strides = array<i32>} : memref<288x256xbf16, #tpu.memory_space<vmem>>, vector<32x256xbf16>,
    %c16_i32_172 = arith.constant 16 : i32
    %398 = tpu.dynamic_rotate %392 by %c16_i32_172 dim 1 : vector<32x256xf32>, i32 -> vector<32x256xf32>
    %399 = vector.broadcast %43 : vector<1x256xf32> to vector<32x256xf32>
    %400 = arith.mulf %398, %399 : vector<32x256xf32>
    %401 = arith.truncf %400 : vector<32x256xf32> to vector<32x256xbf16>
    %c32_173 = arith.constant 32 : index
    %c0_174 = arith.constant 0 : index
    %402 = vector.load %arg9[%c32_173, %c0_174] : memref<288x256xbf16, #tpu.memory_space<vmem>>, vector<32x256xbf16>
    tpu.vector_store %arg9[%c32_173, %c0_174], %401 {strides = array<i32>} : memref<288x256xbf16, #tpu.memory_space<vmem>>, vector<32x256xbf16>,
    %c15_i32_175 = arith.constant 15 : i32
    %403 = tpu.dynamic_rotate %392 by %c15_i32_175 dim 1 : vector<32x256xf32>, i32 -> vector<32x256xf32>
    %404 = vector.broadcast %64 : vector<1x256xf32> to vector<32x256xf32>
    %405 = arith.mulf %403, %404 : vector<32x256xf32>
    %406 = arith.truncf %405 : vector<32x256xf32> to vector<32x256xbf16>
    %c64_176 = arith.constant 64 : index
    %c0_177 = arith.constant 0 : index
    %407 = vector.load %arg9[%c64_176, %c0_177] : memref<288x256xbf16, #tpu.memory_space<vmem>>, vector<32x256xbf16>
    tpu.vector_store %arg9[%c64_176, %c0_177], %406 {strides = array<i32>} : memref<288x256xbf16, #tpu.memory_space<vmem>>, vector<32x256xbf16>,
    %c1_i32_178 = arith.constant 1 : i32
    %408 = tpu.dynamic_rotate %392 by %c1_i32_178 dim 1 : vector<32x256xf32>, i32 -> vector<32x256xf32>
    %409 = vector.broadcast %85 : vector<1x256xf32> to vector<32x256xf32>
    %410 = arith.mulf %408, %409 : vector<32x256xf32>
    %411 = arith.truncf %410 : vector<32x256xf32> to vector<32x256xbf16>
    %c96_179 = arith.constant 96 : index
    %c0_180 = arith.constant 0 : index
    %412 = vector.load %arg9[%c96_179, %c0_180] : memref<288x256xbf16, #tpu.memory_space<vmem>>, vector<32x256xbf16>
    tpu.vector_store %arg9[%c96_179, %c0_180], %411 {strides = array<i32>} : memref<288x256xbf16, #tpu.memory_space<vmem>>, vector<32x256xbf16>,
    %413 = vector.broadcast %106 : vector<1x256xf32> to vector<32x256xf32>
    %414 = arith.mulf %392, %413 : vector<32x256xf32>
    %415 = arith.truncf %414 : vector<32x256xf32> to vector<32x256xbf16>
    %c128_181 = arith.constant 128 : index
    %c0_182 = arith.constant 0 : index
    %416 = vector.load %arg9[%c128_181, %c0_182] : memref<288x256xbf16, #tpu.memory_space<vmem>>, vector<32x256xbf16>
    tpu.vector_store %arg9[%c128_181, %c0_182], %415 {strides = array<i32>} : memref<288x256xbf16, #tpu.memory_space<vmem>>, vector<32x256xbf16>,
    %c255_i32_183 = arith.constant 255 : i32
    %417 = tpu.dynamic_rotate %392 by %c255_i32_183 dim 1 : vector<32x256xf32>, i32 -> vector<32x256xf32>
    %418 = vector.broadcast %127 : vector<1x256xf32> to vector<32x256xf32>
    %419 = arith.mulf %417, %418 : vector<32x256xf32>
    %420 = arith.truncf %419 : vector<32x256xf32> to vector<32x256xbf16>
    %c160 = arith.constant 160 : index
    %c0_184 = arith.constant 0 : index
    %421 = vector.load %arg9[%c160, %c0_184] : memref<288x256xbf16, #tpu.memory_space<vmem>>, vector<32x256xbf16>
    tpu.vector_store %arg9[%c160, %c0_184], %420 {strides = array<i32>} : memref<288x256xbf16, #tpu.memory_space<vmem>>, vector<32x256xbf16>,
    %c241_i32_185 = arith.constant 241 : i32
    %422 = tpu.dynamic_rotate %392 by %c241_i32_185 dim 1 : vector<32x256xf32>, i32 -> vector<32x256xf32>
    %423 = vector.broadcast %148 : vector<1x256xf32> to vector<32x256xf32>
    %424 = arith.mulf %422, %423 : vector<32x256xf32>
    %425 = arith.truncf %424 : vector<32x256xf32> to vector<32x256xbf16>
    %c192 = arith.constant 192 : index
    %c0_186 = arith.constant 0 : index
    %426 = vector.load %arg9[%c192, %c0_186] : memref<288x256xbf16, #tpu.memory_space<vmem>>, vector<32x256xbf16>
    tpu.vector_store %arg9[%c192, %c0_186], %425 {strides = array<i32>} : memref<288x256xbf16, #tpu.memory_space<vmem>>, vector<32x256xbf16>,
    %c240_i32_187 = arith.constant 240 : i32
    %427 = tpu.dynamic_rotate %392 by %c240_i32_187 dim 1 : vector<32x256xf32>, i32 -> vector<32x256xf32>
    %428 = vector.broadcast %169 : vector<1x256xf32> to vector<32x256xf32>
    %429 = arith.mulf %427, %428 : vector<32x256xf32>
    %430 = arith.truncf %429 : vector<32x256xf32> to vector<32x256xbf16>
    %c224 = arith.constant 224 : index
    %c0_188 = arith.constant 0 : index
    %431 = vector.load %arg9[%c224, %c0_188] : memref<288x256xbf16, #tpu.memory_space<vmem>>, vector<32x256xbf16>
    tpu.vector_store %arg9[%c224, %c0_188], %430 {strides = array<i32>} : memref<288x256xbf16, #tpu.memory_space<vmem>>, vector<32x256xbf16>,
    %c239_i32_189 = arith.constant 239 : i32
    %432 = tpu.dynamic_rotate %392 by %c239_i32_189 dim 1 : vector<32x256xf32>, i32 -> vector<32x256xf32>
    %433 = vector.broadcast %190 : vector<1x256xf32> to vector<32x256xf32>
    %434 = arith.mulf %432, %433 : vector<32x256xf32>
    %435 = arith.truncf %434 : vector<32x256xf32> to vector<32x256xbf16>
    %c256 = arith.constant 256 : index
    %c0_190 = arith.constant 0 : index
    %436 = vector.load %arg9[%c256, %c0_190] : memref<288x256xbf16, #tpu.memory_space<vmem>>, vector<32x256xbf16>
    tpu.vector_store %arg9[%c256, %c0_190], %435 {strides = array<i32>} : memref<288x256xbf16, #tpu.memory_space<vmem>>, vector<32x256xbf16>,
    %c0_191 = arith.constant 0 : index
    %c0_192 = arith.constant 0 : index
    %437 = vector.load %arg5[%c0_191, %c0_192] : memref<16x288xbf16, #tpu.memory_space<vmem>>, vector<16x288xbf16>
    %c0_193 = arith.constant 0 : index
    %c0_194 = arith.constant 0 : index
    %438 = vector.load %arg9[%c0_193, %c0_194] : memref<288x256xbf16, #tpu.memory_space<vmem>>, vector<288x256xbf16>
    %cst_195 = arith.constant dense<0.000000e+00> : vector<16x256xf32>
    %439 = tpu.matmul %437, %438, %cst_195 {dimension_numbers = #tpu.dot_dimension_numbers<[1], [0], [0], [1], [0, 0, 1, 1], [], []>} : vector<16x288xbf16>, vector<288x256xbf16>, vector<16x256xf32> -> vector<16x256xf32>
    %440 = vector.broadcast %257 : vector<16x1xf32> to vector<16x256xf32>
    %441 = arith.addf %439, %440 : vector<16x256xf32>
    %cst_196 = arith.constant 0.000000e+00 : f32
    %442 = vector.broadcast %cst_196 : f32 to vector<16x256xf32>
    %443 = arith.maximumf %441, %442 : vector<16x256xf32>
    %c17_i32_197 = arith.constant 17 : i32
    %444 = tpu.dynamic_rotate %443 by %c17_i32_197 dim 1 : vector<16x256xf32>, i32 -> vector<16x256xf32>
    %445 = vector.broadcast %22 : vector<1x256xf32> to vector<16x256xf32>
    %446 = arith.mulf %444, %445 : vector<16x256xf32>
    %447 = arith.truncf %446 : vector<16x256xf32> to vector<16x256xbf16>
    %c0_198 = arith.constant 0 : index
    %c0_199 = arith.constant 0 : index
    %448 = vector.load %arg9[%c0_198, %c0_199] : memref<288x256xbf16, #tpu.memory_space<vmem>>, vector<16x256xbf16>
    tpu.vector_store %arg9[%c0_198, %c0_199], %447 {strides = array<i32>} : memref<288x256xbf16, #tpu.memory_space<vmem>>, vector<16x256xbf16>,
    %c16_i32_200 = arith.constant 16 : i32
    %449 = tpu.dynamic_rotate %443 by %c16_i32_200 dim 1 : vector<16x256xf32>, i32 -> vector<16x256xf32>
    %450 = vector.broadcast %43 : vector<1x256xf32> to vector<16x256xf32>
    %451 = arith.mulf %449, %450 : vector<16x256xf32>
    %452 = arith.truncf %451 : vector<16x256xf32> to vector<16x256xbf16>
    %c16_201 = arith.constant 16 : index
    %c0_202 = arith.constant 0 : index
    %453 = vector.load %arg9[%c16_201, %c0_202] : memref<288x256xbf16, #tpu.memory_space<vmem>>, vector<16x256xbf16>
    tpu.vector_store %arg9[%c16_201, %c0_202], %452 {strides = array<i32>} : memref<288x256xbf16, #tpu.memory_space<vmem>>, vector<16x256xbf16>,
    %c15_i32_203 = arith.constant 15 : i32
    %454 = tpu.dynamic_rotate %443 by %c15_i32_203 dim 1 : vector<16x256xf32>, i32 -> vector<16x256xf32>
    %455 = vector.broadcast %64 : vector<1x256xf32> to vector<16x256xf32>
    %456 = arith.mulf %454, %455 : vector<16x256xf32>
    %457 = arith.truncf %456 : vector<16x256xf32> to vector<16x256xbf16>
    %c32_204 = arith.constant 32 : index
    %c0_205 = arith.constant 0 : index
    %458 = vector.load %arg9[%c32_204, %c0_205] : memref<288x256xbf16, #tpu.memory_space<vmem>>, vector<16x256xbf16>
    tpu.vector_store %arg9[%c32_204, %c0_205], %457 {strides = array<i32>} : memref<288x256xbf16, #tpu.memory_space<vmem>>, vector<16x256xbf16>,
    %c1_i32_206 = arith.constant 1 : i32
    %459 = tpu.dynamic_rotate %443 by %c1_i32_206 dim 1 : vector<16x256xf32>, i32 -> vector<16x256xf32>
    %460 = vector.broadcast %85 : vector<1x256xf32> to vector<16x256xf32>
    %461 = arith.mulf %459, %460 : vector<16x256xf32>
    %462 = arith.truncf %461 : vector<16x256xf32> to vector<16x256xbf16>
    %c48_207 = arith.constant 48 : index
    %c0_208 = arith.constant 0 : index
    %463 = vector.load %arg9[%c48_207, %c0_208] : memref<288x256xbf16, #tpu.memory_space<vmem>>, vector<16x256xbf16>
    tpu.vector_store %arg9[%c48_207, %c0_208], %462 {strides = array<i32>} : memref<288x256xbf16, #tpu.memory_space<vmem>>, vector<16x256xbf16>,
    %464 = vector.broadcast %106 : vector<1x256xf32> to vector<16x256xf32>
    %465 = arith.mulf %443, %464 : vector<16x256xf32>
    %466 = arith.truncf %465 : vector<16x256xf32> to vector<16x256xbf16>
    %c64_209 = arith.constant 64 : index
    %c0_210 = arith.constant 0 : index
    %467 = vector.load %arg9[%c64_209, %c0_210] : memref<288x256xbf16, #tpu.memory_space<vmem>>, vector<16x256xbf16>
    tpu.vector_store %arg9[%c64_209, %c0_210], %466 {strides = array<i32>} : memref<288x256xbf16, #tpu.memory_space<vmem>>, vector<16x256xbf16>,
    %c255_i32_211 = arith.constant 255 : i32
    %468 = tpu.dynamic_rotate %443 by %c255_i32_211 dim 1 : vector<16x256xf32>, i32 -> vector<16x256xf32>
    %469 = vector.broadcast %127 : vector<1x256xf32> to vector<16x256xf32>
    %470 = arith.mulf %468, %469 : vector<16x256xf32>
    %471 = arith.truncf %470 : vector<16x256xf32> to vector<16x256xbf16>
    %c80_212 = arith.constant 80 : index
    %c0_213 = arith.constant 0 : index
    %472 = vector.load %arg9[%c80_212, %c0_213] : memref<288x256xbf16, #tpu.memory_space<vmem>>, vector<16x256xbf16>
    tpu.vector_store %arg9[%c80_212, %c0_213], %471 {strides = array<i32>} : memref<288x256xbf16, #tpu.memory_space<vmem>>, vector<16x256xbf16>,
    %c241_i32_214 = arith.constant 241 : i32
    %473 = tpu.dynamic_rotate %443 by %c241_i32_214 dim 1 : vector<16x256xf32>, i32 -> vector<16x256xf32>
    %474 = vector.broadcast %148 : vector<1x256xf32> to vector<16x256xf32>
    %475 = arith.mulf %473, %474 : vector<16x256xf32>
    %476 = arith.truncf %475 : vector<16x256xf32> to vector<16x256xbf16>
    %c96_215 = arith.constant 96 : index
    %c0_216 = arith.constant 0 : index
    %477 = vector.load %arg9[%c96_215, %c0_216] : memref<288x256xbf16, #tpu.memory_space<vmem>>, vector<16x256xbf16>
    tpu.vector_store %arg9[%c96_215, %c0_216], %476 {strides = array<i32>} : memref<288x256xbf16, #tpu.memory_space<vmem>>, vector<16x256xbf16>,
    %c240_i32_217 = arith.constant 240 : i32
    %478 = tpu.dynamic_rotate %443 by %c240_i32_217 dim 1 : vector<16x256xf32>, i32 -> vector<16x256xf32>
    %479 = vector.broadcast %169 : vector<1x256xf32> to vector<16x256xf32>
    %480 = arith.mulf %478, %479 : vector<16x256xf32>
    %481 = arith.truncf %480 : vector<16x256xf32> to vector<16x256xbf16>
    %c112_218 = arith.constant 112 : index
    %c0_219 = arith.constant 0 : index
    %482 = vector.load %arg9[%c112_218, %c0_219] : memref<288x256xbf16, #tpu.memory_space<vmem>>, vector<16x256xbf16>
    tpu.vector_store %arg9[%c112_218, %c0_219], %481 {strides = array<i32>} : memref<288x256xbf16, #tpu.memory_space<vmem>>, vector<16x256xbf16>,
    %c239_i32_220 = arith.constant 239 : i32
    %483 = tpu.dynamic_rotate %443 by %c239_i32_220 dim 1 : vector<16x256xf32>, i32 -> vector<16x256xf32>
    %484 = vector.broadcast %190 : vector<1x256xf32> to vector<16x256xf32>
    %485 = arith.mulf %483, %484 : vector<16x256xf32>
    %486 = arith.truncf %485 : vector<16x256xf32> to vector<16x256xbf16>
    %c128_221 = arith.constant 128 : index
    %c0_222 = arith.constant 0 : index
    %487 = vector.load %arg9[%c128_221, %c0_222] : memref<288x256xbf16, #tpu.memory_space<vmem>>, vector<16x256xbf16>
    tpu.vector_store %arg9[%c128_221, %c0_222], %486 {strides = array<i32>} : memref<288x256xbf16, #tpu.memory_space<vmem>>, vector<16x256xbf16>,
    %c0_223 = arith.constant 0 : index
    %c0_224 = arith.constant 0 : index
    %488 = vector.load %arg6[%c0_223, %c0_224] : memref<16x144xbf16, #tpu.memory_space<vmem>>, vector<16x144xbf16>
    %c0_225 = arith.constant 0 : index
    %c0_226 = arith.constant 0 : index
    %489 = vector.load %arg9[%c0_225, %c0_226] : memref<288x256xbf16, #tpu.memory_space<vmem>>, vector<144x256xbf16>
    %cst_227 = arith.constant dense<0.000000e+00> : vector<16x256xf32>
    %490 = tpu.matmul %488, %489, %cst_227 {dimension_numbers = #tpu.dot_dimension_numbers<[1], [0], [0], [1], [0, 0, 1, 1], [], []>} : vector<16x144xbf16>, vector<144x256xbf16>, vector<16x256xf32> -> vector<16x256xf32>
    %491 = vector.broadcast %258 : vector<16x1xf32> to vector<16x256xf32>
    %492 = arith.addf %490, %491 : vector<16x256xf32>
    %cst_228 = arith.constant 0.000000e+00 : f32
    %493 = vector.broadcast %cst_228 : f32 to vector<16x256xf32>
    %494 = arith.maximumf %492, %493 : vector<16x256xf32>
    %495 = vector.broadcast %259 : vector<16x1xf32> to vector<16x256xf32>
    %496 = arith.mulf %495, %494 : vector<16x256xf32>
    %cst_229 = arith.constant dense<0.000000e+00> : vector<256xf32>
    %497 = vector.multi_reduction <add>, %496, %cst_229 [0] : vector<16x256xf32> to vector<256xf32>
    %498 = vector.shape_cast %497 : vector<256xf32> to vector<1x256xf32>
    %499 = vector.broadcast %260 : vector<1x1xf32> to vector<1x256xf32>
    %500 = arith.addf %498, %499 : vector<1x256xf32>
    %cst_230 = arith.constant 0.000000e+00 : f32
    %501 = vector.broadcast %cst_230 : f32 to vector<1x256xf32>
    %502 = arith.maximumf %500, %501 : vector<1x256xf32>
    %c0_231 = arith.constant 0 : index
    %c0_232 = arith.constant 0 : index
    %c0_233 = arith.constant 0 : index
    %503 = vector.load %arg8[%c0_231, %c0_232, %c0_233] : memref<1x1x256xf32, #tpu.memory_space<vmem>>, vector<1x1x256xf32>
    %504 = vector.shape_cast %503 : vector<1x1x256xf32> to vector<1x256xf32>
    %505 = vector.shape_cast %502 : vector<1x256xf32> to vector<1x1x256xf32>
    tpu.vector_store %arg8[%c0_231, %c0_232, %c0_233], %505 {strides = array<i32>} : memref<1x1x256xf32, #tpu.memory_space<vmem>>, vector<1x1x256xf32>,
    return
  }
  func.func @transform_0(%arg0: i32) -> (i32, i32, i32) {
    %c0_i32 = arith.constant 0 : i32
    %c0_i32_0 = arith.constant 0 : i32
    %c0_i32_1 = arith.constant 0 : i32
    return %arg0, %c0_i32, %c0_i32_0 : i32, i32, i32
  }
  func.func @transform_1(%arg0: i32) -> (i32, i32) {
    %c0_i32 = arith.constant 0 : i32
    %c0_i32_0 = arith.constant 0 : i32
    %c0_i32_1 = arith.constant 0 : i32
    return %c0_i32, %c0_i32_0 : i32, i32
  }
  func.func @transform_2(%arg0: i32) -> (i32, i32) {
    %c0_i32 = arith.constant 0 : i32
    %c0_i32_0 = arith.constant 0 : i32
    %c0_i32_1 = arith.constant 0 : i32
    return %c0_i32, %c0_i32_0 : i32, i32
  }
  func.func @transform_3(%arg0: i32) -> (i32, i32) {
    %c0_i32 = arith.constant 0 : i32
    %c0_i32_0 = arith.constant 0 : i32
    %c0_i32_1 = arith.constant 0 : i32
    return %c0_i32, %c0_i32_0 : i32, i32
  }
  func.func @transform_4(%arg0: i32) -> (i32, i32) {
    %c0_i32 = arith.constant 0 : i32
    %c0_i32_0 = arith.constant 0 : i32
    %c0_i32_1 = arith.constant 0 : i32
    return %c0_i32, %c0_i32_0 : i32, i32
  }
  func.func @transform_5(%arg0: i32) -> (i32, i32) {
    %c0_i32 = arith.constant 0 : i32
    %c0_i32_0 = arith.constant 0 : i32
    %c0_i32_1 = arith.constant 0 : i32
    return %c0_i32, %c0_i32_0 : i32, i32
  }
  func.func @transform_6(%arg0: i32) -> (i32, i32) {
    %c0_i32 = arith.constant 0 : i32
    %c0_i32_0 = arith.constant 0 : i32
    %c0_i32_1 = arith.constant 0 : i32
    return %c0_i32, %c0_i32_0 : i32, i32
  }
  func.func @transform_7(%arg0: i32) -> (i32, i32, i32) {
    %c0_i32 = arith.constant 0 : i32
    %c0_i32_0 = arith.constant 0 : i32
    %c0_i32_1 = arith.constant 0 : i32
    return %arg0, %c0_i32, %c0_i32_0 : i32, i32, i32
  }
}

</mosaic_0001>

<bundles_post_ra>
// kernel: midas_forward.1
= control target key start
LH: loop header
LB: loop body
LE: loop exit
PB: predicated region body
PF: predicated region fallthrough
CT: control target
= control target key end

     0   :  { %s3270_s24 = smov 0   ;;  %s4785_s0 = inlined_call_operand.vmem [shape: f32[2,16,256], index: 0, kind: input, shape index: {}]   ;;  %s4786_s1 = inlined_call_operand.vmem [shape: s32[2,256], index: 1, kind: input, shape index: {}]   ;;  %s4787_s2 = inlined_call_operand.vmem [shape: bf16[16,144], index: 2, kind: input, shape index: {}]   ;;  %s4788_s3 = inlined_call_operand.vmem [shape: bf16[32,144], index: 3, kind: input, shape index: {}]   ;;  %s4789_s4 = inlined_call_operand.vmem [shape: bf16[16,288], index: 4, kind: input, shape index: {}]   ;;  %s4790_s5 = inlined_call_operand.vmem [shape: bf16[16,144], index: 5, kind: input, shape index: {}]   ;;  %s4791_s6 = inlined_call_operand.vmem [shape: f32[32,8], index: 6, kind: input, shape index: {}]   ;;  %s4792_s7 = inlined_call_operand.vmem [shape: f32[2,1,256], index: 7, kind: output, shape index: {}]  }
   0x1 LB: > { %s2623_s25 = sadd.s32 4294967295, %s3209_s24   ;;  %p2627_p0 = scmp.ge.s32.totalorder %s3209_s24, 1  ;;  %s3209_s24 = sphi %s3270_s24, %s17_s24  }
   0x2   : > { %p237_p1 = scmp.lt.s32.totalorder %s3209_s24, 3 }
   0x4   : > { %p238_p2 = pnand %p2627_p0, %p237_p1 }
   0x5   : > { %p268_p3 = scmp.lt.s32.totalorder (!%p238_p2), %s2623_s25, 1  ;;  %s3211_s30 = smov (!%p238_p2), 112  }
   0x6   : > { %241 = sbr.rel (%p238_p2) target bundleno = 1802 (0x70a), region = 48  ;;  %s3212_s8 = smov (!%p238_p2), 113  }
   0x7   : > { %s3213_s9 = smov (!%p238_p2), 127   ;;  %s3214_s10 = smov (!%p238_p2), 1  }
   0x8   : > { %s3215_s11 = smov (!%p238_p2), 15   ;;  %s3216_s12 = smov (!%p238_p2), 16  }
   0x9   : > { %s3217_s13 = smov (!%p238_p2), 17   ;;  %s3218_s14 = smov (!%p238_p2), 111  }
   0xa   : > { %s3222_s27 = smov (!%p238_p2), 2   ;;  %s3225_s15 = smov (!%p238_p2), 32  }
   0xb   : > { %s4818_s25 = smov (!%p268_p3, %s2623_s25), 1  ;;  %v3359_v4 = vld [vmem:[%s4786_s1] ss:$2 sm:$0x3]  ;;  %v383_v9 = vlaneseq  ;;  %v3219_v13 = vmov 0.0  }
   0xc   : > { %s3057_s26 = sshll.u32 %s4818_s25, 5  ;;  %v320_v5 = vadd.s32 1, %v3359_v4  ;;  %v3367_v7 = vld [vmem:[%s4786_s1 + $0x1] ss:$2 sm:$0x3]  ;;  %vm305_vm6 = vcmp.ge.s32.totalorder %v3359_v4, 0 }
   0xd   : > { %s272_s29 = scalar_lea.vmem %s4785_s0, %s3057_s26  ;;  %vm292_vm2 = vcmp.ge.s32.totalorder %v3367_v7, 0  ;;  %vm294_vm4 = vcmp.lt.s32.totalorder %v3367_v7, 16  ;;  %vm306_vm7 = vcmp.lt.s32.totalorder %v3359_v4, 16  ;;  %v3388_v12 = vand.u32 127, %v383_v9  ;;  %s2630_s23 = sshll.u32 %s4818_s25, 1 }
   0xe   : > { %v3284_v0 = vld [vmem:[%s272_s29 + $0x8] sm:$0xff]  ;;  %v3286_v1 = vld [vmem:[%s272_s29] sm:$0xff]  ;;  %v3294_v2 = vld [vmem:[%s272_s29 + $0x18] sm:$0xff]  ;;  %vm321_vm0 = vcmp.ge.s32.totalorder %v320_v5, 0  ;;  %vm322_vm1 = vcmp.lt.s32.totalorder %v320_v5, 16  ;;  %v3403_v17 = vadd.s32 4294967295, %v3367_v7  ;;  %s276_s28 = scalar_lea.vmem %s4792_s7, %s2630_s23 }
   0xf   : > { %550 = vrot.lane.b32.xlu1 %v3284_v0, %s3211_s30  ;;  %546 = vrot.lane.b32.xlu0 %v3286_v1, %s3211_s30  ;;  %v3296_v3 = vld [vmem:[%s272_s29 + $0x10] sm:$0xff]  ;;  %vm3370_vm3 = vmand %vm321_vm0, %vm322_vm1  ;;  %vm554_vm12 = vcmp.lt.s32.totalorder %v3388_v12, 112  ;;  %v3425_v29 = vadd.s32 1, %v3367_v7 }
  0x10   : > { %520 = vrot.lane.b32.xlu2 %v3286_v1, %s3212_s8  ;;  %vm328_vm5 = vmand %vm3370_vm3, %vm292_vm2  ;;  %vm286_vm13 = vcmp.ge.s32.totalorder %v3403_v17, 0  ;;  %vm288_vm14 = vcmp.lt.s32.totalorder %v3403_v17, 16 }
  0x11   : > { %vm329_vm8 = vmand %vm328_vm5, %vm294_vm4  ;;  %vm299_vm1 = vcmp.ge.s32.totalorder %v3425_v29, 0  ;;  %vm301_vm5 = vcmp.lt.s32.totalorder %v3425_v29, 16 }
  0x12   : > { %vm3383_vm9 = vmand %vm305_vm6, %vm306_vm7  ;;  %v2639_v14 = vsel %vm329_vm8, 1.0, %v3219_v13  ;;  %vm528_vm7 = vcmp.lt.s32.totalorder %v3388_v12, 113 }
  0x13   : > { %vm312_vm10 = vmand %vm3383_vm9, %vm292_vm2  ;;  %v3398_v15 = vperm.slane %v2639_v14, 0  ;;  %v3400_v16 = vperm.slane %v2639_v14, 1  ;;  %v281_v14 = vadd.s32 4294967295, %v3359_v4 }
  0x14   : > { %vm313_vm11 = vmand %vm312_vm10, %vm294_vm4 }
  0x15   : > { %v2636_v20 = vsel %vm313_vm11, 1.0, %v3219_v13  ;;  %vm324_vm15 = vmand %vm3370_vm3, %vm286_vm13  ;;  %vm502_vm11 = vcmp.lt.s32.totalorder %v3388_v12, 127 }
  0x16   : > { %v3415_v26 = vperm.slane %v2636_v20, 0  ;;  %v3417_v27 = vperm.slane %v2636_v20, 1  ;;  %vm325_vm0 = vmand %vm324_vm15, %vm288_vm14 }
  0x17   : > { %552 = vrot.lane.b32.xlu1 %v3294_v2, %s3211_s30  ;;  %548 = vrot.lane.b32.xlu0 %v3296_v3, %s3211_s30  ;;  %v2638_v42 = vsel %vm325_vm0, 1.0, %v3219_v13  ;;  %vm316_vm6 = vmand %vm3383_vm9, %vm299_vm1  ;;  %vm282_vm0 = vcmp.ge.s32.totalorder %v281_v14, 0 }
  0x18   : > { %522 = vrot.lane.b32.xlu2 %v3296_v3, %s3212_s8  ;;  %v486_v30 = vmul.f32 %v3415_v26, %v3286_v1  ;;  %v487_v31 = vmul.f32 %v3417_v27, %v3284_v0  ;;  %v488_v32 = vmul.f32 %v3415_v26, %v3296_v3  ;;  %v489_v33 = vmul.f32 %v3417_v27, %v3294_v2  ;;  %vm317_vm8 = vmand %vm316_vm6, %vm301_vm5 }
  0x19   : > { %v3451_v45 = vperm.slane %v2638_v42, 0  ;;  %v3453_v46 = vperm.slane %v2638_v42, 1  ;;  %vm308_vm10 = vmand %vm3383_vm9, %vm286_vm13  ;;  %v2637_v57 = vsel %vm317_vm8, 1.0, %v3219_v13  ;;  %vm463_vm9 = vcmp.lt.s32.totalorder %v3388_v12, 1 }
  0x1a   : > { %v490_v38 = vpack.c.bf16 %v487_v31, %v486_v30  ;;  %v491_v39 = vpack.c.bf16 %v489_v33, %v488_v32  ;;  %vm309_vm15 = vmand %vm308_vm10, %vm288_vm14  ;;  %vm283_vm6 = vcmp.lt.s32.totalorder %v281_v14, 16 }
  0x1b   : > { %v2635_v11 = vsel %vm309_vm15, 1.0, %v3219_v13  ;;  %vm3504_vm8 = vmand %vm282_vm0, %vm283_vm6  ;;  %vm437_vm6 = vcmp.lt.s32.totalorder %v3388_v12, 15 }
  0x1c   : > { %492 = vst [vmem:[#allocation2 + $0x40] sm:$0xff] %v490_v38  ;;  %v3500_v31 = vperm.slane %v2635_v11, 0  ;;  %vm3518_vm10 = vmand %vm3504_vm8, %vm299_vm1 }
  0x1d   : > { %493 = vst [vmem:[#allocation2 + $0x48] sm:$0xff] %v491_v39  ;;  %vm302_vm15 = vmand %vm3518_vm10, %vm301_vm5 }
  0x1e   : > { %vm293_vm0 = vmand %vm3504_vm8, %vm292_vm2 }
  0x1f   : > { %526 = vrot.lane.b32.xlu1 %v3294_v2, %s3212_s8  ;;  %524 = vrot.lane.b32.xlu0 %v3284_v0, %s3212_s8  ;;  %vm295_vm10 = vmand %vm293_vm0, %vm294_vm4  ;;  %vm411_vm4 = vcmp.lt.s32.totalorder %v3388_v12, 16 }
  0x20   : > { %494 = vrot.lane.b32.xlu2 %v3286_v1, %s3213_s9  ;;  %vm287_vm2 = vmand %vm3504_vm8, %vm286_vm13  ;;  %vm385_vm13 = vcmp.lt.s32.totalorder %v3388_v12, 17 }
  0x27   : > { %498 = vrot.lane.b32.xlu1 %v3284_v0, %s3213_s9  ;;  %496 = vrot.lane.b32.xlu0 %v3296_v3, %s3213_s9 }
  0x28   : > { %500 = vrot.lane.b32.xlu2 %v3294_v2, %s3213_s9 }
  0x2f   : > { %457 = vrot.lane.b32.xlu1 %v3296_v3, %s3214_s10  ;;  %455 = vrot.lane.b32.xlu0 %v3286_v1, %s3214_s10 }
  0x30   : > { %459 = vrot.lane.b32.xlu2 %v3284_v0, %s3214_s10 }
  0x37   : > { %429 = vrot.lane.b32.xlu1 %v3286_v1, %s3215_s11  ;;  %461 = vrot.lane.b32.xlu0 %v3294_v2, %s3214_s10 }
  0x38   : > { %431 = vrot.lane.b32.xlu2 %v3296_v3, %s3215_s11 }
  0x3f   : > { %435 = vrot.lane.b32.xlu1 %v3294_v2, %s3215_s11  ;;  %433 = vrot.lane.b32.xlu0 %v3284_v0, %s3215_s11 }
  0x40   : > { %403 = vrot.lane.b32.xlu2 %v3286_v1, %s3216_s12 }
  0x47   : > { %407 = vrot.lane.b32.xlu1 %v3284_v0, %s3216_s12  ;;  %405 = vrot.lane.b32.xlu0 %v3296_v3, %s3216_s12 }
  0x48   : > { %409 = vrot.lane.b32.xlu2 %v3294_v2, %s3216_s12 }
  0x4f   : > { %377 = vrot.lane.b32.xlu1 %v3296_v3, %s3217_s13  ;;  %375 = vrot.lane.b32.xlu0 %v3286_v1, %s3217_s13 }
  0x50   : > { %379 = vrot.lane.b32.xlu2 %v3284_v0, %s3217_s13 }
  0x57   : > { %572 = vrot.lane.b32.xlu1 %v3286_v1, %s3218_s14  ;;  %381 = vrot.lane.b32.xlu0 %v3294_v2, %s3217_s13  ;;  %v3479_v1 = vperm.slane %v2637_v57, 0 }
  0x58   : > { %574 = vrot.lane.b32.xlu2 %v3296_v3, %s3218_s14 }
  0x5f   : > { %578 = vrot.lane.b32.xlu1 %v3294_v2, %s3218_s14  ;;  %576 = vrot.lane.b32.xlu0 %v3284_v0, %s3218_s14  ;;  %v3481_v2 = vperm.slane %v2637_v57, 1 }
  0x6a   : > { %v3362_v6 = vpop.permute.xlu2 %520 }
  0x72   : > { %v523_v10 = vpop.permute.xlu2 %522 }
  0x7a   : > { %v3410_v23 = vpop.permute.xlu2 %494 }
  0x81   : > { %v551_v18 = vpop.permute.xlu1 %550  ;;  %v547_v19 = vpop.permute.xlu0 %546 }
  0x82   : > { %v555_v21 = vsel %vm554_vm12, %v547_v19, %v551_v18  ;;  %v557_v22 = vsel %vm554_vm12, %v551_v18, %v547_v19  ;;  %v501_v43 = vpop.permute.xlu2 %500 }
  0x83   : > { %v564_v24 = vmul.f32 %v3398_v15, %v555_v21  ;;  %v565_v25 = vmul.f32 %v3400_v16, %v557_v22 }
  0x85   : > { %v568_v28 = vpack.c.bf16 %v565_v25, %v564_v24 }
  0x87   : > { %570 = vst [vmem:[#allocation2 + $0x70] sm:$0xff] %v568_v28 }
  0x89   : > { %v553_v34 = vpop.permute.xlu1 %552  ;;  %v549_v35 = vpop.permute.xlu0 %548 }
  0x8a   : > { %v556_v36 = vsel %vm554_vm12, %v549_v35, %v553_v34  ;;  %v558_v37 = vsel %vm554_vm12, %v553_v34, %v549_v35  ;;  %v460_v0 = vpop.permute.xlu2 %459  ;;  %v3502_v35 = vperm.slane %v2635_v11, 1  ;;  %v2634_v11 = vsel %vm302_vm15, 1.0, %v3219_v13  ;;  %vm289_vm15 = vmand %vm287_vm2, %vm288_vm14 }
  0x8b   : > { %v566_v40 = vmul.f32 %v3398_v15, %v556_v36  ;;  %v567_v41 = vmul.f32 %v3400_v16, %v558_v37  ;;  %vm332_vm14 = vmand %vm3370_vm3, %vm299_vm1  ;;  %vm4794_vm3 = vcmp.lt.s32.totalorder %v3388_v12, 111  ;;  %vm4793_vm1 = vcmask 130048  }
  0x8c   : > { %vm333_vm8 = vmand %vm332_vm14, %vm301_vm5  ;;  %vm3223_vm14 = vmmov 1  }
  0x8d   : > { %v569_v44 = vpack.c.bf16 %v567_v41, %v566_v40 }
  0x8e   : > { %v2707_v60 = vld [vmem:[#allocation2 + $0x70] sm:$0xf]  ;;  %v3074_v62 = vld [vmem:[#allocation2 + $0x74] sm:$0xf] }
  0x8f   : > { %571 = vst [vmem:[#allocation2 + $0x78] sm:$0xff] %v569_v44 }
  0x91   : > { %v527_v47 = vpop.permute.xlu1 %526  ;;  %v525_v48 = vpop.permute.xlu0 %524 }
  0x92   : > { %v530_v49 = vsel %vm528_vm7, %v523_v10, %v527_v47  ;;  %v532_v50 = vsel %vm528_vm7, %v527_v47, %v523_v10  ;;  %v529_v51 = vsel %vm528_vm7, %v3362_v6, %v525_v48  ;;  %v531_v52 = vsel %vm528_vm7, %v525_v48, %v3362_v6  ;;  %v432_v38 = vpop.permute.xlu2 %431 }
  0x93   : > { %v540_v53 = vmul.f32 %v3451_v45, %v530_v49  ;;  %v541_v54 = vmul.f32 %v3453_v46, %v532_v50  ;;  %v538_v55 = vmul.f32 %v3451_v45, %v529_v51  ;;  %v539_v56 = vmul.f32 %v3453_v46, %v531_v52  ;;  %v2683_v50 = vld [vmem:[#allocation2 + $0x40] sm:$0xf]  ;;  %v3069_v51 = vld [vmem:[#allocation2 + $0x44] sm:$0xf0]  ;;  %v3068_v52 = vld [vmem:[#allocation2 + $0x44] sm:$0xf] }
  0x95   : > { %v543_v58 = vpack.c.bf16 %v541_v54, %v540_v53  ;;  %v542_v59 = vpack.c.bf16 %v539_v56, %v538_v55  ;;  %v2685_v55 = vld [vmem:[#allocation2 + $0x48] sm:$0xf0] }
  0x96   : > { %v3075_v61 = vld [vmem:[#allocation2 + $0x74] sm:$0xf0]  ;;  %v2709_v63 = vld [vmem:[#allocation2 + $0x78] sm:$0xf0] }
  0x97   : > { %545 = vst [vmem:[#allocation2 + $0x68] sm:$0xff] %v543_v58  ;;  %v2708_v3 = vor.u32 %v3075_v61, %v2707_v60  ;;  %v2712_v5 = vor.u32 %v3074_v62, %v2709_v63  ;;  %v2684_v62 = vor.u32 %v3069_v51, %v2683_v50 }
  0x98   : > { %544 = vst [vmem:[#allocation2 + $0x60] sm:$0xff] %v542_v59 }
  0x99   : > { %v499_v6 = vpop.permute.xlu1 %498  ;;  %731 = vmatpush.bf16.msra.mxu0 %v2708_v3  ;;  %759 = vmatpush.bf16.msra.mxu2 %v2712_v5  ;;  %v497_v10 = vpop.permute.xlu0 %496  ;;  %v2688_v3 = vor.u32 %v3068_v52, %v2685_v55 }
  0x9a   : > { %v503_v18 = vsel %vm502_vm11, %v3410_v23, %v499_v6  ;;  %v505_v19 = vsel %vm502_vm11, %v499_v6, %v3410_v23  ;;  %v504_v20 = vsel %vm502_vm11, %v497_v10, %v501_v43  ;;  %v506_v21 = vsel %vm502_vm11, %v501_v43, %v497_v10  ;;  %v404_v10 = vpop.permute.xlu2 %403 }
  0x9b   : > { %v512_v22 = vmul.f32 %v3479_v1, %v503_v18  ;;  %v513_v24 = vmul.f32 %v3481_v2, %v505_v19  ;;  %v514_v4 = vmul.f32 %v3479_v1, %v504_v20  ;;  %v515_v25 = vmul.f32 %v3481_v2, %v506_v21 }
  0x9c   : > { %v3538_v18 = vperm.slane %v2634_v11, 0  ;;  %v3540_v19 = vperm.slane %v2634_v11, 1 }
  0x9d   : > { %v516_v28 = vpack.c.bf16 %v513_v24, %v512_v22  ;;  %v517_v30 = vpack.c.bf16 %v515_v25, %v514_v4 }
  0x9e   : > { %v3073_v23 = vld [vmem:[#allocation2 + $0x64] sm:$0xf0]  ;;  %v2701_v32 = vld [vmem:[#allocation2 + $0x68] sm:$0xf0] }
  0x9f   : > { %518 = vst [vmem:[#allocation2 + $0x50] sm:$0xff] %v516_v28  ;;  %v2699_v33 = vld [vmem:[#allocation2 + $0x60] sm:$0xf]  ;;  %v3072_v34 = vld [vmem:[#allocation2 + $0x64] sm:$0xf] }
  0xa0   : > { %519 = vst [vmem:[#allocation2 + $0x58] sm:$0xff] %v517_v30  ;;  %v2700_v36 = vor.u32 %v3073_v23, %v2699_v33  ;;  %v2704_v37 = vor.u32 %v3072_v34, %v2701_v32  ;;  %v2633_v32 = vsel %vm295_vm10, 1.0, %v3219_v13 }
  0xa1   : > { %v458_v39 = vpop.permute.xlu1 %457  ;;  %v456_v40 = vpop.permute.xlu0 %455  ;;  %v3564_v41 = vperm.slane %v2633_v32, 0 }
  0xa2   : > { %732 = vmatpush.bf16.msra.mxu0 %v2700_v36  ;;  %760 = vmatpush.bf16.msra.mxu2 %v2704_v37  ;;  %v464_v42 = vsel %vm463_vm9, %v456_v40, %v460_v0  ;;  %v466_v43 = vsel %vm463_vm9, %v460_v0, %v456_v40  ;;  %v410_v36 = vpop.permute.xlu2 %409 }
  0xa3   : > { %v473_v44 = vmul.f32 %v3500_v31, %v466_v43  ;;  %v474_v47 = vmul.f32 %v3502_v35, %v464_v42  ;;  %v3566_v42 = vperm.slane %v2633_v32, 1 }
  0xa5   : > { %v477_v49 = vpack.c.bf16 %v474_v47, %v473_v44 }
  0xa6   : > { %v2691_v53 = vld [vmem:[#allocation2 + $0x50] sm:$0xf]  ;;  %v3070_v54 = vld [vmem:[#allocation2 + $0x54] sm:$0xf] }
  0xa7   : > { %479 = vst [vmem:[#allocation2 + $0x30] sm:$0xff] %v477_v49  ;;  %v3071_v56 = vld [vmem:[#allocation2 + $0x54] sm:$0xf0]  ;;  %v2693_v57 = vld [vmem:[#allocation2 + $0x58] sm:$0xf0]  ;;  %v2632_v49 = vsel %vm289_vm15, 1.0, %v3219_v13 }
  0xa8   : > { %v2692_v58 = vor.u32 %v3071_v56, %v2691_v53  ;;  %v2696_v59 = vor.u32 %v3070_v54, %v2693_v57 }
  0xa9   : > { %v430_v60 = vpop.permute.xlu1 %429  ;;  %v462_v61 = vpop.permute.xlu0 %461 }
  0xaa   : > { %733 = vmatpush.bf16.msra.mxu0 %v2692_v58  ;;  %761 = vmatpush.bf16.msra.mxu2 %v2696_v59  ;;  %v465_v63 = vsel %vm463_vm9, %v458_v39, %v462_v61  ;;  %v467_v0 = vsel %vm463_vm9, %v462_v61, %v458_v39  ;;  %v3582_v59 = vperm.slane %v2632_v49, 0 }
  0xab   : > { %v475_v5 = vmul.f32 %v3500_v31, %v467_v0  ;;  %v476_v6 = vmul.f32 %v3502_v35, %v465_v63  ;;  %v3584_v63 = vperm.slane %v2632_v49, 1 }
  0xad   : > { %v478_v14 = vpack.c.bf16 %v476_v6, %v475_v5 }
  0xae   : > { %734 = vmatpush.bf16.msra.mxu0 %v2684_v62  ;;  %762 = vmatpush.bf16.msra.mxu2 %v2688_v3  ;;  %v2675_v37 = vld [vmem:[#allocation2 + $0x30] sm:$0xf]  ;;  %v3066_v39 = vld [vmem:[#allocation2 + $0x34] sm:$0xf]  ;;  %v380_v62 = vpop.permute.xlu2 %379 }
  0xaf   : > { %480 = vst [vmem:[#allocation2 + $0x38] sm:$0xff] %v478_v14 }
  0xb1   : > { %v436_v20 = vpop.permute.xlu1 %435  ;;  %v434_v21 = vpop.permute.xlu0 %433 }
  0xb2   : > { %v439_v22 = vsel %vm437_vm6, %v432_v38, %v436_v20  ;;  %v441_v24 = vsel %vm437_vm6, %v436_v20, %v432_v38  ;;  %v438_v4 = vsel %vm437_vm6, %v430_v60, %v434_v21  ;;  %v440_v25 = vsel %vm437_vm6, %v434_v21, %v430_v60 }
  0xb3   : > { %v449_v7 = vmul.f32 %v3538_v18, %v441_v24  ;;  %v450_v28 = vmul.f32 %v3540_v19, %v439_v22  ;;  %v447_v30 = vmul.f32 %v3538_v18, %v440_v25  ;;  %v448_v23 = vmul.f32 %v3540_v19, %v438_v4  ;;  %v3595_v4 = vld [vmem:[%s4791_s6 + $0x8] sm:$0xff]  ;;  %v3600_v25 = vld [vmem:[%s4791_s6] sm:$0xff] }
  0xb5   : > { %v452_v33 = vpack.c.bf16 %v450_v28, %v449_v7  ;;  %v451_v34 = vpack.c.bf16 %v448_v23, %v447_v30  ;;  %v3220_v30 = vmov 0  }
  0xb6   : > { %v3067_v38 = vld [vmem:[#allocation2 + $0x34] sm:$0xf0]  ;;  %v2677_v40 = vld [vmem:[#allocation2 + $0x38] sm:$0xf0]  ;;  %3187 = vset.pattern.permute.xlu0 %v3220_v30  ;;  %3186 = vset.pattern.permute.xlu2 %v3220_v30 }
  0xb7   : > { %454 = vst [vmem:[#allocation2 + $0x28] sm:$0xff] %v452_v33  ;;  %v2676_v43 = vor.u32 %v3067_v38, %v2675_v37  ;;  %v2680_v44 = vor.u32 %v3066_v39, %v2677_v40  ;;  %625 = vperm.xlu0 %3187, %v3595_v4   ;;  %620 = vperm.xlu2 %3186, %v3600_v25  }
  0xb8   : > { %453 = vst [vmem:[#allocation2 + $0x20] sm:$0xff] %v451_v34 }
  0xb9   : > { %v408_v47 = vpop.permute.xlu1 %407  ;;  %v406_v48 = vpop.permute.xlu0 %405  ;;  %735 = vmatpush.bf16.msra.mxu0 %v2676_v43  ;;  %763 = vmatpush.bf16.msra.mxu2 %v2680_v44  ;;  %v2640_v43 = vsel %vm333_vm8, 1.0, %v3219_v13 }
  0xba   : > { %v412_v17 = vsel %vm411_vm4, %v404_v10, %v408_v47  ;;  %v414_v50 = vsel %vm411_vm4, %v408_v47, %v404_v10  ;;  %v413_v51 = vsel %vm411_vm4, %v406_v48, %v410_v36  ;;  %v415_v52 = vsel %vm411_vm4, %v410_v36, %v406_v48  ;;  %v575_v48 = vpop.permute.xlu2 %574 }
  0xbb   : > { %v421_v53 = vmul.f32 %v3564_v41, %v414_v50  ;;  %v422_v54 = vmul.f32 %v3566_v42, %v412_v17  ;;  %v423_v55 = vmul.f32 %v3564_v41, %v415_v52  ;;  %v424_v56 = vmul.f32 %v3566_v42, %v413_v51 }
  0xbc   : > { %v3618_v29 = vperm.slane %v2640_v43, 0  ;;  %v3620_v47 = vperm.slane %v2640_v43, 1 }
  0xbd   : > { %v425_v57 = vpack.c.bf16 %v422_v54, %v421_v53  ;;  %v426_v58 = vpack.c.bf16 %v424_v56, %v423_v55 }
  0xbe   : > { %v3065_v60 = vld [vmem:[#allocation2 + $0x24] sm:$0xf0]  ;;  %v2669_v61 = vld [vmem:[#allocation2 + $0x28] sm:$0xf0] }
  0xbf   : > { %427 = vst [vmem:[#allocation2 + $0x10] sm:$0xff] %v425_v57  ;;  %v2667_v0 = vld [vmem:[#allocation2 + $0x20] sm:$0xf]  ;;  %v3064_v3 = vld [vmem:[#allocation2 + $0x24] sm:$0xf] }
  0xc0   : > { %428 = vst [vmem:[#allocation2 + $0x18] sm:$0xff] %v426_v58  ;;  %v2668_v5 = vor.u32 %v3065_v60, %v2667_v0  ;;  %v2672_v6 = vor.u32 %v3064_v3, %v2669_v61  ;;  %v3059_v0 = vld [vmem:[%s4787_s2 + $0x4] sm:$0xf0] }
  0xc1   : > { %v378_v10 = vpop.permute.xlu1 %377  ;;  %v376_v11 = vpop.permute.xlu0 %375 }
  0xc2   : > { %v386_v14 = vsel %vm385_vm13, %v376_v11, %v380_v62  ;;  %v388_v20 = vsel %vm385_vm13, %v380_v62, %v376_v11  ;;  %736 = vmatpush.bf16.msra.mxu0 %v2668_v5  ;;  %764 = vmatpush.bf16.msra.mxu2 %v2672_v6  ;;  %v2643_v62 = vld [vmem:[%s4787_s2] sm:$0xf] }
  0xc3   : > { %v395_v21 = vmul.f32 %v3582_v59, %v388_v20  ;;  %v396_v22 = vmul.f32 %v3584_v63, %v386_v14  ;;  %v2644_v14 = vor.u32 %v3059_v0, %v2643_v62  ;;  %v3058_v20 = vld [vmem:[%s4787_s2 + $0x4] sm:$0xf] }
  0xc5   : > { %v399_v24 = vpack.c.bf16 %v396_v22, %v395_v21 }
  0xc6   : > { %v2659_v7 = vld [vmem:[#allocation2 + $0x10] sm:$0xf]  ;;  %v3062_v28 = vld [vmem:[#allocation2 + $0x14] sm:$0xf] }
  0xc7   : > { %401 = vst [vmem:[#allocation2] sm:$0xff] %v399_v24  ;;  %v3063_v23 = vld [vmem:[#allocation2 + $0x14] sm:$0xf0]  ;;  %v2661_v32 = vld [vmem:[#allocation2 + $0x18] sm:$0xf0] }
  0xc8   : > { %v2660_v33 = vor.u32 %v3063_v23, %v2659_v7  ;;  %v2664_v34 = vor.u32 %v3062_v28, %v2661_v32  ;;  %v2645_v24 = vld [vmem:[%s4787_s2 + $0x8] sm:$0xf0] }
  0xc9   : > { %v573_v36 = vpop.permute.xlu1 %572  ;;  %v382_v37 = vpop.permute.xlu0 %381  ;;  %v2648_v32 = vor.u32 %v3058_v20, %v2645_v24 }
  0xca   : > { %v387_v8 = vsel %vm385_vm13, %v378_v10, %v382_v37  ;;  %v389_v38 = vsel %vm385_vm13, %v382_v37, %v378_v10  ;;  %737 = vmatpush.bf16.msra.mxu0 %v2660_v33  ;;  %765 = vmatpush.bf16.msra.mxu2 %v2664_v34 }
  0xcb   : > { %v397_v39 = vmul.f32 %v3582_v59, %v389_v38  ;;  %v398_v40 = vmul.f32 %v3584_v63, %v387_v8 }
  0xcd   : > { %v400_v44 = vpack.c.bf16 %v398_v40, %v397_v39 }
  0xce   : > { %v2651_v61 = vld [vmem:[#allocation2] sm:$0xf]  ;;  %v3060_v5 = vld [vmem:[#allocation2 + $0x4] sm:$0xf] }
  0xcf   : > { %402 = vst [vmem:[#allocation2 + $0x8] sm:$0xff] %v400_v44 }
  0xd1   : > { %v579_v49 = vpop.permute.xlu1 %578  ;;  %v577_v17 = vpop.permute.xlu0 %576 }
  0xd2   : > { %v582_v50 = vsel %vm4794_vm3, %v575_v48, %v579_v49  ;;  %v584_v51 = vsel %vm4794_vm3, %v579_v49, %v575_v48  ;;  %v581_v52 = vsel %vm4794_vm3, %v573_v36, %v577_v17  ;;  %v583_v53 = vsel %vm4794_vm3, %v577_v17, %v573_v36 }
  0xd3   : > { %v592_v54 = vmul.f32 %v3618_v29, %v582_v50  ;;  %v593_v55 = vmul.f32 %v3620_v47, %v584_v51  ;;  %v590_v56 = vmul.f32 %v3618_v29, %v581_v52  ;;  %v591_v57 = vmul.f32 %v3620_v47, %v583_v53 }
  0xd5   : > { %v595_v58 = vpack.c.bf16 %v593_v55, %v592_v54  ;;  %v594_v60 = vpack.c.bf16 %v591_v57, %v590_v56 }
  0xd6   : > { %v3061_v3 = vld [vmem:[#allocation2 + $0x4] sm:$0xf0]  ;;  %v2653_v6 = vld [vmem:[#allocation2 + $0x8] sm:$0xf0] }
  0xd7   : > { %597 = vst [vmem:[#allocation2 + $0x88] sm:$0xff] %v595_v58  ;;  %v2652_v10 = vor.u32 %v3061_v3, %v2651_v61  ;;  %v2656_v11 = vor.u32 %v3060_v5, %v2653_v6 }
  0xd8   : > { %596 = vst [vmem:[#allocation2 + $0x80] sm:$0xff] %v594_v60 }
  0xd9   : > { %738 = vmatpush.bf16.msra.mxu0 %v2652_v10  ;;  %766 = vmatpush.bf16.msra.mxu2 %v2656_v11 }
  0xdc   : > { %739 = vmatmul.bf16.vlgmr.msra.gmra.mxu0 %v2644_v14  ;;  %767 = vmatmul.bf16.vlgmr.msra.gmra.mxu2 %v2644_v14 }
  0xde   : > { %v3077_v21 = vld [vmem:[#allocation2 + $0x84] sm:$0xf0]  ;;  %v2717_v22 = vld [vmem:[#allocation2 + $0x88] sm:$0xf0] }
  0xdf   : > { %v2715_v7 = vld [vmem:[#allocation2 + $0x80] sm:$0xf]  ;;  %v3076_v28 = vld [vmem:[#allocation2 + $0x84] sm:$0xf] }
  0xe0   : > { %v2716_v30 = vor.u32 %v3077_v21, %v2715_v7  ;;  %v2720_v23 = vor.u32 %v3076_v28, %v2717_v22 }
  0xe2   : > { %752 = vmatpush.bf16.msra.mxu1 %v2716_v30  ;;  %780 = vmatpush.bf16.msra.mxu3 %v2720_v23 }
  0xe5   : > { %2721 = vmatmul.msk.bf16.vlgmr.msra.gmra.mxu1 %vm4793_vm1, %v2648_v32  ;;  %2722 = vmatmul.msk.bf16.vlgmr.msra.gmra.mxu3 %vm4793_vm1, %v2648_v32 }
 0x111   : > { %v621_v33 = vpop.permute.xlu2 %620 }
 0x129   : > { %v626_v43 = vpop.permute.xlu0 %625 }
 0x159   : > { %v740_v34 = vpop.f32.mrf.mxu0 }
 0x15a   : > { %v741_v36 = vadd.f32 %v740_v34, %v621_v33 }
 0x15f   : > { %v768_v37 = vpop.f32.mrf.mxu2 }
 0x160   : > { %v769_v40 = vadd.f32 %v768_v37, %v621_v33 }
 0x161   : > { %v742_v44 = vpop.f32.mrf.mxu0 }
 0x162   : > { %v754_v8 = vpop.f32.mrf.mxu1  ;;  %v743_v51 = vadd.f32 %v742_v44, %v626_v43 }
 0x163   : > { %v755_v38 = vadd.f32 %v754_v8, %v741_v36 }
 0x165   : > { %v787_v39 = vmax.f32 %v755_v38, 0.0 }
 0x167   : > { %879 = vrot.lane.b32.xlu2 %v787_v39, %s3213_s9  ;;  %919 = vrot.lane.b32.xlu0 %v787_v39, %s3211_s30  ;;  %v770_v50 = vpop.f32.mrf.mxu2  ;;  %v871_v53 = vmul.f32 %v787_v39, %v3415_v26 }
 0x168   : > { %939 = vrot.lane.b32.xlu1 %v787_v39, %s3218_s14  ;;  %v782_v48 = vpop.f32.mrf.mxu3  ;;  %v771_v56 = vadd.f32 %v770_v50, %v626_v43 }
 0x169   : > { %v783_v49 = vadd.f32 %v782_v48, %v769_v40 }
 0x16a   : > { %v756_v17 = vpop.f32.mrf.mxu1 }
 0x16b   : > { %v788_v52 = vmax.f32 %v783_v49, 0.0  ;;  %v757_v55 = vadd.f32 %v756_v17, %v743_v51 }
 0x16d   : > { %v872_v54 = vmul.f32 %v788_v52, %v3417_v27  ;;  %v789_v60 = vmax.f32 %v757_v55, 0.0 }
 0x16f   : > { %851 = vrot.lane.b32.xlu0 %v787_v39, %s3214_s10  ;;  %923 = vrot.lane.b32.xlu2 %v788_v52, %s3211_s30  ;;  %v875_v57 = vpack.c.bf16 %v872_v54, %v871_v53  ;;  %v873_v0 = vmul.f32 %v789_v60, %v3415_v26 }
 0x170   : > { %899 = vrot.lane.b32.xlu1 %v787_v39, %s3212_s8  ;;  %v784_v58 = vpop.f32.mrf.mxu3 }
 0x171   : > { %v785_v61 = vadd.f32 %v784_v58, %v771_v56  ;;  %877 = vst [vmem:[#allocation2 + $0x40] sm:$0xff] %v875_v57 }
 0x173   : > { %v790_v62 = vmax.f32 %v785_v61, 0.0 }
 0x175   : > { %v874_v3 = vmul.f32 %v790_v62, %v3417_v27 }
 0x177   : > { %903 = vrot.lane.b32.xlu0 %v788_v52, %s3212_s8  ;;  %855 = vrot.lane.b32.xlu2 %v788_v52, %s3214_s10  ;;  %v876_v5 = vpack.c.bf16 %v874_v3, %v873_v0 }
 0x178   : > { %831 = vrot.lane.b32.xlu1 %v787_v39, %s3215_s11 }
 0x179   : > { %878 = vst [vmem:[#allocation2 + $0x48] sm:$0xff] %v876_v5 }
 0x17f   : > { %835 = vrot.lane.b32.xlu0 %v788_v52, %s3215_s11  ;;  %941 = vrot.lane.b32.xlu2 %v789_v60, %s3218_s14 }
 0x180   : > { %943 = vrot.lane.b32.xlu1 %v788_v52, %s3218_s14 }
 0x187   : > { %881 = vrot.lane.b32.xlu0 %v789_v60, %s3213_s9  ;;  %901 = vrot.lane.b32.xlu2 %v789_v60, %s3212_s8 }
 0x188   : > { %883 = vrot.lane.b32.xlu1 %v788_v52, %s3213_s9 }
 0x18f   : > { %925 = vrot.lane.b32.xlu0 %v790_v62, %s3211_s30  ;;  %833 = vrot.lane.b32.xlu2 %v789_v60, %s3215_s11 }
 0x190   : > { %921 = vrot.lane.b32.xlu1 %v789_v60, %s3211_s30 }
 0x197   : > { %813 = vrot.lane.b32.xlu0 %v789_v60, %s3216_s12  ;;  %945 = vrot.lane.b32.xlu2 %v790_v62, %s3218_s14 }
 0x198   : > { %853 = vrot.lane.b32.xlu1 %v789_v60, %s3214_s10 }
 0x19f   : > { %857 = vrot.lane.b32.xlu0 %v790_v62, %s3214_s10  ;;  %885 = vrot.lane.b32.xlu2 %v790_v62, %s3213_s9 }
 0x1a0   : > { %905 = vrot.lane.b32.xlu1 %v790_v62, %s3212_s8 }
 0x1a7   : > { %791 = vrot.lane.b32.xlu0 %v787_v39, %s3217_s13  ;;  %811 = vrot.lane.b32.xlu2 %v787_v39, %s3216_s12 }
 0x1a8   : > { %815 = vrot.lane.b32.xlu1 %v788_v52, %s3216_s12 }
 0x1af   : > { %797 = vrot.lane.b32.xlu0 %v790_v62, %s3217_s13  ;;  %817 = vrot.lane.b32.xlu2 %v790_v62, %s3216_s12 }
 0x1b0   : > { %837 = vrot.lane.b32.xlu1 %v790_v62, %s3215_s11 }
 0x1b7   : > { %795 = vrot.lane.b32.xlu2 %v788_v52, %s3217_s13 }
 0x1b8   : > { %793 = vrot.lane.b32.xlu1 %v789_v60, %s3217_s13 }
 0x1c1   : > { %v880_v6 = vpop.permute.xlu2 %879 }
 0x1c9   : > { %v924_v10 = vpop.permute.xlu2 %923 }
 0x1d1   : > { %v856_v11 = vpop.permute.xlu2 %855 }
 0x1d9   : > { %v920_v14 = vpop.permute.xlu0 %919  ;;  %v942_v20 = vpop.permute.xlu2 %941 }
 0x1da   : > { %v927_v21 = vsel %vm554_vm12, %v920_v14, %v924_v10  ;;  %v929_v22 = vsel %vm554_vm12, %v924_v10, %v920_v14  ;;  %v940_v24 = vpop.permute.xlu1 %939 }
 0x1db   : > { %v931_v7 = vmul.f32 %v927_v21, %v3398_v15  ;;  %v932_v28 = vmul.f32 %v929_v22, %v3400_v16 }
 0x1dd   : > { %v935_v30 = vpack.c.bf16 %v932_v28, %v931_v7 }
 0x1df   : > { %937 = vst [vmem:[#allocation2 + $0x70] sm:$0xff] %v935_v30 }
 0x1e1   : > { %v852_v23 = vpop.permute.xlu0 %851  ;;  %v3690_v32 = vpop.permute.xlu2 %901 }
 0x1e2   : > { %v859_v33 = vsel %vm463_vm9, %v852_v23, %v856_v11  ;;  %v861_v34 = vsel %vm463_vm9, %v856_v11, %v852_v23  ;;  %v900_v36 = vpop.permute.xlu1 %899 }
 0x1e3   : > { %v863_v37 = vmul.f32 %v861_v34, %v3500_v31  ;;  %v864_v8 = vmul.f32 %v859_v33, %v3502_v35 }
 0x1e5   : > { %v867_v38 = vpack.c.bf16 %v864_v8, %v863_v37 }
 0x1e7   : > { %869 = vst [vmem:[#allocation2 + $0x30] sm:$0xff] %v867_v38 }
 0x1e9   : > { %v904_v39 = vpop.permute.xlu0 %903  ;;  %v3698_v40 = vpop.permute.xlu2 %833 }
 0x1ea   : > { %v832_v43 = vpop.permute.xlu1 %831  ;;  %v907_v44 = vsel %vm528_vm7, %v900_v36, %v904_v39  ;;  %v909_v48 = vsel %vm528_vm7, %v904_v39, %v900_v36  ;;  %v3078_v39 = vld [vmem:[%s4788_s3 + $0x4] sm:$0xf] }
 0x1eb   : > { %v911_v49 = vmul.f32 %v907_v44, %v3451_v45  ;;  %v912_v17 = vmul.f32 %v909_v48, %v3453_v46 }
 0x1ed   : > { %v915_v50 = vpack.c.bf16 %v912_v17, %v911_v49 }
 0x1ef   : > { %917 = vst [vmem:[#allocation2 + $0x60] sm:$0xff] %v915_v50 }
 0x1f1   : > { %v836_v51 = vpop.permute.xlu0 %835  ;;  %v946_v52 = vpop.permute.xlu2 %945 }
 0x1f2   : > { %v839_v53 = vsel %vm437_vm6, %v832_v43, %v836_v51  ;;  %v841_v54 = vsel %vm437_vm6, %v836_v51, %v832_v43  ;;  %v948_v55 = vsel %vm4794_vm3, %v942_v20, %v946_v52  ;;  %v950_v56 = vsel %vm4794_vm3, %v946_v52, %v942_v20  ;;  %v944_v57 = vpop.permute.xlu1 %943  ;;  %v2727_v43 = vld [vmem:[%s4788_s3 + $0x8] sm:$0xf0] }
 0x1f3   : > { %v843_v58 = vmul.f32 %v841_v54, %v3538_v18  ;;  %v844_v60 = vmul.f32 %v839_v53, %v3540_v19  ;;  %v953_v61 = vmul.f32 %v948_v55, %v3618_v29  ;;  %v954_v62 = vmul.f32 %v950_v56, %v3620_v47 }
 0x1f4   : > { %v947_v0 = vsel %vm4794_vm3, %v940_v24, %v944_v57  ;;  %v949_v3 = vsel %vm4794_vm3, %v944_v57, %v940_v24  ;;  %v2730_v54 = vor.u32 %v3078_v39, %v2727_v43  ;;  %vm1226_vm3 = vcmp.lt.s32.totalorder %v3388_v12, 2 }
 0x1f5   : > { %v847_v5 = vpack.c.bf16 %v844_v60, %v843_v58  ;;  %v956_v10 = vpack.c.bf16 %v954_v62, %v953_v61  ;;  %v951_v11 = vmul.f32 %v947_v0, %v3618_v29  ;;  %v952_v14 = vmul.f32 %v949_v3, %v3620_v47 }
 0x1f7   : > { %849 = vst [vmem:[#allocation2 + $0x20] sm:$0xff] %v847_v5  ;;  %v955_v20 = vpack.c.bf16 %v952_v14, %v951_v11 }
 0x1f8   : > { %958 = vst [vmem:[#allocation2 + $0x88] sm:$0xff] %v956_v10 }
 0x1f9   : > { %957 = vst [vmem:[#allocation2 + $0x80] sm:$0xff] %v955_v20  ;;  %v882_v21 = vpop.permute.xlu0 %881  ;;  %v886_v22 = vpop.permute.xlu2 %885  ;;  %v2797_v20 = vld [vmem:[#allocation2 + $0x70] sm:$0xf] }
 0x1fa   : > { %v888_v7 = vsel %vm502_vm11, %v882_v21, %v886_v22  ;;  %v890_v28 = vsel %vm502_vm11, %v886_v22, %v882_v21  ;;  %v884_v30 = vpop.permute.xlu1 %883  ;;  %v3096_v21 = vld [vmem:[#allocation2 + $0x74] sm:$0xf] }
 0x1fb   : > { %v893_v24 = vmul.f32 %v888_v7, %v3479_v1  ;;  %v894_v23 = vmul.f32 %v890_v28, %v3481_v2  ;;  %v887_v33 = vsel %vm502_vm11, %v880_v6, %v884_v30  ;;  %v889_v34 = vsel %vm502_vm11, %v884_v30, %v880_v6  ;;  %v3080_v22 = vld [vmem:[%s4788_s3 + $0x14] sm:$0xf]  ;;  %v2735_v7 = vld [vmem:[%s4788_s3 + $0x18] sm:$0xf0] }
 0x1fc   : > { %v891_v36 = vmul.f32 %v887_v33, %v3479_v1  ;;  %v892_v37 = vmul.f32 %v889_v34, %v3481_v2 }
 0x1fd   : > { %v896_v8 = vpack.c.bf16 %v894_v23, %v893_v24 }
 0x1fe   : > { %v895_v38 = vpack.c.bf16 %v892_v37, %v891_v36 }
 0x1ff   : > { %898 = vst [vmem:[#allocation2 + $0x58] sm:$0xff] %v896_v8  ;;  %v3099_v44 = vld [vmem:[#allocation2 + $0x84] sm:$0xf0]  ;;  %v2807_v48 = vld [vmem:[#allocation2 + $0x88] sm:$0xf0]  ;;  %v2738_v8 = vor.u32 %v3080_v22, %v2735_v7 }
 0x200   : > { %897 = vst [vmem:[#allocation2 + $0x50] sm:$0xff] %v895_v38  ;;  %v2805_v49 = vld [vmem:[#allocation2 + $0x80] sm:$0xf]  ;;  %v3098_v6 = vld [vmem:[#allocation2 + $0x84] sm:$0xf] }
 0x201   : > { %v926_v17 = vpop.permute.xlu0 %925  ;;  %v812_v50 = vpop.permute.xlu2 %811  ;;  %v2806_v51 = vor.u32 %v3099_v44, %v2805_v49  ;;  %v2810_v52 = vor.u32 %v3098_v6, %v2807_v48 }
 0x202   : > { %v922_v53 = vpop.permute.xlu1 %921 }
 0x203   : > { %1139 = vmatpush.bf16.msrb.mxu3 %v2806_v51  ;;  %1177 = vmatpush.bf16.msrb.mxu0 %v2810_v52  ;;  %v928_v55 = vsel %vm554_vm12, %v922_v53, %v926_v17  ;;  %v930_v56 = vsel %vm554_vm12, %v926_v17, %v922_v53 }
 0x204   : > { %v933_v57 = vmul.f32 %v928_v55, %v3398_v15  ;;  %v934_v58 = vmul.f32 %v930_v56, %v3400_v16 }
 0x206   : > { %v936_v60 = vpack.c.bf16 %v934_v58, %v933_v57  ;;  %2811 = vmatmul.msk.bf16.vlgmr.msrb.gmra.mxu3 %vm4793_vm1, %v2730_v54  ;;  %2813 = vmatmul.msk.bf16.vlgmr.msrb.gmra.mxu0 %vm4793_vm1, %v2730_v54  ;;  %v3093_v22 = vld [vmem:[#allocation2 + $0x54] sm:$0xf0] }
 0x207   : > { %v2781_v7 = vld [vmem:[#allocation2 + $0x50] sm:$0xf] }
 0x208   : > { %938 = vst [vmem:[#allocation2 + $0x78] sm:$0xff] %v936_v60 }
 0x209   : > { %v814_v61 = vpop.permute.xlu0 %813  ;;  %v818_v62 = vpop.permute.xlu2 %817 }
 0x20a   : > { %v820_v0 = vsel %vm411_vm4, %v814_v61, %v818_v62  ;;  %v822_v3 = vsel %vm411_vm4, %v818_v62, %v814_v61  ;;  %v854_v5 = vpop.permute.xlu1 %853 }
 0x20b   : > { %v825_v10 = vmul.f32 %v822_v3, %v3564_v41  ;;  %v826_v11 = vmul.f32 %v820_v0, %v3566_v42  ;;  %v368_v0 = vld [vmem:[%s4791_s6 + $0x10] sm:$0xff] }
 0x20d   : > { %v828_v14 = vpack.c.bf16 %v826_v11, %v825_v10  ;;  %v3094_v10 = vld [vmem:[#allocation2 + $0x64] sm:$0xf]  ;;  %v3221_v11 = vmov 1  }
 0x20e   : > { %3188 = vset.pattern.permute.xlu1 %v3221_v11  ;;  %3190 = vset.pattern.permute.xlu0 %v3221_v11 }
 0x20f   : > { %830 = vst [vmem:[#allocation2 + $0x18] sm:$0xff] %v828_v14  ;;  %v3097_v28 = vld [vmem:[#allocation2 + $0x74] sm:$0xf0]  ;;  %v2799_v30 = vld [vmem:[#allocation2 + $0x78] sm:$0xf0]  ;;  %991 = vperm.xlu1 %3188, %v368_v0   ;;  %982 = vperm.xlu0 %3190, %v3600_v25  }
 0x210   : > { %v2798_v24 = vor.u32 %v3097_v28, %v2797_v20  ;;  %v2802_v23 = vor.u32 %v3096_v21, %v2799_v30  ;;  %3189 = vset.pattern.permute.xlu2 %v3221_v11  ;;  %v3092_v28 = vld [vmem:[#allocation2 + $0x54] sm:$0xf]  ;;  %v2783_v30 = vld [vmem:[#allocation2 + $0x58] sm:$0xf0]  ;;  %v3086_v0 = vld [vmem:[#allocation2 + $0x24] sm:$0xf] }
 0x211   : > { %v858_v33 = vpop.permute.xlu0 %857  ;;  %v796_v51 = vpop.permute.xlu2 %795 }
 0x212   : > { %v860_v34 = vsel %vm463_vm9, %v854_v5, %v858_v33  ;;  %v862_v36 = vsel %vm463_vm9, %v858_v33, %v854_v5  ;;  %1113 = vmatpush.bf16.msrb.mxu1 %v2798_v24  ;;  %1151 = vmatpush.bf16.msra.mxu3 %v2802_v23  ;;  %v906_v37 = vpop.permute.xlu1 %905  ;;  %v2789_v5 = vld [vmem:[#allocation2 + $0x60] sm:$0xf] }
 0x213   : > { %v865_v38 = vmul.f32 %v862_v36, %v3500_v31  ;;  %v866_v39 = vmul.f32 %v860_v34, %v3502_v35  ;;  %v908_v43 = vsel %vm528_vm7, %v3690_v32, %v906_v37  ;;  %v910_v44 = vsel %vm528_vm7, %v906_v37, %v3690_v32 }
 0x214   : > { %v913_v48 = vmul.f32 %v908_v43, %v3451_v45  ;;  %v914_v49 = vmul.f32 %v910_v44, %v3453_v46  ;;  %v2782_v36 = vor.u32 %v3093_v22, %v2781_v7  ;;  %v2786_v37 = vor.u32 %v3092_v28, %v2783_v30  ;;  %v2773_v43 = vld [vmem:[#allocation2 + $0x40] sm:$0xf]  ;;  %v3090_v44 = vld [vmem:[#allocation2 + $0x44] sm:$0xf]  ;;  %v3079_v30 = vld [vmem:[%s4788_s3 + $0x4] sm:$0xf0] }
 0x215   : > { %v868_v6 = vpack.c.bf16 %v866_v39, %v865_v38  ;;  %v2775_v38 = vld [vmem:[#allocation2 + $0x48] sm:$0xf0]  ;;  %v2725_v28 = vld [vmem:[%s4788_s3] sm:$0xf] }
 0x216   : > { %v916_v17 = vpack.c.bf16 %v914_v49, %v913_v48  ;;  %2812 = vmatmul.msk.bf16.gmra.mxu3 %vm4793_vm1, %v2738_v8  ;;  %2814 = vmatmul.msk.bf16.gmra.mxu0 %vm4793_vm1, %v2738_v8  ;;  %v3091_v8 = vld [vmem:[#allocation2 + $0x44] sm:$0xf0]  ;;  %v2778_v49 = vor.u32 %v3090_v44, %v2775_v38 }
 0x217   : > { %870 = vst [vmem:[#allocation2 + $0x38] sm:$0xff] %v868_v6  ;;  %986 = vperm.xlu1 %3188, %v3595_v4   ;;  %v2774_v48 = vor.u32 %v3091_v8, %v2773_v43  ;;  %v3081_v8 = vld [vmem:[%s4788_s3 + $0x14] sm:$0xf0] }
 0x218   : > { %918 = vst [vmem:[#allocation2 + $0x68] sm:$0xff] %v916_v17 }
 0x219   : > { %v792_v52 = vpop.permute.xlu0 %791 }
 0x21a   : > { %v799_v53 = vsel %vm385_vm13, %v792_v52, %v796_v51  ;;  %v801_v32 = vsel %vm385_vm13, %v796_v51, %v792_v52  ;;  %v816_v54 = vpop.permute.xlu1 %815 }
 0x21b   : > { %v803_v55 = vmul.f32 %v801_v32, %v3582_v59  ;;  %v804_v56 = vmul.f32 %v799_v53, %v3584_v63  ;;  %v819_v57 = vsel %vm411_vm4, %v812_v50, %v816_v54  ;;  %v821_v58 = vsel %vm411_vm4, %v816_v54, %v812_v50  ;;  %v2765_v32 = vld [vmem:[#allocation2 + $0x30] sm:$0xf]  ;;  %v3088_v54 = vld [vmem:[#allocation2 + $0x34] sm:$0xf] }
 0x21c   : > { %v823_v60 = vmul.f32 %v821_v58, %v3564_v41  ;;  %v824_v61 = vmul.f32 %v819_v57, %v3566_v42  ;;  %v369_v58 = vld [vmem:[%s4791_s6 + $0x18] sm:$0xff] }
 0x21d   : > { %v807_v62 = vpack.c.bf16 %v804_v56, %v803_v55  ;;  %996 = vperm.xlu2 %3189, %v369_v58  }
 0x21e   : > { %v827_v3 = vpack.c.bf16 %v824_v61, %v823_v60  ;;  %v3089_v6 = vld [vmem:[#allocation2 + $0x34] sm:$0xf0]  ;;  %v2757_v61 = vld [vmem:[#allocation2 + $0x20] sm:$0xf] }
 0x21f   : > { %809 = vst [vmem:[#allocation2] sm:$0xff] %v807_v62  ;;  %v3095_v14 = vld [vmem:[#allocation2 + $0x64] sm:$0xf0]  ;;  %v2791_v20 = vld [vmem:[#allocation2 + $0x68] sm:$0xf0]  ;;  %v2766_v56 = vor.u32 %v3089_v6, %v2765_v32 }
 0x220   : > { %829 = vst [vmem:[#allocation2 + $0x10] sm:$0xff] %v827_v3  ;;  %v2790_v50 = vor.u32 %v3095_v14, %v2789_v5  ;;  %v2794_v21 = vor.u32 %v3094_v10, %v2791_v20  ;;  %v3085_v20 = vld [vmem:[#allocation2 + $0x14] sm:$0xf0] }
 0x221   : > { %v798_v17 = vpop.permute.xlu0 %797 }
 0x222   : > { %1114 = vmatpush.bf16.msrb.mxu1 %v2790_v50  ;;  %1152 = vmatpush.bf16.msra.mxu3 %v2794_v21  ;;  %v838_v24 = vpop.permute.xlu1 %837  ;;  %v2751_v50 = vld [vmem:[#allocation2 + $0x18] sm:$0xf0] }
 0x223   : > { %v840_v23 = vsel %vm437_vm6, %v3698_v40, %v838_v24  ;;  %v842_v33 = vsel %vm437_vm6, %v838_v24, %v3698_v40  ;;  %v2767_v40 = vld [vmem:[#allocation2 + $0x38] sm:$0xf0] }
 0x224   : > { %v845_v25 = vmul.f32 %v842_v33, %v3538_v18  ;;  %v846_v34 = vmul.f32 %v840_v23, %v3540_v19  ;;  %v2770_v57 = vor.u32 %v3088_v54, %v2767_v40 }
 0x226   : > { %v848_v39 = vpack.c.bf16 %v846_v34, %v845_v25  ;;  %1115 = vmatpush.bf16.msrb.mxu1 %v2782_v36  ;;  %1153 = vmatpush.bf16.msra.mxu3 %v2786_v37  ;;  %v2741_v7 = vld [vmem:[#allocation2] sm:$0xf]  ;;  %v3082_v23 = vld [vmem:[#allocation2 + $0x4] sm:$0xf]  ;;  %v2726_v36 = vor.u32 %v3079_v30, %v2725_v28  ;;  %v2733_v37 = vld [vmem:[%s4788_s3 + $0x10] sm:$0xf] }
 0x227   : > { %v2749_v11 = vld [vmem:[#allocation2 + $0x10] sm:$0xf]  ;;  %v3084_v14 = vld [vmem:[#allocation2 + $0x14] sm:$0xf]  ;;  %v2734_v38 = vor.u32 %v3081_v8, %v2733_v37 }
 0x228   : > { %850 = vst [vmem:[#allocation2 + $0x28] sm:$0xff] %v848_v39  ;;  %v2750_v21 = vor.u32 %v3085_v20, %v2749_v11  ;;  %v2754_v22 = vor.u32 %v3084_v14, %v2751_v50 }
 0x22a   : > { %v794_v51 = vpop.permute.xlu1 %793  ;;  %1116 = vmatpush.bf16.msrb.mxu1 %v2774_v48  ;;  %1154 = vmatpush.bf16.msra.mxu3 %v2778_v49 }
 0x22b   : > { %v800_v52 = vsel %vm385_vm13, %v794_v51, %v798_v17  ;;  %v802_v53 = vsel %vm385_vm13, %v798_v17, %v794_v51 }
 0x22c   : > { %v805_v55 = vmul.f32 %v802_v53, %v3582_v59  ;;  %v806_v4 = vmul.f32 %v800_v52, %v3584_v63 }
 0x22e   : > { %v808_v60 = vpack.c.bf16 %v806_v4, %v805_v55  ;;  %1117 = vmatpush.bf16.msrb.mxu1 %v2766_v56  ;;  %1155 = vmatpush.bf16.msra.mxu3 %v2770_v57 }
 0x22f   : > { %v3087_v62 = vld [vmem:[#allocation2 + $0x24] sm:$0xf0]  ;;  %v2759_v3 = vld [vmem:[#allocation2 + $0x28] sm:$0xf0] }
 0x230   : > { %810 = vst [vmem:[#allocation2 + $0x8] sm:$0xff] %v808_v60  ;;  %v2758_v5 = vor.u32 %v3087_v62, %v2757_v61  ;;  %v2762_v10 = vor.u32 %v3086_v0, %v2759_v3 }
 0x232   : > { %1118 = vmatpush.bf16.msrb.mxu1 %v2758_v5  ;;  %1156 = vmatpush.bf16.msra.mxu3 %v2762_v10 }
 0x236   : > { %1119 = vmatpush.bf16.msrb.mxu1 %v2750_v21  ;;  %1157 = vmatpush.bf16.msra.mxu3 %v2754_v22 }
 0x237   : > { %v3083_v24 = vld [vmem:[#allocation2 + $0x4] sm:$0xf0]  ;;  %v2743_v33 = vld [vmem:[#allocation2 + $0x8] sm:$0xf0] }
 0x238   : > { %v2742_v25 = vor.u32 %v3083_v24, %v2741_v7  ;;  %v2746_v34 = vor.u32 %v3082_v23, %v2743_v33 }
 0x23a   : > { %1120 = vmatpush.bf16.msrb.mxu1 %v2742_v25  ;;  %1158 = vmatpush.bf16.msra.mxu3 %v2746_v34 }
 0x23d   : > { %1121 = vmatmul.bf16.vlgmr.msrb.gmra.mxu1 %v2726_v36  ;;  %1159 = vmatmul.bf16.vlgmr.msra.gmra.mxu3 %v2726_v36 }
 0x24d   : > { %1126 = vmatmul.bf16.gmra.mxu1 %v2734_v38  ;;  %1164 = vmatmul.bf16.gmra.mxu3 %v2734_v38 }
 0x277   : > { %v997_v21 = vpop.permute.xlu2 %996 }
 0x281   : > { %v992_v49 = vpop.permute.xlu1 %991  ;;  %v983_v6 = vpop.permute.xlu0 %982 }
 0x283   : > { %v1179_v4 = vpop.f32.mrf.mxu0 }
 0x289   : > { %v1141_v39 = vpop.f32.mrf.mxu3  ;;  %v987_v32 = vpop.permute.xlu1 %986 }
 0x28b   : > { %v1181_v10 = vpop.f32.mrf.mxu0 }
 0x291   : > { %v1143_v43 = vpop.f32.mrf.mxu3 }
 0x293   : > { %v1184_v7 = vpop.f32.mrf.mxu0 }
 0x299   : > { %v1146_v44 = vpop.f32.mrf.mxu3 }
 0x29b   : > { %v1186_v36 = vpop.f32.mrf.mxu0 }
 0x2a1   : > { %v1148_v48 = vpop.f32.mrf.mxu3 }
 0x2ba   : > { %v1122_v40 = vpop.f32.mrf.mxu1 }
 0x2bb   : > { %v1123_v17 = vadd.f32 %v1122_v40, %v983_v6  ;;  %v3199_v40 = vld [vmem:[%s4786_s1 + $0x1] ss:$2 sm:$0x3] }
 0x2bc   : > { %vm343_vm5 = vcmp.ge.s32.totalorder %v3199_v40, 2  ;;  %vm347_vm2 = vcmp.eq.s32.totalorder %v3199_v40, 15  ;;  %vm340_vm15 = vcmp.eq.s32.totalorder %v3199_v40, 0  ;;  %vm350_vm1 = vcmp.le.s32.totalorder %v3199_v40, 13 }
 0x2bd   : > { %v1142_v51 = vadd.f32 %v1141_v39, %v1123_v17  ;;  %v336_v17 = vand.u32 1, %v3199_v40 }
 0x2bf   : > { %v3824_v52 = vmax.f32 %v1142_v51, 0.0  ;;  %vm337_vm0 = vcmp.eq.s32.totalorder %v336_v17, 0 }
 0x2c0   : > { %v1160_v53 = vpop.f32.mrf.mxu3  ;;  %vm344_vm10 = vmand %vm337_vm0, %vm343_vm5 }
 0x2c1   : > { %v1161_v54 = vadd.f32 %v1160_v53, %v983_v6  ;;  %1256 = vrot.lane.b32.xlu1 %v3824_v52, %s3214_s10  ;;  %1210 = vrot.lane.b32.xlu2 %v3824_v52, %s3222_s27  ;;  %vm346_vm8 = vmxor %vm337_vm0, %vm3223_vm14 }
 0x2c2   : > { %v1124_v55 = vpop.f32.mrf.mxu1  ;;  %vm351_vm5 = vmand %vm346_vm8, %vm350_vm1 }
 0x2c3   : > { %v1125_v56 = vadd.f32 %v1124_v55, %v987_v32  ;;  %v1180_v57 = vadd.f32 %v1179_v4, %v1161_v54  ;;  %v341_v54 = vsel %vm337_vm0, 0.75, %v3219_v13  ;;  %v345_v55 = vsel %vm344_vm10, 0.25, %v3219_v13 }
 0x2c5   : > { %v1144_v58 = vadd.f32 %v1143_v43, %v1125_v56  ;;  %v3830_v60 = vmax.f32 %v1180_v57, 0.0  ;;  %v3224_v56 = vmov 0.75  }
 0x2c6   : > { %v348_v57 = vsel %vm347_vm2, 1.0, %v3224_v56 }
 0x2c7   : > { %v3832_v61 = vmax.f32 %v1144_v58, 0.0  ;;  %v342_v58 = vsel %vm340_vm15, 1.0, %v341_v54 }
 0x2c8   : > { %v1162_v3 = vpop.f32.mrf.mxu3 }
 0x2c9   : > { %1212 = vrot.lane.b32.xlu0 %v3832_v61, %s3222_s27  ;;  %1301 = vrot.lane.b32.xlu2 %v3824_v52, %s3213_s9  ;;  %v1163_v11 = vadd.f32 %v1162_v3, %v987_v32  ;;  %v3902_v3 = vperm.slane %v345_v55, 0 }
 0x2ca   : > { %1218 = vrot.lane.b32.xlu1 %v3830_v60, %s3222_s27  ;;  %v1127_v62 = vpop.f32.mrf.mxu1 }
 0x2cb   : > { %v1128_v0 = vadd.f32 %v1127_v62, %v992_v49  ;;  %v1182_v50 = vadd.f32 %v1181_v10, %v1163_v11 }
 0x2cd   : > { %v1147_v5 = vadd.f32 %v1146_v44, %v1128_v0  ;;  %v3854_v28 = vmax.f32 %v1182_v50, 0.0  ;;  %v3910_v50 = vperm.slane %v342_v58, 0 }
 0x2cf   : > { %v3846_v14 = vmax.f32 %v1147_v5, 0.0  ;;  %v3904_v5 = vperm.slane %v345_v55, 1 }
 0x2d0   : > { %v1165_v20 = vpop.f32.mrf.mxu3 }
 0x2d1   : > { %1303 = vrot.lane.b32.xlu0 %v3832_v61, %s3213_s9  ;;  %1258 = vrot.lane.b32.xlu2 %v3832_v61, %s3214_s10  ;;  %v1166_v30 = vadd.f32 %v1165_v20, %v992_v49  ;;  %v349_v20 = vsel %vm346_vm8, %v348_v57, 0.0 }
 0x2d2   : > { %1309 = vrot.lane.b32.xlu1 %v3830_v60, %s3213_s9  ;;  %v1129_v22 = vpop.f32.mrf.mxu1 }
 0x2d3   : > { %v1130_v24 = vadd.f32 %v1129_v22, %v997_v21  ;;  %v1185_v33 = vadd.f32 %v1184_v7, %v1166_v30  ;;  %v352_v22 = vsel %vm351_vm5, 0.25, %v3219_v13  ;;  %vm1375_vm5 = vcmp.lt.s32.totalorder %v3388_v12, 32 }
 0x2d5   : > { %v1149_v25 = vadd.f32 %v1148_v48, %v1130_v24  ;;  %v3862_v37 = vmax.f32 %v1185_v33, 0.0  ;;  %v3917_v24 = vperm.slane %v349_v20, 0  ;;  %v1202_v33 = vmul.f32 %v3910_v50, %v3824_v52 }
 0x2d7   : > { %v3864_v8 = vmax.f32 %v1149_v25, 0.0 }
 0x2d8   : > { %v1167_v23 = vpop.f32.mrf.mxu3 }
 0x2d9   : > { %1214 = vrot.lane.b32.xlu2 %v3846_v14, %s3222_s27  ;;  %1264 = vrot.lane.b32.xlu0 %v3830_v60, %s3214_s10  ;;  %v1168_v34 = vadd.f32 %v1167_v23, %v997_v21  ;;  %v3912_v21 = vperm.slane %v342_v58, 1  ;;  %v3919_v23 = vperm.slane %v349_v20, 1 }
 0x2da   : > { %1260 = vrot.lane.b32.xlu1 %v3846_v14, %s3214_s10 }
 0x2db   : > { %v1187_v38 = vadd.f32 %v1186_v36, %v1168_v34  ;;  %v1203_v25 = vmul.f32 %v3912_v21, %v3830_v60  ;;  %v3925_v34 = vperm.slane %v352_v22, 0  ;;  %v3927_v36 = vperm.slane %v352_v22, 1 }
 0x2dd   : > { %v3872_v39 = vmax.f32 %v1187_v38, 0.0 }
 0x2e1   : > { %1220 = vrot.lane.b32.xlu2 %v3854_v28, %s3222_s27  ;;  %1305 = vrot.lane.b32.xlu0 %v3846_v14, %s3213_s9 }
 0x2e2   : > { %1266 = vrot.lane.b32.xlu1 %v3854_v28, %s3214_s10 }
 0x2e9   : > { %1311 = vrot.lane.b32.xlu2 %v3854_v28, %s3213_s9  ;;  %1268 = vrot.lane.b32.xlu0 %v3862_v37, %s3214_s10 }
 0x2ea   : > { %1216 = vrot.lane.b32.xlu1 %v3864_v8, %s3222_s27 }
 0x2f1   : > { %1262 = vrot.lane.b32.xlu2 %v3864_v8, %s3214_s10  ;;  %1224 = vrot.lane.b32.xlu0 %v3872_v39, %s3222_s27 }
 0x2f2   : > { %1307 = vrot.lane.b32.xlu1 %v3864_v8, %s3213_s9 }
 0x2f9   : > { %1222 = vrot.lane.b32.xlu2 %v3862_v37, %s3222_s27  ;;  %1315 = vrot.lane.b32.xlu0 %v3872_v39, %s3213_s9 }
 0x2fa   : > { %1270 = vrot.lane.b32.xlu1 %v3872_v39, %s3214_s10 }
 0x301   : > { %1313 = vrot.lane.b32.xlu2 %v3862_v37, %s3213_s9 }
 0x31b   : > { %v1211_v43 = vpop.permute.xlu2 %1210 }
 0x323   : > { %v1302_v44 = vpop.permute.xlu2 %1301 }
 0x32b   : > { %v3888_v48 = vpop.permute.xlu2 %1258 }
 0x333   : > { %v1257_v49 = vpop.permute.xlu1 %1256  ;;  %v3890_v6 = vpop.permute.xlu2 %1214 }
 0x33b   : > { %v1213_v51 = vpop.permute.xlu0 %1212  ;;  %v1221_v53 = vpop.permute.xlu2 %1220 }
 0x33c   : > { %v1219_v32 = vpop.permute.xlu1 %1218  ;;  %v1232_v58 = vsel %vm1226_vm3, %v1221_v53, %v1213_v51 }
 0x33d   : > { %v1227_v10 = vsel %vm1226_vm3, %v1211_v43, %v1219_v32  ;;  %v1231_v11 = vsel %vm1226_vm3, %v1219_v32, %v1211_v43 }
 0x33e   : > { %v1240_v7 = vmul.f32 %v3902_v3, %v1231_v11  ;;  %v1241_v30 = vmul.f32 %v3904_v5, %v1227_v10 }
 0x340   : > { %v1248_v54 = vadd.f32 %v1240_v7, %v1202_v33  ;;  %v1249_v60 = vadd.f32 %v1241_v30, %v1203_v25  ;;  %v1242_v7 = vmul.f32 %v3902_v3, %v1232_v58  ;;  %v1204_v33 = vmul.f32 %v3910_v50, %v3832_v61 }
 0x341   : > { %v1228_v25 = vsel %vm1226_vm3, %v1213_v51, %v1221_v53 }
 0x342   : > { %v1243_v51 = vmul.f32 %v3904_v5, %v1228_v25  ;;  %v1206_v25 = vmul.f32 %v3910_v50, %v3846_v14 }
 0x343   : > { %v3899_v4 = vpop.permute.xlu0 %1303  ;;  %v1312_v62 = vpop.permute.xlu2 %1311 }
 0x344   : > { %v1310_v0 = vpop.permute.xlu1 %1309 }
 0x345   : > { %v1317_v43 = vsel %vm502_vm11, %v1302_v44, %v1310_v0  ;;  %v1321_v40 = vsel %vm502_vm11, %v1310_v0, %v1302_v44 }
 0x346   : > { %v1330_v44 = vmul.f32 %v3925_v34, %v1317_v43  ;;  %v1331_v0 = vmul.f32 %v3927_v36, %v1321_v40  ;;  %v1318_v43 = vsel %vm502_vm11, %v3899_v4, %v1312_v62 }
 0x347   : > { %v1332_v53 = vmul.f32 %v3925_v34, %v1318_v43 }
 0x34b   : > { %v1265_v38 = vpop.permute.xlu0 %1264  ;;  %v3941_v10 = vpop.permute.xlu2 %1262 }
 0x34c   : > { %v1272_v17 = vsel %vm463_vm9, %v1257_v49, %v1265_v38  ;;  %v1276_v52 = vsel %vm463_vm9, %v1265_v38, %v1257_v49  ;;  %v1261_v32 = vpop.permute.xlu1 %1260 }
 0x34d   : > { %v1285_v55 = vmul.f32 %v3917_v24, %v1276_v52  ;;  %v1286_v57 = vmul.f32 %v3919_v23, %v1272_v17  ;;  %v1250_v17 = vadd.f32 %v1242_v7, %v1204_v33 }
 0x34f   : > { %v1293_v11 = vadd.f32 %v1285_v55, %v1248_v54  ;;  %v1294_v20 = vadd.f32 %v1286_v57, %v1249_v60  ;;  %v1205_v55 = vmul.f32 %v3912_v21, %v3854_v28 }
 0x351   : > { %v3945_v22 = vadd.f32 %v1330_v44, %v1293_v11  ;;  %v3947_v49 = vadd.f32 %v1331_v0, %v1294_v20  ;;  %v1251_v44 = vadd.f32 %v1243_v51, %v1205_v55 }
 0x353   : > { %v1306_v30 = vpop.permute.xlu0 %1305  ;;  %1359 = vrot.lane.b32.xlu2 %v3945_v22, %s3225_s15  ;;  %1413 = vrot.lane.b32.xlu0 %v3947_v49, %s3216_s12  ;;  %v1223_v54 = vpop.permute.xlu2 %1222 }
 0x354   : > { %v1267_v38 = vpop.permute.xlu1 %1266  ;;  %1367 = vrot.lane.b32.xlu1 %v3947_v49, %s3225_s15  ;;  %v1233_v28 = vsel %vm1226_vm3, %v1223_v54, %v3890_v6 }
 0x355   : > { %v1277_v40 = vsel %vm463_vm9, %v1267_v38, %v3888_v48  ;;  %v1273_v61 = vsel %vm463_vm9, %v3888_v48, %v1267_v38  ;;  %v1322_v48 = vsel %vm502_vm11, %v1312_v62, %v3899_v4  ;;  %v1244_v4 = vmul.f32 %v3902_v3, %v1233_v28 }
 0x356   : > { %v1287_v52 = vmul.f32 %v3917_v24, %v1277_v40  ;;  %v1288_v57 = vmul.f32 %v3919_v23, %v1273_v61  ;;  %v1333_v7 = vmul.f32 %v3927_v36, %v1322_v48  ;;  %v1229_v61 = vsel %vm1226_vm3, %v3890_v6, %v1223_v54 }
 0x357   : > { %v1252_v40 = vadd.f32 %v1244_v4, %v1206_v25 }
 0x358   : > { %v1295_v60 = vadd.f32 %v1287_v52, %v1250_v17  ;;  %v1296_v20 = vadd.f32 %v1288_v57, %v1251_v44  ;;  %v1207_v57 = vmul.f32 %v3912_v21, %v3862_v37 }
 0x35a   : > { %v3975_v58 = vadd.f32 %v1332_v53, %v1295_v60  ;;  %v3993_v62 = vadd.f32 %v1333_v7, %v1296_v20  ;;  %v1245_v53 = vmul.f32 %v3904_v5, %v1229_v61  ;;  %v1209_v61 = vmul.f32 %v3912_v21, %v3872_v39 }
 0x35b   : > { %1450 = vrot.lane.b32.xlu2 %v3945_v22, %s3211_s30  ;;  %v1269_v0 = vpop.permute.xlu0 %1268  ;;  %v1314_v38 = vpop.permute.xlu2 %1313 }
 0x35c   : > { %v1217_v11 = vpop.permute.xlu1 %1216  ;;  %1361 = vrot.lane.b32.xlu0 %v3975_v58, %s3225_s15  ;;  %1405 = vrot.lane.b32.xlu1 %v3945_v22, %s3216_s12  ;;  %v1278_v33 = vsel %vm463_vm9, %v1269_v0, %v1261_v32  ;;  %v1319_v52 = vsel %vm502_vm11, %v1306_v30, %v1314_v38  ;;  %v1274_v51 = vsel %vm463_vm9, %v1261_v32, %v1269_v0 }
 0x35d   : > { %v1289_v43 = vmul.f32 %v3917_v24, %v1278_v33  ;;  %v1334_v60 = vmul.f32 %v3925_v34, %v1319_v52  ;;  %v1290_v6 = vmul.f32 %v3919_v23, %v1274_v51  ;;  %v1253_v44 = vadd.f32 %v1245_v53, %v1207_v57 }
 0x35e   : > { %v1323_v32 = vsel %vm502_vm11, %v1314_v38, %v1306_v30  ;;  %v1208_v30 = vmul.f32 %v3910_v50, %v3864_v8 }
 0x35f   : > { %v1297_v14 = vadd.f32 %v1289_v43, %v1252_v40  ;;  %v1298_v0 = vadd.f32 %v1290_v6, %v1253_v44  ;;  %v1335_v28 = vmul.f32 %v3927_v36, %v1323_v32 }
 0x361   : > { %v4016_v54 = vadd.f32 %v1334_v60, %v1297_v14  ;;  %v4033_v33 = vadd.f32 %v1335_v28, %v1298_v0 }
 0x363   : > { %1369 = vrot.lane.b32.xlu2 %v3993_v62, %s3225_s15  ;;  %v1225_v55 = vpop.permute.xlu0 %1224 }
 0x364   : > { %v1308_v17 = vpop.permute.xlu1 %1307  ;;  %1452 = vrot.lane.b32.xlu0 %v3975_v58, %s3211_s30  ;;  %1458 = vrot.lane.b32.xlu1 %v3947_v49, %s3211_s30  ;;  %v1234_v37 = vsel %vm1226_vm3, %v1225_v55, %v1217_v11  ;;  %v1230_v38 = vsel %vm1226_vm3, %v1217_v11, %v1225_v55 }
 0x365   : > { %v1246_v7 = vmul.f32 %v3902_v3, %v1234_v37 }
 0x367   : > { %v1254_v43 = vadd.f32 %v1246_v7, %v1208_v30 }
 0x36b   : > { %1407 = vrot.lane.b32.xlu2 %v3975_v58, %s3216_s12  ;;  %v1316_v4 = vpop.permute.xlu0 %1315 }
 0x36c   : > { %1363 = vrot.lane.b32.xlu0 %v4016_v54, %s3225_s15  ;;  %v1271_v48 = vpop.permute.xlu1 %1270  ;;  %1415 = vrot.lane.b32.xlu1 %v3993_v62, %s3216_s12  ;;  %v1320_v3 = vsel %vm502_vm11, %v1308_v17, %v1316_v4 }
 0x36d   : > { %v1279_v20 = vsel %vm463_vm9, %v1271_v48, %v3941_v10  ;;  %v1275_v8 = vsel %vm463_vm9, %v3941_v10, %v1271_v48  ;;  %v1336_v40 = vmul.f32 %v3925_v34, %v1320_v3  ;;  %v1324_v10 = vsel %vm502_vm11, %v1316_v4, %v1308_v17 }
 0x36e   : > { %v1291_v25 = vmul.f32 %v3917_v24, %v1279_v20  ;;  %v1247_v24 = vmul.f32 %v3904_v5, %v1230_v38  ;;  %v1292_v11 = vmul.f32 %v3919_v23, %v1275_v8  ;;  %v1337_v39 = vmul.f32 %v3927_v36, %v1324_v10  ;;  %v3200_v36 = vld [vmem:[%s4786_s1] ss:$2 sm:$0x3] }
 0x36f   : > { %v338_v17 = vand.u32 1, %v3200_v36  ;;  %vm356_vm3 = vcmp.ge.s32.totalorder %v3200_v36, 2  ;;  %vm360_vm0 = vcmp.eq.s32.totalorder %v3200_v36, 15  ;;  %vm353_vm2 = vcmp.eq.s32.totalorder %v3200_v36, 0 }
 0x370   : > { %v1299_v50 = vadd.f32 %v1291_v25, %v1254_v43  ;;  %v1255_v14 = vadd.f32 %v1247_v24, %v1209_v61  ;;  %v361_v57 = vsel %vm360_vm0, 1.0, %v3224_v56  ;;  %vm363_vm8 = vcmp.le.s32.totalorder %v3200_v36, 13 }
 0x371   : > { %vm339_vm1 = vcmp.eq.s32.totalorder %v338_v17, 0 }
 0x372   : > { %v4056_v52 = vadd.f32 %v1336_v40, %v1299_v50  ;;  %v1300_v5 = vadd.f32 %v1292_v11, %v1255_v14  ;;  %vm357_vm10 = vmand %vm339_vm1, %vm356_vm3  ;;  %v354_v55 = vsel %vm339_vm1, 0.75, %v3219_v13 }
 0x373   : > { %1460 = vrot.lane.b32.xlu2 %v3993_v62, %s3211_s30  ;;  %vm359_vm15 = vmxor %vm339_vm1, %vm3223_vm14  ;;  %v358_v6 = vsel %vm357_vm10, 0.25, %v3219_v13  ;;  %v355_v44 = vsel %vm353_vm2, 1.0, %v354_v55  ;;  %vm4803_vm14 = vcmp.lt.s32.totalorder %v3388_v12, 111 }
 0x374   : > { %1417 = vrot.lane.b32.xlu0 %v4033_v33, %s3216_s12  ;;  %1409 = vrot.lane.b32.xlu1 %v4016_v54, %s3216_s12  ;;  %v4067_v21 = vadd.f32 %v1337_v39, %v1300_v5  ;;  %v362_v48 = vsel %vm359_vm15, %v361_v57, 0.0  ;;  %v4089_v0 = vperm.slane %v358_v6, 0  ;;  %v4091_v37 = vperm.slane %v358_v6, 1  ;;  %vm364_vm3 = vmand %vm359_vm15, %vm363_vm8 }
 0x375   : > { %v4093_v7 = vperm.slane %v355_v44, 0  ;;  %v4095_v30 = vperm.slane %v355_v44, 1  ;;  %v4101_v25 = vperm.slane %v362_v48, 0  ;;  %v4103_v38 = vperm.slane %v362_v48, 1  ;;  %vm4804_vm1 = vmmov %vm4803_vm14 }
 0x376   : > { %v365_v8 = vsel %vm364_vm3, 0.25, %v3219_v13  ;;  %vm4805_vm0 = vmmov %vm4804_vm1  ;;  %vm2074_vm3 = vcmask 261120  }
 0x377   : > { %v1351_v40 = vmul.f32 %v4093_v7, %v3945_v22  ;;  %v1352_v61 = vmul.f32 %v4095_v30, %v3947_v49  ;;  %v4118_v10 = vperm.slane %v365_v8, 0  ;;  %v4120_v5 = vperm.slane %v365_v8, 1  ;;  %vm4806_vm10 = vmmov %vm4805_vm0 }
 0x378   : > { %vm4807_vm2 = vmmov %vm4805_vm0 }
 0x379   : > { %vm4808_vm15 = vmmov %vm4805_vm0 }
 0x37a   : > { %vm4809_vm8 = vmmov %vm4805_vm0 }
 0x37b   : > { %1371 = vrot.lane.b32.xlu2 %v4033_v33, %s3225_s15 }
 0x37c   : > { %1454 = vrot.lane.b32.xlu0 %v4016_v54, %s3211_s30  ;;  %1365 = vrot.lane.b32.xlu1 %v4056_v52, %s3225_s15 }
 0x383   : > { %1462 = vrot.lane.b32.xlu2 %v4033_v33, %s3211_s30 }
 0x384   : > { %1373 = vrot.lane.b32.xlu0 %v4067_v21, %s3225_s15  ;;  %1419 = vrot.lane.b32.xlu1 %v4067_v21, %s3216_s12 }
 0x38b   : > { %1411 = vrot.lane.b32.xlu2 %v4056_v52, %s3216_s12 }
 0x38c   : > { %1464 = vrot.lane.b32.xlu0 %v4067_v21, %s3211_s30  ;;  %1456 = vrot.lane.b32.xlu1 %v4056_v52, %s3211_s30 }
 0x3ad   : > { %v1360_v23 = vpop.permute.xlu2 %1359 }
 0x3b5   : > { %v1451_v34 = vpop.permute.xlu2 %1450 }
 0x3bd   : > { %v1370_v53 = vpop.permute.xlu2 %1369 }
 0x3c5   : > { %v1414_v51 = vpop.permute.xlu0 %1413  ;;  %v1408_v20 = vpop.permute.xlu2 %1407 }
 0x3c6   : > { %v1368_v60 = vpop.permute.xlu1 %1367 }
 0x3c7   : > { %v1376_v56 = vsel %vm1375_vm5, %v1360_v23, %v1368_v60  ;;  %v1380_v4 = vsel %vm1375_vm5, %v1368_v60, %v1360_v23 }
 0x3c8   : > { %v1389_v50 = vmul.f32 %v4089_v0, %v1380_v4  ;;  %v1390_v24 = vmul.f32 %v4091_v37, %v1376_v56 }
 0x3ca   : > { %v1397_v13 = vadd.f32 %v1389_v50, %v1351_v40  ;;  %v1398_v23 = vadd.f32 %v1390_v24, %v1352_v61 }
 0x3cd   : > { %v1461_v6 = vpop.permute.xlu2 %1460 }
 0x3ce   : > { %v1362_v32 = vpop.permute.xlu0 %1361  ;;  %v1406_v28 = vpop.permute.xlu1 %1405 }
 0x3cf   : > { %v1421_v43 = vsel %vm411_vm4, %v1406_v28, %v1414_v51  ;;  %v1425_v3 = vsel %vm411_vm4, %v1414_v51, %v1406_v28  ;;  %v1381_v17 = vsel %vm1375_vm5, %v1370_v53, %v1362_v32  ;;  %v1377_v44 = vsel %vm1375_vm5, %v1362_v32, %v1370_v53 }
 0x3d0   : > { %v1434_v11 = vmul.f32 %v4101_v25, %v1425_v3  ;;  %v1435_v14 = vmul.f32 %v4103_v38, %v1421_v43  ;;  %v1391_v56 = vmul.f32 %v4089_v0, %v1381_v17  ;;  %v1392_v4 = vmul.f32 %v4091_v37, %v1377_v44 }
 0x3d1   : > { %v1353_v32 = vmul.f32 %v4093_v7, %v3975_v58  ;;  %v1354_v3 = vmul.f32 %v4095_v30, %v3993_v62 }
 0x3d2   : > { %v1442_v51 = vadd.f32 %v1434_v11, %v1397_v13  ;;  %v1443_v60 = vadd.f32 %v1435_v14, %v1398_v23 }
 0x3d3   : > { %v1399_v14 = vadd.f32 %v1391_v56, %v1353_v32  ;;  %v1400_v13 = vadd.f32 %v1392_v4, %v1354_v3  ;;  %v1356_v3 = vmul.f32 %v4095_v30, %v4033_v33 }
 0x3d6   : > { %v1453_v39 = vpop.permute.xlu0 %1452  ;;  %v1459_v36 = vpop.permute.xlu1 %1458 }
 0x3d7   : > { %v1466_v22 = vsel %vm554_vm12, %v1451_v34, %v1459_v36  ;;  %v1470_v49 = vsel %vm554_vm12, %v1459_v36, %v1451_v34  ;;  %v1467_v24 = vsel %vm554_vm12, %v1453_v39, %v1461_v6  ;;  %v1471_v40 = vsel %vm554_vm12, %v1461_v6, %v1453_v39  ;;  %v1372_v39 = vpop.permute.xlu2 %1371 }
 0x3d8   : > { %v1479_v55 = vmul.f32 %v4118_v10, %v1466_v22  ;;  %v1480_v57 = vmul.f32 %v4120_v5, %v1470_v49  ;;  %v1481_v23 = vmul.f32 %v4118_v10, %v1467_v24  ;;  %v1482_v36 = vmul.f32 %v4120_v5, %v1471_v40 }
 0x3da   : > { %v4132_v48 = vadd.f32 %v1479_v55, %v1442_v51  ;;  %v4134_v28 = vadd.f32 %v1480_v57, %v1443_v60 }
 0x3dc   : > { %v1655_v34 = vmul.f32 %v4132_v48, %v3415_v26  ;;  %v1656_v43 = vmul.f32 %v4134_v28, %v3417_v27  ;;  %1751 = vrot.lane.b32.xlu2 %v4132_v48, %s3211_s30  ;;  %1615 = vrot.lane.b32.xlu1 %v4132_v48, %s3214_s10 }
 0x3dd   : > { %1623 = vrot.lane.b32.xlu0 %v4134_v28, %s3214_s10 }
 0x3de   : > { %v1364_v53 = vpop.permute.xlu0 %1363  ;;  %v1663_v8 = vpack.c.bf16 %v1656_v43, %v1655_v34  ;;  %v1416_v50 = vpop.permute.xlu1 %1415 }
 0x3df   : > { %v1422_v61 = vsel %vm411_vm4, %v1408_v20, %v1416_v50  ;;  %v1426_v11 = vsel %vm411_vm4, %v1416_v50, %v1408_v20  ;;  %v1378_v60 = vsel %vm1375_vm5, %v1364_v53, %v1372_v39  ;;  %v1382_v55 = vsel %vm1375_vm5, %v1372_v39, %v1364_v53  ;;  %v1463_v24 = vpop.permute.xlu2 %1462 }
 0x3e0   : > { %1667 = vst [vmem:[#allocation2 + $0x80] sm:$0xff] %v1663_v8  ;;  %v1436_v58 = vmul.f32 %v4101_v25, %v1426_v11  ;;  %v1437_v62 = vmul.f32 %v4103_v38, %v1422_v61  ;;  %v1393_v43 = vmul.f32 %v4089_v0, %v1382_v55  ;;  %v1394_v32 = vmul.f32 %v4091_v37, %v1378_v60 }
 0x3e1   : > { %v1355_v53 = vmul.f32 %v4093_v7, %v4016_v54 }
 0x3e2   : > { %v1444_v17 = vadd.f32 %v1436_v58, %v1399_v14  ;;  %v1445_v22 = vadd.f32 %v1437_v62, %v1400_v13  ;;  %v1402_v61 = vadd.f32 %v1394_v32, %v1356_v3 }
 0x3e3   : > { %v1401_v40 = vadd.f32 %v1393_v43, %v1355_v53  ;;  %v1358_v43 = vmul.f32 %v4095_v30, %v4067_v21 }
 0x3e4   : > { %v4164_v49 = vadd.f32 %v1481_v23, %v1444_v17  ;;  %v4166_v51 = vadd.f32 %v1482_v36, %v1445_v22  ;;  %1535 = vrot.lane.b32.xlu2 %v4132_v48, %s3216_s12  ;;  %1575 = vrot.lane.b32.xlu1 %v4132_v48, %s3215_s11 }
 0x3e5   : > { %1583 = vrot.lane.b32.xlu0 %v4134_v28, %s3215_s11 }
 0x3e6   : > { %v1418_v20 = vpop.permute.xlu0 %1417  ;;  %v1657_v57 = vmul.f32 %v4164_v49, %v3415_v26  ;;  %v1658_v6 = vmul.f32 %v4166_v51, %v3417_v27  ;;  %v1410_v44 = vpop.permute.xlu1 %1409 }
 0x3e7   : > { %v1423_v4 = vsel %vm411_vm4, %v1410_v44, %v1418_v20  ;;  %v1427_v34 = vsel %vm411_vm4, %v1418_v20, %v1410_v44 }
 0x3e8   : > { %v1664_v56 = vpack.c.bf16 %v1658_v6, %v1657_v57  ;;  %v1438_v8 = vmul.f32 %v4101_v25, %v1427_v34  ;;  %v1439_v50 = vmul.f32 %v4103_v38, %v1423_v4  ;;  %v1412_v4 = vpop.permute.xlu2 %1411  ;;  %v1357_v34 = vmul.f32 %v4093_v7, %v4056_v52 }
 0x3ea   : > { %1668 = vst [vmem:[#allocation2 + $0x88] sm:$0xff] %v1664_v56  ;;  %v1446_v13 = vadd.f32 %v1438_v8, %v1401_v40  ;;  %v1447_v58 = vadd.f32 %v1439_v50, %v1402_v61 }
 0x3ec   : > { %1719 = vrot.lane.b32.xlu2 %v4134_v28, %s3212_s8  ;;  %1759 = vrot.lane.b32.xlu1 %v4134_v28, %s3211_s30 }
 0x3ed   : > { %1711 = vrot.lane.b32.xlu0 %v4132_v48, %s3212_s8 }
 0x3ee   : > { %v1455_v54 = vpop.permute.xlu0 %1454  ;;  %v1366_v14 = vpop.permute.xlu1 %1365 }
 0x3ef   : > { %v1468_v33 = vsel %vm554_vm12, %v1455_v54, %v1463_v24  ;;  %v1472_v11 = vsel %vm554_vm12, %v1463_v24, %v1455_v54 }
 0x3f0   : > { %v1483_v62 = vmul.f32 %v4118_v10, %v1468_v33  ;;  %v1484_v23 = vmul.f32 %v4120_v5, %v1472_v11 }
 0x3f2   : > { %v4206_v36 = vadd.f32 %v1483_v62, %v1446_v13  ;;  %v4208_v17 = vadd.f32 %v1484_v23, %v1447_v58 }
 0x3f4   : > { %v1659_v22 = vmul.f32 %v4206_v36, %v3415_v26  ;;  %v1660_v39 = vmul.f32 %v4208_v17, %v3417_v27  ;;  %1503 = vrot.lane.b32.xlu2 %v4134_v28, %s3217_s13  ;;  %1543 = vrot.lane.b32.xlu1 %v4134_v28, %s3216_s12 }
 0x3f5   : > { %1495 = vrot.lane.b32.xlu0 %v4132_v48, %s3217_s13 }
 0x3f6   : > { %v1374_v20 = vpop.permute.xlu0 %1373  ;;  %v1665_v60 = vpack.c.bf16 %v1660_v39, %v1659_v22  ;;  %v1420_v6 = vpop.permute.xlu1 %1419 }
 0x3f7   : > { %v1379_v55 = vsel %vm1375_vm5, %v1366_v14, %v1374_v20  ;;  %v1383_v57 = vsel %vm1375_vm5, %v1374_v20, %v1366_v14  ;;  %v1424_v32 = vsel %vm411_vm4, %v1412_v4, %v1420_v6  ;;  %v1428_v53 = vsel %vm411_vm4, %v1420_v6, %v1412_v4  ;;  %vm4810_vm5 = vmmov %vm4805_vm0 }
 0x3f8   : > { %1669 = vst [vmem:[#allocation2 + $0x90] sm:$0xff] %v1665_v60  ;;  %v1395_v44 = vmul.f32 %v4089_v0, %v1383_v57  ;;  %v1396_v56 = vmul.f32 %v4091_v37, %v1379_v55  ;;  %v1440_v21 = vmul.f32 %v4101_v25, %v1428_v53  ;;  %v1441_v0 = vmul.f32 %v4103_v38, %v1424_v32 }
 0x3fa   : > { %v1403_v3 = vadd.f32 %v1395_v44, %v1357_v34  ;;  %v1404_v8 = vadd.f32 %v1396_v56, %v1358_v43 }
 0x3fc   : > { %1617 = vrot.lane.b32.xlu2 %v4164_v49, %s3214_s10  ;;  %1671 = vrot.lane.b32.xlu1 %v4132_v48, %s3213_s9  ;;  %v1448_v50 = vadd.f32 %v1440_v21, %v1403_v3  ;;  %v1449_v24 = vadd.f32 %v1441_v0, %v1404_v8 }
 0x3fd   : > { %1753 = vrot.lane.b32.xlu0 %v4164_v49, %s3211_s30 }
 0x3fe   : > { %v1465_v52 = vpop.permute.xlu0 %1464  ;;  %v1457_v37 = vpop.permute.xlu1 %1456 }
 0x3ff   : > { %v1469_v7 = vsel %vm554_vm12, %v1457_v37, %v1465_v52  ;;  %v1473_v30 = vsel %vm554_vm12, %v1465_v52, %v1457_v37 }
 0x400   : > { %v1485_v40 = vmul.f32 %v4118_v10, %v1469_v7  ;;  %v1486_v61 = vmul.f32 %v4120_v5, %v1473_v30 }
 0x402   : > { %v4248_v54 = vadd.f32 %v1485_v40, %v1448_v50  ;;  %v4250_v33 = vadd.f32 %v1486_v61, %v1449_v24 }
 0x404   : > { %1577 = vrot.lane.b32.xlu2 %v4164_v49, %s3215_s11  ;;  %1625 = vrot.lane.b32.xlu1 %v4166_v51, %s3214_s10  ;;  %v1661_v25 = vmul.f32 %v4248_v54, %v3415_v26  ;;  %v1662_v38 = vmul.f32 %v4250_v33, %v3417_v27 }
 0x405   : > { %1537 = vrot.lane.b32.xlu0 %v4164_v49, %s3216_s12 }
 0x406   : > { %v1666_v10 = vpack.c.bf16 %v1662_v38, %v1661_v25 }
 0x408   : > { %1670 = vst [vmem:[#allocation2 + $0x98] sm:$0xff] %v1666_v10 }
 0x40c   : > { %1761 = vrot.lane.b32.xlu2 %v4166_v51, %s3211_s30  ;;  %1585 = vrot.lane.b32.xlu1 %v4166_v51, %s3215_s11 }
 0x40d   : > { %1721 = vrot.lane.b32.xlu0 %v4166_v51, %s3212_s8 }
 0x414   : > { %1545 = vrot.lane.b32.xlu2 %v4166_v51, %s3216_s12  ;;  %1713 = vrot.lane.b32.xlu1 %v4164_v49, %s3212_s8 }
 0x415   : > { %1505 = vrot.lane.b32.xlu0 %v4166_v51, %s3217_s13 }
 0x41c   : > { %1627 = vrot.lane.b32.xlu2 %v4208_v17, %s3214_s10  ;;  %1497 = vrot.lane.b32.xlu1 %v4164_v49, %s3217_s13 }
 0x41d   : > { %1619 = vrot.lane.b32.xlu0 %v4206_v36, %s3214_s10 }
 0x424   : > { %1579 = vrot.lane.b32.xlu2 %v4206_v36, %s3215_s11  ;;  %1587 = vrot.lane.b32.xlu1 %v4208_v17, %s3215_s11 }
 0x425   : > { %1755 = vrot.lane.b32.xlu0 %v4206_v36, %s3211_s30 }
 0x42c   : > { %1763 = vrot.lane.b32.xlu2 %v4208_v17, %s3211_s30  ;;  %1715 = vrot.lane.b32.xlu1 %v4206_v36, %s3212_s8 }
 0x42d   : > { %1539 = vrot.lane.b32.xlu0 %v4206_v36, %s3216_s12 }
 0x434   : > { %1547 = vrot.lane.b32.xlu2 %v4208_v17, %s3216_s12  ;;  %1499 = vrot.lane.b32.xlu1 %v4206_v36, %s3217_s13 }
 0x435   : > { %1723 = vrot.lane.b32.xlu0 %v4208_v17, %s3212_s8 }
 0x436   : > { %v1752_v5 = vpop.permute.xlu2 %1751 }
 0x43c   : > { %1675 = vrot.lane.b32.xlu2 %v4206_v36, %s3213_s9  ;;  %1683 = vrot.lane.b32.xlu1 %v4208_v17, %s3213_s9 }
 0x43d   : > { %1507 = vrot.lane.b32.xlu0 %v4208_v17, %s3217_s13 }
 0x43e   : > { %v1536_v11 = vpop.permute.xlu2 %1535 }
 0x444   : > { %1589 = vrot.lane.b32.xlu2 %v4250_v33, %s3215_s11  ;;  %1621 = vrot.lane.b32.xlu1 %v4248_v54, %s3214_s10 }
 0x445   : > { %1629 = vrot.lane.b32.xlu0 %v4250_v33, %s3214_s10 }
 0x446   : > { %v1720_v14 = vpop.permute.xlu2 %1719 }
 0x44c   : > { %1717 = vrot.lane.b32.xlu2 %v4248_v54, %s3212_s8  ;;  %1757 = vrot.lane.b32.xlu1 %v4248_v54, %s3211_s30 }
 0x44d   : > { %1581 = vrot.lane.b32.xlu0 %v4248_v54, %s3215_s11 }
 0x44e   : > { %v1616_v13 = vpop.permute.xlu1 %1615  ;;  %v1504_v58 = vpop.permute.xlu2 %1503 }
 0x44f   : > { %v1624_v62 = vpop.permute.xlu0 %1623 }
 0x450   : > { %v1631_v23 = vsel %vm463_vm9, %v1616_v13, %v1624_v62  ;;  %v1635_v22 = vsel %vm463_vm9, %v1624_v62, %v1616_v13 }
 0x451   : > { %v1639_v39 = vmul.f32 %v1635_v22, %v3500_v31  ;;  %v1640_v20 = vmul.f32 %v1631_v23, %v3502_v35 }
 0x453   : > { %v1647_v60 = vpack.c.bf16 %v1640_v20, %v1639_v39 }
 0x454   : > { %1501 = vrot.lane.b32.xlu2 %v4248_v54, %s3217_s13  ;;  %1541 = vrot.lane.b32.xlu1 %v4248_v54, %s3216_s12 }
 0x455   : > { %1651 = vst [vmem:[#allocation2 + $0x60] sm:$0xff] %v1647_v60  ;;  %1765 = vrot.lane.b32.xlu0 %v4250_v33, %s3211_s30 }
 0x456   : > { %v1576_v55 = vpop.permute.xlu1 %1575  ;;  %v4328_v57 = vpop.permute.xlu2 %1617 }
 0x457   : > { %v1584_v6 = vpop.permute.xlu0 %1583 }
 0x458   : > { %v1591_v44 = vsel %vm437_vm6, %v1576_v55, %v1584_v6  ;;  %v1595_v56 = vsel %vm437_vm6, %v1584_v6, %v1576_v55 }
 0x459   : > { %v1599_v4 = vmul.f32 %v1595_v56, %v3538_v18  ;;  %v1600_v34 = vmul.f32 %v1591_v44, %v3540_v19 }
 0x45b   : > { %v1607_v43 = vpack.c.bf16 %v1600_v34, %v1599_v4 }
 0x45c   : > { %1685 = vrot.lane.b32.xlu2 %v4250_v33, %s3213_s9  ;;  %1725 = vrot.lane.b32.xlu1 %v4250_v33, %s3212_s8 }
 0x45d   : > { %1611 = vst [vmem:[#allocation2 + $0x40] sm:$0xff] %v1607_v43  ;;  %1549 = vrot.lane.b32.xlu0 %v4250_v33, %s3216_s12 }
 0x45e   : > { %v4342_v32 = vpop.permute.xlu2 %1577  ;;  %v1760_v53 = vpop.permute.xlu1 %1759 }
 0x45f   : > { %v1767_v3 = vsel %vm554_vm12, %v1752_v5, %v1760_v53  ;;  %v1771_v8 = vsel %vm554_vm12, %v1760_v53, %v1752_v5  ;;  %v1712_v52 = vpop.permute.xlu0 %1711 }
 0x460   : > { %v1775_v21 = vmul.f32 %v1767_v3, %v3398_v15  ;;  %v1776_v0 = vmul.f32 %v1771_v8, %v3400_v16  ;;  %v1727_v37 = vsel %vm528_vm7, %v1712_v52, %v1720_v14  ;;  %v1731_v7 = vsel %vm528_vm7, %v1720_v14, %v1712_v52 }
 0x461   : > { %v1735_v30 = vmul.f32 %v1727_v37, %v3451_v45  ;;  %v1736_v50 = vmul.f32 %v1731_v7, %v3453_v46 }
 0x462   : > { %v1783_v24 = vpack.c.bf16 %v1776_v0, %v1775_v21 }
 0x463   : > { %v1743_v40 = vpack.c.bf16 %v1736_v50, %v1735_v30 }
 0x464   : > { %1787 = vst [vmem:[#allocation2 + $0xe0] sm:$0xff] %v1783_v24  ;;  %1673 = vrot.lane.b32.xlu2 %v4164_v49, %s3213_s9  ;;  %1509 = vrot.lane.b32.xlu1 %v4250_v33, %s3217_s13 }
 0x465   : > { %1747 = vst [vmem:[#allocation2 + $0xc0] sm:$0xff] %v1743_v40  ;;  %1677 = vrot.lane.b32.xlu0 %v4248_v54, %s3213_s9 }
 0x466   : > { %v1762_v61 = vpop.permute.xlu2 %1761  ;;  %v1544_v25 = vpop.permute.xlu1 %1543 }
 0x467   : > { %v1551_v38 = vsel %vm411_vm4, %v1536_v11, %v1544_v25  ;;  %v1555_v10 = vsel %vm411_vm4, %v1544_v25, %v1536_v11  ;;  %v1496_v5 = vpop.permute.xlu0 %1495 }
 0x468   : > { %v1559_v14 = vmul.f32 %v1555_v10, %v3564_v41  ;;  %v1560_v13 = vmul.f32 %v1551_v38, %v3566_v42  ;;  %v1511_v62 = vsel %vm385_vm13, %v1496_v5, %v1504_v58  ;;  %v1515_v23 = vsel %vm385_vm13, %v1504_v58, %v1496_v5 }
 0x469   : > { %v1519_v22 = vmul.f32 %v1515_v23, %v3582_v59  ;;  %v1520_v39 = vmul.f32 %v1511_v62, %v3584_v63 }
 0x46a   : > { %v1567_v20 = vpack.c.bf16 %v1560_v13, %v1559_v14 }
 0x46b   : > { %v1527_v60 = vpack.c.bf16 %v1520_v39, %v1519_v22 }
 0x46c   : > { %1571 = vst [vmem:[#allocation2 + $0x20] sm:$0xff] %v1567_v20  ;;  %1795 = vrot.lane.b32.xlu2 %v4206_v36, %s3218_s14  ;;  %1681 = vrot.lane.b32.xlu1 %v4166_v51, %s3213_s9 }
 0x46d   : > { %1531 = vst [vmem:[#allocation2] sm:$0xff] %v1527_v60  ;;  %1679 = vrot.lane.b32.xlu0 %v4134_v28, %s3213_s9 }
 0x46e   : > { %v1546_v11 = vpop.permute.xlu2 %1545  ;;  %v4380_v55 = vpop.permute.xlu1 %1671 }
 0x46f   : > { %v1754_v58 = vpop.permute.xlu0 %1753 }
 0x470   : > { %v1768_v6 = vsel %vm554_vm12, %v1754_v58, %v1762_v61  ;;  %v1772_v44 = vsel %vm554_vm12, %v1762_v61, %v1754_v58 }
 0x471   : > { %v1777_v56 = vmul.f32 %v1768_v6, %v3398_v15  ;;  %v1778_v36 = vmul.f32 %v1772_v44, %v3400_v16 }
 0x473   : > { %v1784_v4 = vpack.c.bf16 %v1778_v36, %v1777_v56 }
 0x474   : > { %1805 = vrot.lane.b32.xlu2 %v4250_v33, %s3218_s14  ;;  %1803 = vrot.lane.b32.xlu1 %v4208_v17, %s3218_s14 }
 0x475   : > { %1788 = vst [vmem:[#allocation2 + $0xe8] sm:$0xff] %v1784_v4  ;;  %1791 = vrot.lane.b32.xlu0 %v4132_v48, %s3218_s14 }
 0x476   : > { %v1628_v34 = vpop.permute.xlu2 %1627  ;;  %v1626_v43 = vpop.permute.xlu1 %1625 }
 0x477   : > { %v1632_v53 = vsel %vm463_vm9, %v4328_v57, %v1626_v43  ;;  %v1636_v3 = vsel %vm463_vm9, %v1626_v43, %v4328_v57  ;;  %v1538_v8 = vpop.permute.xlu0 %1537 }
 0x478   : > { %v1641_v33 = vmul.f32 %v1636_v3, %v3500_v31  ;;  %v1642_v52 = vmul.f32 %v1632_v53, %v3502_v35  ;;  %v1552_v17 = vsel %vm411_vm4, %v1538_v8, %v1546_v11  ;;  %v1556_v48 = vsel %vm411_vm4, %v1546_v11, %v1538_v8 }
 0x479   : > { %v1561_v21 = vmul.f32 %v1556_v48, %v3564_v41  ;;  %v1562_v0 = vmul.f32 %v1552_v17, %v3566_v42 }
 0x47a   : > { %v1648_v37 = vpack.c.bf16 %v1642_v52, %v1641_v33 }
 0x47b   : > { %v1568_v7 = vpack.c.bf16 %v1562_v0, %v1561_v21 }
 0x47c   : > { %1652 = vst [vmem:[#allocation2 + $0x68] sm:$0xff] %v1648_v37  ;;  %1799 = vrot.lane.b32.xlu2 %v4134_v28, %s3218_s14  ;;  %1793 = vrot.lane.b32.xlu1 %v4164_v49, %s3218_s14 }
 0x47d   : > { %1572 = vst [vmem:[#allocation2 + $0x28] sm:$0xff] %v1568_v7  ;;  %1797 = vrot.lane.b32.xlu0 %v4248_v54, %s3218_s14 }
 0x47e   : > { %v1580_v57 = vpop.permute.xlu2 %1579  ;;  %v1586_v30 = vpop.permute.xlu1 %1585 }
 0x47f   : > { %v1592_v50 = vsel %vm437_vm6, %v4342_v32, %v1586_v30  ;;  %v1596_v24 = vsel %vm437_vm6, %v1586_v30, %v4342_v32  ;;  %v1722_v40 = vpop.permute.xlu0 %1721 }
 0x480   : > { %v1601_v28 = vmul.f32 %v1596_v24, %v3538_v18  ;;  %v1602_v61 = vmul.f32 %v1592_v50, %v3540_v19 }
 0x482   : > { %v1608_v49 = vpack.c.bf16 %v1602_v61, %v1601_v28 }
 0x484   : > { %1612 = vst [vmem:[#allocation2 + $0x48] sm:$0xff] %v1608_v49 }
 0x485   : > { %1801 = vrot.lane.b32.xlu0 %v4166_v51, %s3218_s14 }
 0x486   : > { %v1764_v54 = vpop.permute.xlu2 %1763  ;;  %v1714_v25 = vpop.permute.xlu1 %1713 }
 0x487   : > { %v1728_v38 = vsel %vm528_vm7, %v1714_v25, %v1722_v40  ;;  %v1732_v10 = vsel %vm528_vm7, %v1722_v40, %v1714_v25  ;;  %v1506_v5 = vpop.permute.xlu0 %1505 }
 0x488   : > { %v1737_v32 = vmul.f32 %v1728_v38, %v3451_v45  ;;  %v1738_v14 = vmul.f32 %v1732_v10, %v3453_v46 }
 0x48a   : > { %v1744_v13 = vpack.c.bf16 %v1738_v14, %v1737_v32 }
 0x48c   : > { %1748 = vst [vmem:[#allocation2 + $0xc8] sm:$0xff] %v1744_v13 }
 0x48e   : > { %v1548_v62 = vpop.permute.xlu2 %1547  ;;  %v1498_v23 = vpop.permute.xlu1 %1497 }
 0x48f   : > { %v1512_v51 = vsel %vm385_vm13, %v1498_v23, %v1506_v5  ;;  %v1516_v22 = vsel %vm385_vm13, %v1506_v5, %v1498_v23  ;;  %v1620_v39 = vpop.permute.xlu0 %1619 }
 0x490   : > { %v1521_v20 = vmul.f32 %v1516_v22, %v3582_v59  ;;  %v1522_v60 = vmul.f32 %v1512_v51, %v3584_v63  ;;  %v1633_v11 = vsel %vm463_vm9, %v1620_v39, %v1628_v34  ;;  %v1637_v58 = vsel %vm463_vm9, %v1628_v34, %v1620_v39 }
 0x491   : > { %v1643_v6 = vmul.f32 %v1637_v58, %v3500_v31  ;;  %v1644_v44 = vmul.f32 %v1633_v11, %v3502_v35 }
 0x492   : > { %v1528_v56 = vpack.c.bf16 %v1522_v60, %v1521_v20 }
 0x493   : > { %v1649_v36 = vpack.c.bf16 %v1644_v44, %v1643_v6 }
 0x494   : > { %1532 = vst [vmem:[#allocation2 + $0x8] sm:$0xff] %v1528_v56 }
 0x495   : > { %1653 = vst [vmem:[#allocation2 + $0x70] sm:$0xff] %v1649_v36 }
 0x496   : > { %v1588_v4 = vpop.permute.xlu1 %1587  ;;  %v1676_v43 = vpop.permute.xlu2 %1675 }
 0x497   : > { %v1593_v53 = vsel %vm437_vm6, %v1580_v57, %v1588_v4  ;;  %v1597_v3 = vsel %vm437_vm6, %v1588_v4, %v1580_v57  ;;  %v1756_v8 = vpop.permute.xlu0 %1755 }
 0x498   : > { %v1603_v33 = vmul.f32 %v1597_v3, %v3538_v18  ;;  %v1604_v34 = vmul.f32 %v1593_v53, %v3540_v19  ;;  %v1769_v52 = vsel %vm554_vm12, %v1756_v8, %v1764_v54  ;;  %v1773_v17 = vsel %vm554_vm12, %v1764_v54, %v1756_v8 }
 0x499   : > { %v1779_v48 = vmul.f32 %v1769_v52, %v3398_v15  ;;  %v1780_v21 = vmul.f32 %v1773_v17, %v3400_v16 }
 0x49a   : > { %v1609_v0 = vpack.c.bf16 %v1604_v34, %v1603_v33 }
 0x49b   : > { %v1785_v37 = vpack.c.bf16 %v1780_v21, %v1779_v48 }
 0x49c   : > { %1613 = vst [vmem:[#allocation2 + $0x50] sm:$0xff] %v1609_v0 }
 0x49d   : > { %1789 = vst [vmem:[#allocation2 + $0xf0] sm:$0xff] %v1785_v37 }
 0x49e   : > { %v1716_v7 = vpop.permute.xlu1 %1715  ;;  %v1590_v24 = vpop.permute.xlu2 %1589 }
 0x49f   : > { %v1540_v57 = vpop.permute.xlu0 %1539 }
 0x4a0   : > { %v1553_v30 = vsel %vm411_vm4, %v1540_v57, %v1548_v62  ;;  %v1557_v50 = vsel %vm411_vm4, %v1548_v62, %v1540_v57  ;;  %v2885_v57 = vld [vmem:[#allocation2 + $0x70] sm:$0xf] }
 0x4a1   : > { %v1563_v40 = vmul.f32 %v1557_v50, %v3564_v41  ;;  %v1564_v28 = vmul.f32 %v1553_v30, %v3566_v42  ;;  %v3117_v50 = vld [vmem:[#allocation2 + $0x74] sm:$0xf] }
 0x4a3   : > { %v1569_v61 = vpack.c.bf16 %v1564_v28, %v1563_v40 }
 0x4a5   : > { %1573 = vst [vmem:[#allocation2 + $0x30] sm:$0xff] %v1569_v61 }
 0x4a6   : > { %v1500_v49 = vpop.permute.xlu1 %1499  ;;  %v4466_v32 = vpop.permute.xlu2 %1717 }
 0x4a7   : > { %v1724_v54 = vpop.permute.xlu0 %1723 }
 0x4a8   : > { %v1729_v25 = vsel %vm528_vm7, %v1716_v7, %v1724_v54  ;;  %v1733_v38 = vsel %vm528_vm7, %v1724_v54, %v1716_v7  ;;  %v3116_v54 = vld [vmem:[#allocation2 + $0x64] sm:$0xf0] }
 0x4a9   : > { %v1739_v10 = vmul.f32 %v1729_v25, %v3451_v45  ;;  %v1740_v5 = vmul.f32 %v1733_v38, %v3453_v46  ;;  %v2879_v25 = vld [vmem:[#allocation2 + $0x68] sm:$0xf0] }
 0x4ab   : > { %v1745_v14 = vpack.c.bf16 %v1740_v5, %v1739_v10  ;;  %v2877_v5 = vld [vmem:[#allocation2 + $0x60] sm:$0xf] }
 0x4ad   : > { %1749 = vst [vmem:[#allocation2 + $0xd0] sm:$0xff] %v1745_v14  ;;  %v3115_v14 = vld [vmem:[#allocation2 + $0x64] sm:$0xf] }
 0x4ae   : > { %v1684_v13 = vpop.permute.xlu1 %1683  ;;  %v4480_v56 = vpop.permute.xlu2 %1501 }
 0x4af   : > { %v1689_v62 = vsel %vm502_vm11, %v1676_v43, %v1684_v13  ;;  %v1693_v23 = vsel %vm502_vm11, %v1684_v13, %v1676_v43  ;;  %v1508_v51 = vpop.permute.xlu0 %1507 }
 0x4b0   : > { %v1699_v22 = vmul.f32 %v1689_v62, %v3479_v1  ;;  %v1700_v39 = vmul.f32 %v1693_v23, %v3481_v2  ;;  %v1513_v20 = vsel %vm385_vm13, %v1500_v49, %v1508_v51  ;;  %v1517_v60 = vsel %vm385_vm13, %v1508_v51, %v1500_v49 }
 0x4b1   : > { %v1523_v11 = vmul.f32 %v1517_v60, %v3582_v59  ;;  %v1524_v58 = vmul.f32 %v1513_v20, %v3584_v63  ;;  %v2878_v51 = vor.u32 %v3116_v54, %v2877_v5  ;;  %v2869_v20 = vld [vmem:[#allocation2 + $0x50] sm:$0xf] }
 0x4b2   : > { %v1705_v6 = vpack.c.bf16 %v1700_v39, %v1699_v22  ;;  %v2882_v22 = vor.u32 %v3115_v14, %v2879_v25  ;;  %v3132_v25 = vld [vmem:[#allocation2 + $0xe4] sm:$0xf0] }
 0x4b3   : > { %v1529_v44 = vpack.c.bf16 %v1524_v58, %v1523_v11  ;;  %v3113_v11 = vld [vmem:[#allocation2 + $0x54] sm:$0xf] }
 0x4b4   : > { %1709 = vst [vmem:[#allocation2 + $0xb0] sm:$0xff] %v1705_v6 }
 0x4b5   : > { %1533 = vst [vmem:[#allocation2 + $0x10] sm:$0xff] %v1529_v44 }
 0x4b6   : > { %v1622_v36 = vpop.permute.xlu1 %1621  ;;  %v4488_v52 = vpop.permute.xlu2 %1685 }
 0x4b7   : > { %v1630_v4 = vpop.permute.xlu0 %1629 }
 0x4b8   : > { %v1634_v43 = vsel %vm463_vm9, %v1622_v36, %v1630_v4  ;;  %v1638_v53 = vsel %vm463_vm9, %v1630_v4, %v1622_v36  ;;  %v3112_v4 = vld [vmem:[#allocation2 + $0x44] sm:$0xf0] }
 0x4b9   : > { %v1645_v3 = vmul.f32 %v1638_v53, %v3500_v31  ;;  %v1646_v8 = vmul.f32 %v1634_v43, %v3502_v35  ;;  %v2863_v43 = vld [vmem:[#allocation2 + $0x48] sm:$0xf0] }
 0x4bb   : > { %v1650_v33 = vpack.c.bf16 %v1646_v8, %v1645_v3 }
 0x4bd   : > { %1654 = vst [vmem:[#allocation2 + $0x78] sm:$0xff] %v1650_v33 }
 0x4be   : > { %v1758_v34 = vpop.permute.xlu1 %1757  ;;  %v4500_v13 = vpop.permute.xlu2 %1673 }
 0x4bf   : > { %v1582_v17 = vpop.permute.xlu0 %1581 }
 0x4c0   : > { %v1594_v48 = vsel %vm437_vm6, %v1582_v17, %v1590_v24  ;;  %v1598_v21 = vsel %vm437_vm6, %v1590_v24, %v1582_v17 }
 0x4c1   : > { %v1605_v0 = vmul.f32 %v1598_v21, %v3538_v18  ;;  %v1606_v37 = vmul.f32 %v1594_v48, %v3540_v19  ;;  %v2861_v21 = vld [vmem:[#allocation2 + $0x40] sm:$0xf] }
 0x4c3   : > { %v1610_v7 = vpack.c.bf16 %v1606_v37, %v1605_v0  ;;  %v3111_v0 = vld [vmem:[#allocation2 + $0x44] sm:$0xf] }
 0x4c4   : > { %v3118_v30 = vld [vmem:[#allocation2 + $0x74] sm:$0xf0]  ;;  %v2887_v40 = vld [vmem:[#allocation2 + $0x78] sm:$0xf0] }
 0x4c5   : > { %1614 = vst [vmem:[#allocation2 + $0x58] sm:$0xff] %v1610_v7  ;;  %v2886_v28 = vor.u32 %v3118_v30, %v2885_v57  ;;  %v2890_v61 = vor.u32 %v3117_v50, %v2887_v40  ;;  %v2866_v57 = vor.u32 %v3111_v0, %v2863_v43  ;;  %v2847_v0 = vld [vmem:[#allocation2 + $0x28] sm:$0xf0] }
 0x4c6   : > { %v1542_v49 = vpop.permute.xlu1 %1541  ;;  %v4518_v50 = vpop.permute.xlu2 %1795 }
 0x4c7   : > { %2078 = vmatpush.bf16.msrb.mxu2 %v2886_v28  ;;  %2120 = vmatpush.bf16.msrb.mxu3 %v2890_v61  ;;  %v1766_v38 = vpop.permute.xlu0 %1765  ;;  %v2949_v28 = vld [vmem:[#allocation2 + $0xf0] sm:$0xf] }
 0x4c8   : > { %v1770_v24 = vsel %vm554_vm12, %v1758_v34, %v1766_v38  ;;  %v1774_v10 = vsel %vm554_vm12, %v1766_v38, %v1758_v34 }
 0x4c9   : > { %v1781_v62 = vmul.f32 %v1770_v24, %v3398_v15  ;;  %v1782_v23 = vmul.f32 %v1774_v10, %v3400_v16 }
 0x4cb   : > { %v1786_v39 = vpack.c.bf16 %v1782_v23, %v1781_v62  ;;  %2079 = vmatpush.bf16.msrb.mxu2 %v2878_v51  ;;  %2121 = vmatpush.bf16.msrb.mxu3 %v2882_v22  ;;  %v2941_v51 = vld [vmem:[#allocation2 + $0xe0] sm:$0xf] }
 0x4cc   : > { %v3114_v60 = vld [vmem:[#allocation2 + $0x54] sm:$0xf0]  ;;  %v2871_v58 = vld [vmem:[#allocation2 + $0x58] sm:$0xf0] }
 0x4cd   : > { %1790 = vst [vmem:[#allocation2 + $0xf8] sm:$0xff] %v1786_v39  ;;  %v2870_v6 = vor.u32 %v3114_v60, %v2869_v20  ;;  %v2874_v44 = vor.u32 %v3113_v11, %v2871_v58  ;;  %v2853_v60 = vld [vmem:[#allocation2 + $0x30] sm:$0xf] }
 0x4ce   : > { %v1726_v36 = vpop.permute.xlu1 %1725  ;;  %v2933_v58 = vld [vmem:[#allocation2 + $0xd0] sm:$0xf] }
 0x4cf   : > { %v1730_v53 = vsel %vm528_vm7, %v4466_v32, %v1726_v36  ;;  %v1734_v3 = vsel %vm528_vm7, %v1726_v36, %v4466_v32  ;;  %2080 = vmatpush.bf16.msrb.mxu2 %v2870_v6  ;;  %2122 = vmatpush.bf16.msrb.mxu3 %v2874_v44  ;;  %v1550_v8 = vpop.permute.xlu0 %1549  ;;  %v2862_v32 = vor.u32 %v3112_v4, %v2861_v21  ;;  %v3109_v44 = vld [vmem:[#allocation2 + $0x34] sm:$0xf] }
 0x4d0   : > { %v1741_v33 = vmul.f32 %v1730_v53, %v3451_v45  ;;  %v1742_v34 = vmul.f32 %v1734_v3, %v3453_v46  ;;  %v1554_v17 = vsel %vm411_vm4, %v1542_v49, %v1550_v8  ;;  %v1558_v48 = vsel %vm411_vm4, %v1550_v8, %v1542_v49  ;;  %v4536_v53 = vpop.permute.xlu2 %1805 }
 0x4d1   : > { %v1565_v37 = vmul.f32 %v1558_v48, %v3564_v41  ;;  %v1566_v7 = vmul.f32 %v1554_v17, %v3566_v42 }
 0x4d2   : > { %v1746_v30 = vpack.c.bf16 %v1742_v34, %v1741_v33  ;;  %v3108_v33 = vld [vmem:[#allocation2 + $0x24] sm:$0xf0] }
 0x4d3   : > { %v1570_v40 = vpack.c.bf16 %v1566_v7, %v1565_v37  ;;  %2081 = vmatpush.bf16.msrb.mxu2 %v2862_v32  ;;  %2123 = vmatpush.bf16.msrb.mxu3 %v2866_v57  ;;  %v3128_v34 = vld [vmem:[#allocation2 + $0xc4] sm:$0xf0] }
 0x4d4   : > { %1750 = vst [vmem:[#allocation2 + $0xd8] sm:$0xff] %v1746_v30  ;;  %v3134_v61 = vld [vmem:[#allocation2 + $0xf4] sm:$0xf0]  ;;  %v2845_v30 = vld [vmem:[#allocation2 + $0x20] sm:$0xf] }
 0x4d5   : > { %1574 = vst [vmem:[#allocation2 + $0x38] sm:$0xff] %v1570_v40  ;;  %v2950_v54 = vor.u32 %v3134_v61, %v2949_v28  ;;  %v2925_v40 = vld [vmem:[#allocation2 + $0xc0] sm:$0xf]  ;;  %v2846_v61 = vor.u32 %v3108_v33, %v2845_v30 }
 0x4d6   : > { %v1510_v49 = vpop.permute.xlu1 %1509  ;;  %v2829_v33 = vld [vmem:[#allocation2] sm:$0xf] }
 0x4d7   : > { %v1514_v38 = vsel %vm385_vm13, %v4480_v56, %v1510_v49  ;;  %v1518_v24 = vsel %vm385_vm13, %v1510_v49, %v4480_v56  ;;  %2092 = vmatpush.bf16.msra.mxu1 %v2950_v54  ;;  %v1678_v10 = vpop.permute.xlu0 %1677  ;;  %v2942_v56 = vor.u32 %v3132_v25, %v2941_v51  ;;  %v2926_v54 = vor.u32 %v3128_v34, %v2925_v40  ;;  %v3107_v49 = vld [vmem:[#allocation2 + $0x24] sm:$0xf] }
 0x4d8   : > { %v1525_v5 = vmul.f32 %v1518_v24, %v3582_v59  ;;  %v1526_v14 = vmul.f32 %v1514_v38, %v3584_v63  ;;  %v1690_v62 = vsel %vm502_vm11, %v1678_v10, %v4488_v52  ;;  %v1694_v23 = vsel %vm502_vm11, %v4488_v52, %v1678_v10  ;;  %v2837_v24 = vld [vmem:[#allocation2 + $0x10] sm:$0xf] }
 0x4d9   : > { %v1701_v22 = vmul.f32 %v1690_v62, %v3479_v1  ;;  %v1702_v39 = vmul.f32 %v1694_v23, %v3481_v2  ;;  %v2850_v38 = vor.u32 %v3107_v49, %v2847_v0  ;;  %v2917_v23 = vld [vmem:[#allocation2 + $0xb0] sm:$0xf]  ;;  %v3133_v0 = vld [vmem:[#allocation2 + $0xf4] sm:$0xf]  ;;  %v3226_v49 = vmov 2  }
 0x4da   : > { %v1530_v20 = vpack.c.bf16 %v1526_v14, %v1525_v5  ;;  %v3105_v14 = vld [vmem:[#allocation2 + $0x14] sm:$0xf]  ;;  %3191 = vset.pattern.permute.xlu1 %v3226_v49  ;;  %3192 = vset.pattern.permute.xlu2 %v3226_v49  ;;  %v2903_v49 = vld [vmem:[#allocation2 + $0x98] sm:$0xf0] }
 0x4db   : > { %v1706_v11 = vpack.c.bf16 %v1702_v39, %v1701_v22  ;;  %2093 = vmatpush.bf16.msra.mxu1 %v2942_v56  ;;  %v3130_v6 = vld [vmem:[#allocation2 + $0xd4] sm:$0xf0] }
 0x4dc   : > { %1534 = vst [vmem:[#allocation2 + $0x18] sm:$0xff] %v1530_v20  ;;  %v3110_v36 = vld [vmem:[#allocation2 + $0x34] sm:$0xf0]  ;;  %v2934_v4 = vor.u32 %v3130_v6, %v2933_v58  ;;  %v2855_v43 = vld [vmem:[#allocation2 + $0x38] sm:$0xf0] }
 0x4dd   : > { %1710 = vst [vmem:[#allocation2 + $0xb8] sm:$0xff] %v1706_v11  ;;  %v2854_v52 = vor.u32 %v3110_v36, %v2853_v60  ;;  %v2858_v3 = vor.u32 %v3109_v44, %v2855_v43  ;;  %v3104_v20 = vld [vmem:[#allocation2 + $0x4] sm:$0xf0]  ;;  %v2831_v60 = vld [vmem:[#allocation2 + $0x8] sm:$0xf0]  ;;  %v1800_v11 = vpop.permute.xlu2 %1799 }
 0x4de   : > { %v1682_v8 = vpop.permute.xlu1 %1681  ;;  %v2951_v36 = vld [vmem:[#allocation2 + $0xf8] sm:$0xf0]  ;;  %v3101_v43 = vld [vmem:[%s4789_s4 + $0x8] sm:$0xf0] }
 0x4df   : > { %v1688_v17 = vsel %vm502_vm11, %v4500_v13, %v1682_v8  ;;  %v1692_v48 = vsel %vm502_vm11, %v1682_v8, %v4500_v13  ;;  %2082 = vmatpush.bf16.msrb.mxu2 %v2854_v52  ;;  %2094 = vmatpush.bf16.msra.mxu1 %v2934_v4  ;;  %v1680_v21 = vpop.permute.xlu0 %1679  ;;  %v2817_v4 = vld [vmem:[%s4789_s4] sm:$0xf] }
 0x4e0   : > { %v1697_v37 = vmul.f32 %v1688_v17, %v3479_v1  ;;  %v1698_v7 = vmul.f32 %v1692_v48, %v3481_v2  ;;  %2124 = vmatpush.bf16.msrb.mxu3 %v2858_v3  ;;  %v1687_v32 = vsel %vm502_vm11, %v4380_v55, %v1680_v21  ;;  %v1691_v57 = vsel %vm502_vm11, %v1680_v21, %v4380_v55  ;;  %v3103_v21 = vld [vmem:[#allocation2 + $0x4] sm:$0xf] }
 0x4e1   : > { %v1695_v13 = vmul.f32 %v1687_v32, %v3479_v1  ;;  %v1696_v28 = vmul.f32 %v1691_v57, %v3481_v2  ;;  %v2830_v48 = vor.u32 %v3104_v20, %v2829_v33  ;;  %v2954_v32 = vor.u32 %v3133_v0, %v2951_v36 }
 0x4e2   : > { %v1704_v25 = vpack.c.bf16 %v1698_v7, %v1697_v37  ;;  %v2834_v7 = vor.u32 %v3103_v21, %v2831_v60  ;;  %v2818_v57 = vor.u32 %v3101_v43, %v2817_v4  ;;  %v3120_v60 = vld [vmem:[#allocation2 + $0x84] sm:$0xf0]  ;;  %v3127_v4 = vld [vmem:[#allocation2 + $0xc4] sm:$0xf]  ;;  %v3125_v21 = vld [vmem:[#allocation2 + $0xb4] sm:$0xf] }
 0x4e3   : > { %v1703_v10 = vpack.c.bf16 %v1696_v28, %v1695_v13  ;;  %2083 = vmatpush.bf16.msrb.mxu2 %v2846_v61  ;;  %2095 = vmatpush.bf16.msra.mxu1 %v2926_v54  ;;  %v3106_v5 = vld [vmem:[#allocation2 + $0x14] sm:$0xf0]  ;;  %v2839_v62 = vld [vmem:[#allocation2 + $0x18] sm:$0xf0]  ;;  %v2943_v13 = vld [vmem:[#allocation2 + $0xe8] sm:$0xf0] }
 0x4e4   : > { %1708 = vst [vmem:[#allocation2 + $0xa8] sm:$0xff] %v1704_v25  ;;  %2125 = vmatpush.bf16.msrb.mxu3 %v2850_v38  ;;  %v2838_v55 = vor.u32 %v3106_v5, %v2837_v24  ;;  %v3126_v51 = vld [vmem:[#allocation2 + $0xb4] sm:$0xf0]  ;;  %v2842_v22 = vor.u32 %v3105_v14, %v2839_v62  ;;  %v3131_v54 = vld [vmem:[#allocation2 + $0xe4] sm:$0xf] }
 0x4e5   : > { %1707 = vst [vmem:[#allocation2 + $0xa0] sm:$0xff] %v1703_v10  ;;  %v2918_v39 = vor.u32 %v3126_v51, %v2917_v23  ;;  %v2946_v25 = vor.u32 %v3131_v54, %v2943_v13  ;;  %v3122_v38 = vld [vmem:[#allocation2 + $0x94] sm:$0xf0]  ;;  %v4577_v24 = vld [vmem:[%s4791_s6] sm:$0xff]  ;;  %v2935_v5 = vld [vmem:[#allocation2 + $0xd8] sm:$0xf0] }
 0x4e6   : > { %v1804_v56 = vpop.permute.xlu1 %1803  ;;  %1872 = vperm.xlu1 %3191, %v4577_v24   ;;  %v4589_v23 = vld [vmem:[%s4791_s6 + $0x8] sm:$0xff] }
 0x4e7   : > { %v1809_v58 = vsel %vm4803_vm14, %v4518_v50, %v1804_v56  ;;  %v1813_v6 = vsel %vm4804_vm1, %v1804_v56, %v4518_v50  ;;  %2084 = vmatpush.bf16.msrb.mxu2 %v2838_v55  ;;  %2096 = vmatpush.bf16.msra.mxu1 %v2918_v39  ;;  %v1792_v44 = vpop.permute.xlu0 %1791  ;;  %v2901_v55 = vld [vmem:[#allocation2 + $0x90] sm:$0xf]  ;;  %v3129_v56 = vld [vmem:[#allocation2 + $0xd4] sm:$0xf]  ;;  %vm2567_vm14 = vcmp.lt.s32.totalorder %v383_v9, 256 }
 0x4e8   : > { %v1819_v52 = vmul.f32 %v1809_v58, %v3618_v29  ;;  %v1820_v3 = vmul.f32 %v1813_v6, %v3620_v47  ;;  %2126 = vmatpush.bf16.msrb.mxu3 %v2842_v22  ;;  %v1807_v50 = vsel %vm4805_vm0, %v1792_v44, %v1800_v11  ;;  %v1811_v8 = vsel %vm4806_vm10, %v1800_v11, %v1792_v44  ;;  %v3100_v58 = vld [vmem:[%s4789_s4 + $0x4] sm:$0xf]  ;;  %v2819_v6 = vld [vmem:[%s4789_s4 + $0xc] sm:$0xf0]  ;;  %v2893_v44 = vld [vmem:[#allocation2 + $0x80] sm:$0xf] }
 0x4e9   : > { %v1815_v34 = vmul.f32 %v1807_v50, %v3618_v29  ;;  %v1816_v17 = vmul.f32 %v1811_v8, %v3620_v47  ;;  %1876 = vperm.xlu2 %3192, %v4589_v23   ;;  %v2902_v39 = vor.u32 %v3122_v38, %v2901_v55  ;;  %v2938_v20 = vor.u32 %v3129_v56, %v2935_v5  ;;  %v2919_v8 = vld [vmem:[#allocation2 + $0xb8] sm:$0xf0] }
 0x4ea   : > { %v1825_v37 = vpack.c.bf16 %v1820_v3, %v1819_v52  ;;  %v2894_v36 = vor.u32 %v3120_v60, %v2893_v44  ;;  %v2822_v52 = vor.u32 %v3100_v58, %v2819_v6  ;;  %v2922_v0 = vor.u32 %v3125_v21, %v2919_v8 }
 0x4eb   : > { %v1823_v30 = vpack.c.bf16 %v1816_v17, %v1815_v34  ;;  %2085 = vmatpush.bf16.msrb.mxu2 %v2830_v48  ;;  %v3124_v40 = vld [vmem:[#allocation2 + $0xa4] sm:$0xf0] }
 0x4ec   : > { %1829 = vst [vmem:[#allocation2 + $0x110] sm:$0xff] %v1825_v37  ;;  %2127 = vmatpush.bf16.msrb.mxu3 %v2834_v7  ;;  %v2909_v28 = vld [vmem:[#allocation2 + $0xa0] sm:$0xf] }
 0x4ed   : > { %1827 = vst [vmem:[#allocation2 + $0x100] sm:$0xff] %v1823_v30  ;;  %v2910_v61 = vor.u32 %v3124_v40, %v2909_v28 }
 0x4ee   : > { %2086 = vmatmul.bf16.vlgmr.msrb.gmra.mxu2 %v2818_v57  ;;  %v1794_v3 = vpop.permute.xlu1 %1793 }
 0x4ef   : > { %2134 = vmatpush.bf16.msra.mxu2 %v2954_v32  ;;  %2097 = vmatpush.bf16.msra.mxu1 %v2910_v61  ;;  %v1798_v10 = vpop.permute.xlu0 %1797  ;;  %v3123_v32 = vld [vmem:[#allocation2 + $0xa4] sm:$0xf] }
 0x4f0   : > { %2128 = vmatmul.bf16.vlgmr.msrb.gmra.mxu3 %v2818_v57  ;;  %v1810_v14 = vsel %vm4807_vm2, %v1798_v10, %v4536_v53  ;;  %v1814_v62 = vsel %vm4808_vm15, %v4536_v53, %v1798_v10  ;;  %v2927_v53 = vld [vmem:[#allocation2 + $0xc8] sm:$0xf0] }
 0x4f1   : > { %v1821_v51 = vmul.f32 %v1810_v14, %v3618_v29  ;;  %v1822_v22 = vmul.f32 %v1814_v62, %v3620_v47  ;;  %v2930_v43 = vor.u32 %v3127_v4, %v2927_v53  ;;  %v2911_v57 = vld [vmem:[#allocation2 + $0xa8] sm:$0xf0]  ;;  %v2825_v14 = vld [vmem:[%s4789_s4 + $0x8] sm:$0xf]  ;;  %v3102_v62 = vld [vmem:[%s4789_s4 + $0x10] sm:$0xf0] }
 0x4f2   : > { %v2914_v54 = vor.u32 %v3123_v32, %v2911_v57  ;;  %v2895_v10 = vld [vmem:[#allocation2 + $0x88] sm:$0xf0] }
 0x4f3   : > { %2135 = vmatpush.bf16.msra.mxu2 %v2946_v25  ;;  %v1826_v11 = vpack.c.bf16 %v1822_v22, %v1821_v51  ;;  %2098 = vmatpush.bf16.msra.mxu1 %v2902_v39  ;;  %v2965_v7 = vld [vmem:[#allocation2 + $0x110] sm:$0xf]  ;;  %v3137_v40 = vld [vmem:[#allocation2 + $0x114] sm:$0xf] }
 0x4f4   : > { %v3121_v25 = vld [vmem:[#allocation2 + $0x94] sm:$0xf]  ;;  %v2957_v5 = vld [vmem:[#allocation2 + $0x100] sm:$0xf]  ;;  %v3135_v51 = vld [vmem:[#allocation2 + $0x104] sm:$0xf] }
 0x4f5   : > { %1830 = vst [vmem:[#allocation2 + $0x118] sm:$0xff] %v1826_v11  ;;  %v2906_v38 = vor.u32 %v3121_v25, %v2903_v49  ;;  %v2826_v11 = vor.u32 %v3102_v62, %v2825_v14 }
 0x4f7   : > { %2136 = vmatpush.bf16.msra.mxu2 %v2938_v20  ;;  %v1802_v50 = vpop.permute.xlu0 %1801  ;;  %2099 = vmatpush.bf16.msra.mxu1 %v2894_v36  ;;  %v3119_v20 = vld [vmem:[#allocation2 + $0x84] sm:$0xf] }
 0x4f8   : > { %v1808_v33 = vsel %vm4809_vm8, %v1794_v3, %v1802_v50  ;;  %v1812_v34 = vsel %vm4810_vm5, %v1802_v50, %v1794_v3  ;;  %v2898_v60 = vor.u32 %v3119_v20, %v2895_v10 }
 0x4f9   : > { %v1817_v17 = vmul.f32 %v1808_v33, %v3618_v29  ;;  %v1818_v48 = vmul.f32 %v1812_v34, %v3620_v47 }
 0x4fa   : > { %2100 = vmatmul.bf16.vlgmr.msra.gmra.mxu1 %v2822_v52 }
 0x4fb   : > { %2137 = vmatpush.bf16.msra.mxu2 %v2930_v43  ;;  %v1824_v37 = vpack.c.bf16 %v1818_v48, %v1817_v17 }
 0x4fc   : > { %v3138_v30 = vld [vmem:[#allocation2 + $0x114] sm:$0xf0]  ;;  %v2967_v13 = vld [vmem:[#allocation2 + $0x118] sm:$0xf0] }
 0x4fd   : > { %1828 = vst [vmem:[#allocation2 + $0x108] sm:$0xff] %v1824_v37  ;;  %v2966_v28 = vor.u32 %v3138_v30, %v2965_v7  ;;  %v2970_v61 = vor.u32 %v3137_v40, %v2967_v13 }
 0x4ff   : > { %2138 = vmatpush.bf16.msra.mxu2 %v2922_v0  ;;  %2112 = vmatpush.bf16.msra.mxu0 %v2966_v28 }
 0x500   : > { %2154 = vmatpush.bf16.msrb.mxu1 %v2970_v61 }
 0x503   : > { %2139 = vmatpush.bf16.msra.mxu2 %v2914_v54 }
 0x504   : > { %v3136_v55 = vld [vmem:[#allocation2 + $0x104] sm:$0xf0]  ;;  %v2959_v22 = vld [vmem:[#allocation2 + $0x108] sm:$0xf0] }
 0x505   : > { %v2958_v39 = vor.u32 %v3136_v55, %v2957_v5  ;;  %v2962_v56 = vor.u32 %v3135_v51, %v2959_v22 }
 0x507   : > { %2140 = vmatpush.bf16.msra.mxu2 %v2906_v38  ;;  %2113 = vmatpush.bf16.msra.mxu0 %v2958_v39 }
 0x508   : > { %2155 = vmatpush.bf16.msrb.mxu1 %v2962_v56 }
 0x50a   : > { %2971 = vmatmul.msk.bf16.vlgmr.msra.gmra.mxu0 %vm2074_vm3, %v2826_v11 }
 0x50b   : > { %2141 = vmatpush.bf16.msra.mxu2 %v2898_v60  ;;  %2972 = vmatmul.msk.bf16.vlgmr.msrb.gmra.mxu1 %vm2074_vm3, %v2826_v11 }
 0x50e   : > { %2142 = vmatmul.bf16.vlgmr.msra.gmra.mxu2 %v2822_v52 }
 0x543   : > { %v1877_v34 = vpop.permute.xlu2 %1876 }
 0x558   : > { %v1873_v6 = vpop.permute.xlu1 %1872 }
 0x571   : > { %v2087_v58 = vpop.f32.mrf.mxu2 }
 0x572   : > { %v2088_v44 = vadd.f32 %v2087_v58, %v1873_v6 }
 0x573   : > { %v2129_v8 = vpop.f32.mrf.mxu3 }
 0x574   : > { %v2130_v48 = vadd.f32 %v2129_v8, %v1873_v6 }
 0x577   : > { %v2101_v53 = vpop.f32.mrf.mxu1 }
 0x578   : > { %v2102_v36 = vadd.f32 %v2101_v53, %v2088_v44 }
 0x579   : > { %v2089_v43 = vpop.f32.mrf.mxu2 }
 0x57a   : > { %v2090_v21 = vadd.f32 %v2089_v43, %v1877_v34 }
 0x57b   : > { %v2131_v37 = vpop.f32.mrf.mxu3 }
 0x57c   : > { %v2132_v40 = vadd.f32 %v2131_v37, %v1877_v34 }
 0x57f   : > { %v2103_v4 = vpop.f32.mrf.mxu1 }
 0x580   : > { %v2104_v57 = vadd.f32 %v2103_v4, %v2090_v21 }
 0x587   : > { %v2115_v3 = vpop.f32.mrf.mxu0 }
 0x588   : > { %v2116_v50 = vadd.f32 %v2115_v3, %v2102_v36  ;;  %v2157_v17 = vpop.f32.mrf.mxu1 }
 0x58a   : > { %v2162_v33 = vmax.f32 %v2116_v50, 0.0 }
 0x58c   : > { %2254 = vrot.lane.b32.xlu2 %v2162_v33, %s3213_s9  ;;  %2274 = vrot.lane.b32.xlu1 %v2162_v33, %s3212_s8  ;;  %v2246_v13 = vmul.f32 %v2162_v33, %v3415_v26 }
 0x58d   : > { %2294 = vrot.lane.b32.xlu0 %v2162_v33, %s3211_s30 }
 0x58f   : > { %v2117_v32 = vpop.f32.mrf.mxu0 }
 0x590   : > { %v2118_v28 = vadd.f32 %v2117_v32, %v2104_v57  ;;  %v2159_v49 = vpop.f32.mrf.mxu1 }
 0x591   : > { %v2143_v52 = vpop.f32.mrf.mxu2 }
 0x592   : > { %v2144_v0 = vadd.f32 %v2143_v52, %v2130_v48  ;;  %v2164_v10 = vmax.f32 %v2118_v28, 0.0 }
 0x594   : > { %v2158_v7 = vadd.f32 %v2157_v17, %v2144_v0  ;;  %2186 = vrot.lane.b32.xlu2 %v2162_v33, %s3216_s12  ;;  %2206 = vrot.lane.b32.xlu1 %v2162_v33, %s3215_s11  ;;  %v2248_v62 = vmul.f32 %v2164_v10, %v3415_v26 }
 0x595   : > { %2226 = vrot.lane.b32.xlu0 %v2162_v33, %s3214_s10 }
 0x596   : > { %v2163_v30 = vmax.f32 %v2158_v7, 0.0 }
 0x598   : > { %v2247_v61 = vmul.f32 %v2163_v30, %v3417_v27 }
 0x599   : > { %v2145_v54 = vpop.f32.mrf.mxu2 }
 0x59a   : > { %v2250_v25 = vpack.c.bf16 %v2247_v61, %v2246_v13  ;;  %v2146_v38 = vadd.f32 %v2145_v54, %v2132_v40 }
 0x59c   : > { %2252 = vst [vmem:[#allocation2 + $0x40] sm:$0xff] %v2250_v25  ;;  %v2160_v5 = vadd.f32 %v2159_v49, %v2146_v38  ;;  %2276 = vrot.lane.b32.xlu2 %v2164_v10, %s3212_s8  ;;  %2296 = vrot.lane.b32.xlu1 %v2164_v10, %s3211_s30 }
 0x59d   : > { %2256 = vrot.lane.b32.xlu0 %v2164_v10, %s3213_s9 }
 0x59e   : > { %v2165_v14 = vmax.f32 %v2160_v5, 0.0 }
 0x5a0   : > { %v2249_v55 = vmul.f32 %v2165_v14, %v3417_v27 }
 0x5a2   : > { %v2251_v51 = vpack.c.bf16 %v2249_v55, %v2248_v62 }
 0x5a4   : > { %2253 = vst [vmem:[#allocation2 + $0x48] sm:$0xff] %v2251_v51  ;;  %2208 = vrot.lane.b32.xlu2 %v2164_v10, %s3215_s11  ;;  %2228 = vrot.lane.b32.xlu1 %v2164_v10, %s3214_s10 }
 0x5a5   : > { %2188 = vrot.lane.b32.xlu0 %v2164_v10, %s3216_s12 }
 0x5ac   : > { %2258 = vrot.lane.b32.xlu1 %v2163_v30, %s3213_s9  ;;  %2298 = vrot.lane.b32.xlu2 %v2163_v30, %s3211_s30 }
 0x5ad   : > { %2278 = vrot.lane.b32.xlu0 %v2163_v30, %s3212_s8 }
 0x5b4   : > { %2190 = vrot.lane.b32.xlu1 %v2163_v30, %s3216_s12  ;;  %2230 = vrot.lane.b32.xlu2 %v2163_v30, %s3214_s10 }
 0x5b5   : > { %2210 = vrot.lane.b32.xlu0 %v2163_v30, %s3215_s11 }
 0x5bc   : > { %2280 = vrot.lane.b32.xlu1 %v2165_v14, %s3212_s8  ;;  %2260 = vrot.lane.b32.xlu2 %v2165_v14, %s3213_s9 }
 0x5bd   : > { %2300 = vrot.lane.b32.xlu0 %v2165_v14, %s3211_s30 }
 0x5c4   : > { %2168 = vrot.lane.b32.xlu1 %v2164_v10, %s3217_s13  ;;  %2170 = vrot.lane.b32.xlu2 %v2163_v30, %s3217_s13 }
 0x5c5   : > { %2166 = vrot.lane.b32.xlu0 %v2162_v33, %s3217_s13 }
 0x5cc   : > { %2212 = vrot.lane.b32.xlu1 %v2165_v14, %s3215_s11  ;;  %2192 = vrot.lane.b32.xlu2 %v2165_v14, %s3216_s12 }
 0x5cd   : > { %2232 = vrot.lane.b32.xlu0 %v2165_v14, %s3214_s10 }
 0x5d4   : > { %2314 = vrot.lane.b32.xlu1 %v2162_v33, %s3218_s14  ;;  %2316 = vrot.lane.b32.xlu2 %v2164_v10, %s3218_s14 }
 0x5d5   : > { %2172 = vrot.lane.b32.xlu0 %v2165_v14, %s3217_s13 }
 0x5dc   : > { %2320 = vrot.lane.b32.xlu1 %v2165_v14, %s3218_s14 }
 0x5dd   : > { %2318 = vrot.lane.b32.xlu0 %v2163_v30, %s3218_s14 }
 0x5e6   : > { %v2255_v26 = vpop.permute.xlu2 %2254 }
 0x5ee   : > { %v2187_v27 = vpop.permute.xlu2 %2186 }
 0x5f6   : > { %v4648_v22 = vpop.permute.xlu2 %2276 }
 0x5fe   : > { %v4650_v39 = vpop.permute.xlu2 %2208  ;;  %v2275_v56 = vpop.permute.xlu1 %2274 }
 0x5ff   : > { %v2295_v20 = vpop.permute.xlu0 %2294 }
 0x606   : > { %v2207_v60 = vpop.permute.xlu1 %2206  ;;  %v2299_v11 = vpop.permute.xlu2 %2298 }
 0x607   : > { %v2227_v53 = vpop.permute.xlu0 %2226  ;;  %v2302_v58 = vsel %vm554_vm12, %v2295_v20, %v2299_v11  ;;  %v2304_v6 = vsel %vm554_vm12, %v2299_v11, %v2295_v20 }
 0x608   : > { %v2306_v44 = vmul.f32 %v2302_v58, %v3398_v15  ;;  %v2307_v36 = vmul.f32 %v2304_v6, %v3400_v16 }
 0x60a   : > { %v2310_v4 = vpack.c.bf16 %v2307_v36, %v2306_v44 }
 0x60c   : > { %2312 = vst [vmem:[#allocation2 + $0x70] sm:$0xff] %v2310_v4 }
 0x60e   : > { %v2297_v43 = vpop.permute.xlu1 %2296  ;;  %v2231_v3 = vpop.permute.xlu2 %2230 }
 0x60f   : > { %v2257_v50 = vpop.permute.xlu0 %2256  ;;  %v2234_v8 = vsel %vm463_vm9, %v2227_v53, %v2231_v3  ;;  %v2236_v33 = vsel %vm463_vm9, %v2231_v3, %v2227_v53 }
 0x610   : > { %v2238_v34 = vmul.f32 %v2236_v33, %v3500_v31  ;;  %v2239_v17 = vmul.f32 %v2234_v8, %v3502_v35 }
 0x612   : > { %v2242_v48 = vpack.c.bf16 %v2239_v17, %v2238_v34 }
 0x614   : > { %2244 = vst [vmem:[#allocation2 + $0x30] sm:$0xff] %v2242_v48 }
 0x616   : > { %v4664_v52 = vpop.permute.xlu1 %2228  ;;  %v2261_v21 = vpop.permute.xlu2 %2260 }
 0x617   : > { %v2189_v0 = vpop.permute.xlu0 %2188  ;;  %v2263_v37 = vsel %vm502_vm11, %v2257_v50, %v2261_v21  ;;  %v2265_v7 = vsel %vm502_vm11, %v2261_v21, %v2257_v50 }
 0x618   : > { %v2268_v32 = vmul.f32 %v2263_v37, %v3479_v1  ;;  %v2269_v57 = vmul.f32 %v2265_v7, %v3481_v2 }
 0x61a   : > { %v2271_v30 = vpack.c.bf16 %v2269_v57, %v2268_v32 }
 0x61c   : > { %2273 = vst [vmem:[#allocation2 + $0x58] sm:$0xff] %v2271_v30 }
 0x61e   : > { %v2259_v40 = vpop.permute.xlu1 %2258  ;;  %v2171_v13 = vpop.permute.xlu2 %2170 }
 0x61f   : > { %v2262_v28 = vsel %vm502_vm11, %v2255_v26, %v2259_v40  ;;  %v2264_v61 = vsel %vm502_vm11, %v2259_v40, %v2255_v26  ;;  %v2279_v54 = vpop.permute.xlu0 %2278  ;;  %vm4813_vm11 = vmmov %vm4805_vm0 }
 0x620   : > { %v2266_v49 = vmul.f32 %v2262_v28, %v3479_v1  ;;  %v2267_v25 = vmul.f32 %v2264_v61, %v3481_v2  ;;  %v2282_v38 = vsel %vm528_vm7, %v2275_v56, %v2279_v54  ;;  %v2284_v10 = vsel %vm528_vm7, %v2279_v54, %v2275_v56 }
 0x621   : > { %v2286_v5 = vmul.f32 %v2282_v38, %v3451_v45  ;;  %v2287_v14 = vmul.f32 %v2284_v10, %v3453_v46 }
 0x622   : > { %v2270_v62 = vpack.c.bf16 %v2267_v25, %v2266_v49 }
 0x623   : > { %v2290_v55 = vpack.c.bf16 %v2287_v14, %v2286_v5 }
 0x624   : > { %2272 = vst [vmem:[#allocation2 + $0x50] sm:$0xff] %v2270_v62 }
 0x625   : > { %2292 = vst [vmem:[#allocation2 + $0x60] sm:$0xff] %v2290_v55 }
 0x626   : > { %v2191_v51 = vpop.permute.xlu1 %2190  ;;  %v2193_v26 = vpop.permute.xlu2 %2192 }
 0x627   : > { %v2194_v1 = vsel %vm411_vm4, %v2187_v27, %v2191_v51  ;;  %v2196_v2 = vsel %vm411_vm4, %v2191_v51, %v2187_v27  ;;  %v2211_v20 = vpop.permute.xlu0 %2210  ;;  %v2195_v56 = vsel %vm411_vm4, %v2189_v0, %v2193_v26  ;;  %v2197_v11 = vsel %vm411_vm4, %v2193_v26, %v2189_v0 }
 0x628   : > { %v2198_v53 = vmul.f32 %v2196_v2, %v3564_v41  ;;  %v2199_v58 = vmul.f32 %v2194_v1, %v3566_v42  ;;  %v2214_v6 = vsel %vm437_vm6, %v2207_v60, %v2211_v20  ;;  %v2216_v44 = vsel %vm437_vm6, %v2211_v20, %v2207_v60 }
 0x629   : > { %v2218_v36 = vmul.f32 %v2216_v44, %v3538_v18  ;;  %v2219_v27 = vmul.f32 %v2214_v6, %v3540_v19  ;;  %v2200_v4 = vmul.f32 %v2197_v11, %v3564_v41  ;;  %v2201_v3 = vmul.f32 %v2195_v56, %v3566_v42  ;;  %v3152_v44 = vld [vmem:[#allocation2 + $0x54] sm:$0xf0] }
 0x62a   : > { %v2202_v50 = vpack.c.bf16 %v2199_v58, %v2198_v53 }
 0x62b   : > { %v2222_v8 = vpack.c.bf16 %v2219_v27, %v2218_v36  ;;  %v2203_v33 = vpack.c.bf16 %v2201_v3, %v2200_v4  ;;  %v3151_v6 = vld [vmem:[#allocation2 + $0x54] sm:$0xf]  ;;  %v3025_v36 = vld [vmem:[#allocation2 + $0x58] sm:$0xf0]  ;;  %v3227_v27 = vmov 3  }
 0x62c   : > { %2204 = vst [vmem:[#allocation2 + $0x10] sm:$0xff] %v2202_v50  ;;  %v3031_v2 = vld [vmem:[#allocation2 + $0x60] sm:$0xf]  ;;  %v3153_v20 = vld [vmem:[#allocation2 + $0x64] sm:$0xf]  ;;  %3194 = vset.pattern.permute.xlu0 %v3227_v27  ;;  %3193 = vset.pattern.permute.xlu2 %v3227_v27 }
 0x62d   : > { %2224 = vst [vmem:[#allocation2 + $0x20] sm:$0xff] %v2222_v8  ;;  %2359 = vperm.xlu0 %3194, %v4589_v23   ;;  %v3150_v3 = vld [vmem:[#allocation2 + $0x44] sm:$0xf0]  ;;  %v3017_v50 = vld [vmem:[#allocation2 + $0x48] sm:$0xf0]  ;;  %2355 = vperm.xlu2 %3193, %v4577_v24  }
 0x62e   : > { %2205 = vst [vmem:[#allocation2 + $0x18] sm:$0xff] %v2203_v33  ;;  %v2281_v34 = vpop.permute.xlu1 %2280 }
 0x62f   : > { %v2283_v17 = vsel %vm528_vm7, %v4648_v22, %v2281_v34  ;;  %v2285_v60 = vsel %vm528_vm7, %v2281_v34, %v4648_v22  ;;  %v2301_v48 = vpop.permute.xlu0 %2300  ;;  %vm4812_vm7 = vmmov %vm4805_vm0 }
 0x630   : > { %v2288_v41 = vmul.f32 %v2283_v17, %v3451_v45  ;;  %v2289_v42 = vmul.f32 %v2285_v60, %v3453_v46  ;;  %v2303_v21 = vsel %vm554_vm12, %v2297_v43, %v2301_v48  ;;  %v2305_v0 = vsel %vm554_vm12, %v2301_v48, %v2297_v43  ;;  %v3015_v17 = vld [vmem:[#allocation2 + $0x40] sm:$0xf]  ;;  %v3149_v60 = vld [vmem:[#allocation2 + $0x44] sm:$0xf]  ;;  %vm4811_vm12 = vmmov %vm4805_vm0 }
 0x631   : > { %v2308_v37 = vmul.f32 %v2303_v21, %v3398_v15  ;;  %v2309_v7 = vmul.f32 %v2305_v0, %v3400_v16  ;;  %v3039_v15 = vld [vmem:[#allocation2 + $0x70] sm:$0xf]  ;;  %v3155_v16 = vld [vmem:[#allocation2 + $0x74] sm:$0xf]  ;;  %v3020_v21 = vor.u32 %v3149_v60, %v3017_v50 }
 0x632   : > { %v2291_v32 = vpack.c.bf16 %v2289_v42, %v2288_v41  ;;  %v3016_v42 = vor.u32 %v3150_v3, %v3015_v17 }
 0x633   : > { %v2311_v57 = vpack.c.bf16 %v2309_v7, %v2308_v37  ;;  %v3007_v37 = vld [vmem:[#allocation2 + $0x30] sm:$0xf]  ;;  %v370_v7 = vld [vmem:[%s4791_s6] sm:$0x1] }
 0x634   : > { %2293 = vst [vmem:[#allocation2 + $0x68] sm:$0xff] %v2291_v32 }
 0x635   : > { %2313 = vst [vmem:[#allocation2 + $0x78] sm:$0xff] %v2311_v57  ;;  %v3147_v57 = vld [vmem:[#allocation2 + $0x34] sm:$0xf] }
 0x636   : > { %v2169_v22 = vpop.permute.xlu1 %2168 }
 0x637   : > { %v2167_v30 = vpop.permute.xlu0 %2166 }
 0x638   : > { %v2174_v45 = vsel %vm385_vm13, %v2167_v30, %v2171_v13  ;;  %v2176_v46 = vsel %vm385_vm13, %v2171_v13, %v2167_v30 }
 0x639   : > { %v2178_v40 = vmul.f32 %v2176_v46, %v3582_v59  ;;  %v2179_v43 = vmul.f32 %v2174_v45, %v3584_v63  ;;  %v3229_v45 = vmov 5  }
 0x63a   : > { %3198 = vset.pattern.permute.xlu0 %v3229_v45 }
 0x63b   : > { %v2182_v28 = vpack.c.bf16 %v2179_v43, %v2178_v40  ;;  %v3154_v10 = vld [vmem:[#allocation2 + $0x64] sm:$0xf0]  ;;  %v3033_v5 = vld [vmem:[#allocation2 + $0x68] sm:$0xf0] }
 0x63c   : > { %v3156_v61 = vld [vmem:[#allocation2 + $0x74] sm:$0xf0]  ;;  %v3041_v54 = vld [vmem:[#allocation2 + $0x78] sm:$0xf0]  ;;  %v3032_v11 = vor.u32 %v3154_v10, %v3031_v2  ;;  %v3036_v53 = vor.u32 %v3153_v20, %v3033_v5 }
 0x63d   : > { %2184 = vst [vmem:[#allocation2] sm:$0xff] %v2182_v28  ;;  %v3040_v49 = vor.u32 %v3156_v61, %v3039_v15  ;;  %v3044_v25 = vor.u32 %v3155_v16, %v3041_v54 }
 0x63e   : > { %v2213_v38 = vpop.permute.xlu1 %2212 }
 0x63f   : > { %v2215_v14 = vsel %vm437_vm6, %v4650_v39, %v2213_v38  ;;  %v2217_v13 = vsel %vm437_vm6, %v2213_v38, %v4650_v39  ;;  %v2233_v62 = vpop.permute.xlu0 %2232  ;;  %2464 = vmatpush.bf16.msrb.mxu0 %v3040_v49  ;;  %2492 = vmatpush.bf16.msra.mxu3 %v3044_v25  ;;  %v2999_v25 = vld [vmem:[#allocation2 + $0x20] sm:$0xf]  ;;  %v3145_v38 = vld [vmem:[#allocation2 + $0x24] sm:$0xf]  ;;  %vm4815_vm6 = vcmask 130048  }
 0x640   : > { %v2220_v55 = vmul.f32 %v2217_v13, %v3538_v18  ;;  %v2221_v51 = vmul.f32 %v2215_v14, %v3540_v19  ;;  %v2235_v26 = vsel %vm463_vm9, %v4664_v52, %v2233_v62  ;;  %v2237_v1 = vsel %vm463_vm9, %v2233_v62, %v4664_v52  ;;  %v3023_v18 = vld [vmem:[#allocation2 + $0x50] sm:$0xf]  ;;  %vm4814_vm9 = vmmov %vm4805_vm0 }
 0x641   : > { %v2240_v56 = vmul.f32 %v2237_v1, %v3500_v31  ;;  %v2241_v39 = vmul.f32 %v2235_v26, %v3502_v35  ;;  %v3228_v52 = vmov 4   ;;  %v3024_v4 = vor.u32 %v3152_v44, %v3023_v18  ;;  %v2991_v62 = vld [vmem:[#allocation2 + $0x10] sm:$0xf]  ;;  %v3143_v26 = vld [vmem:[#allocation2 + $0x14] sm:$0xf]  ;;  %vm4816_vm4 = vmmov %vm4815_vm6 }
 0x642   : > { %v2223_v58 = vpack.c.bf16 %v2221_v51, %v2220_v55  ;;  %3195 = vset.pattern.permute.xlu1 %v3228_v52  ;;  %v3028_v31 = vor.u32 %v3151_v6, %v3025_v36  ;;  %3196 = vset.pattern.permute.xlu2 %v3228_v52  ;;  %v3144_v51 = vld [vmem:[#allocation2 + $0x14] sm:$0xf0]  ;;  %v2993_v1 = vld [vmem:[#allocation2 + $0x18] sm:$0xf0]  ;;  %v3139_v6 = vld [vmem:[%s4790_s5 + $0x4] sm:$0xf] }
 0x643   : > { %v2243_v19 = vpack.c.bf16 %v2241_v39, %v2240_v56  ;;  %2465 = vmatpush.bf16.msrb.mxu0 %v3032_v11  ;;  %2493 = vmatpush.bf16.msra.mxu3 %v3036_v53  ;;  %v2992_v12 = vor.u32 %v3144_v51, %v2991_v62  ;;  %v2996_v20 = vor.u32 %v3143_v26, %v2993_v1  ;;  %v2977_v36 = vld [vmem:[%s4790_s5 + $0x8] sm:$0xf0] }
 0x644   : > { %2225 = vst [vmem:[#allocation2 + $0x28] sm:$0xff] %v2223_v58  ;;  %2525 = vperm.xlu1 %3195, %v4577_v24   ;;  %2529 = vperm.xlu2 %3196, %v4589_v23   ;;  %v3140_v23 = vld [vmem:[%s4790_s5 + $0x4] sm:$0xf0]  ;;  %v2983_v39 = vld [vmem:[#allocation2] sm:$0xf] }
 0x645   : > { %2245 = vst [vmem:[#allocation2 + $0x38] sm:$0xff] %v2243_v19  ;;  %v3141_v11 = vld [vmem:[#allocation2 + $0x4] sm:$0xf] }
 0x646   : > { %v2315_v35 = vpop.permute.xlu1 %2314 }
 0x647   : > { %v2173_v8 = vpop.permute.xlu0 %2172  ;;  %2466 = vmatpush.bf16.msrb.mxu0 %v3024_v4  ;;  %2494 = vmatpush.bf16.msra.mxu3 %v3028_v31 }
 0x648   : > { %v2175_v33 = vsel %vm385_vm13, %v2169_v22, %v2173_v8  ;;  %v2177_v34 = vsel %vm385_vm13, %v2173_v8, %v2169_v22  ;;  %vm2562_vm13 = vcmask 1040384  }
 0x649   : > { %v2180_v48 = vmul.f32 %v2177_v34, %v3582_v59  ;;  %v2181_v41 = vmul.f32 %v2175_v33, %v3584_v63  ;;  %v2317_v59 = vpop.permute.xlu2 %2316 }
 0x64b   : > { %v2183_v0 = vpack.c.bf16 %v2181_v41, %v2180_v48  ;;  %2467 = vmatpush.bf16.msrb.mxu0 %v3016_v42  ;;  %2495 = vmatpush.bf16.msra.mxu3 %v3020_v21  ;;  %v3146_v46 = vld [vmem:[#allocation2 + $0x24] sm:$0xf0]  ;;  %v3001_v40 = vld [vmem:[#allocation2 + $0x28] sm:$0xf0] }
 0x64c   : > { %v3148_v32 = vld [vmem:[#allocation2 + $0x34] sm:$0xf0]  ;;  %v3009_v22 = vld [vmem:[#allocation2 + $0x38] sm:$0xf0]  ;;  %3197 = vset.pattern.permute.xlu1 %v3229_v45  ;;  %v3000_v14 = vor.u32 %v3146_v46, %v2999_v25  ;;  %v3004_v13 = vor.u32 %v3145_v38, %v3001_v40 }
 0x64d   : > { %2185 = vst [vmem:[#allocation2 + $0x8] sm:$0xff] %v2183_v0  ;;  %v3008_v30 = vor.u32 %v3148_v32, %v3007_v37  ;;  %v3012_v24 = vor.u32 %v3147_v57, %v3009_v22  ;;  %2552 = vperm.xlu1 %3197, %v370_v7  }
 0x64e   : > { %v2321_v63 = vpop.permute.xlu1 %2320 }
 0x64f   : > { %v2323_v43 = vsel %vm4811_vm12, %v2317_v59, %v2321_v63  ;;  %v2325_v28 = vsel %vm4812_vm7, %v2321_v63, %v2317_v59  ;;  %v2319_v15 = vpop.permute.xlu0 %2318  ;;  %2468 = vmatpush.bf16.msrb.mxu0 %v3008_v30  ;;  %2496 = vmatpush.bf16.msra.mxu3 %v3012_v24 }
 0x650   : > { %v2328_v61 = vmul.f32 %v2323_v43, %v3618_v29  ;;  %v2329_v16 = vmul.f32 %v2325_v28, %v3620_v47  ;;  %v2322_v54 = vsel %vm4813_vm11, %v2315_v35, %v2319_v15  ;;  %v2324_v49 = vsel %vm4814_vm9, %v2319_v15, %v2315_v35 }
 0x651   : > { %v2326_v10 = vmul.f32 %v2322_v54, %v3618_v29  ;;  %v2327_v5 = vmul.f32 %v2324_v49, %v3620_v47  ;;  %v2975_v47 = vld [vmem:[%s4790_s5] sm:$0xf]  ;;  %v2980_v35 = vor.u32 %v3139_v6, %v2977_v36 }
 0x652   : > { %v2331_v55 = vpack.c.bf16 %v2329_v16, %v2328_v61  ;;  %v2976_v18 = vor.u32 %v3140_v23, %v2975_v47 }
 0x653   : > { %v2330_v2 = vpack.c.bf16 %v2327_v5, %v2326_v10  ;;  %2469 = vmatpush.bf16.msrb.mxu0 %v3000_v14  ;;  %2497 = vmatpush.bf16.msra.mxu3 %v3004_v13 }
 0x654   : > { %2333 = vst [vmem:[#allocation2 + $0x88] sm:$0xff] %v2331_v55  ;;  %v3142_v56 = vld [vmem:[#allocation2 + $0x4] sm:$0xf0]  ;;  %v2985_v29 = vld [vmem:[#allocation2 + $0x8] sm:$0xf0] }
 0x655   : > { %2332 = vst [vmem:[#allocation2 + $0x80] sm:$0xff] %v2330_v2  ;;  %v2984_v53 = vor.u32 %v3142_v56, %v2983_v39  ;;  %v2988_v58 = vor.u32 %v3141_v11, %v2985_v29 }
 0x657   : > { %2470 = vmatpush.bf16.msrb.mxu0 %v2992_v12  ;;  %2498 = vmatpush.bf16.msra.mxu3 %v2996_v20 }
 0x65b   : > { %2471 = vmatpush.bf16.msrb.mxu0 %v2984_v53  ;;  %2499 = vmatpush.bf16.msra.mxu3 %v2988_v58  ;;  %v3158_v19 = vld [vmem:[#allocation2 + $0x84] sm:$0xf0]  ;;  %v3049_v44 = vld [vmem:[#allocation2 + $0x88] sm:$0xf0] }
 0x65c   : > { %v3047_v27 = vld [vmem:[#allocation2 + $0x80] sm:$0xf]  ;;  %v3157_v52 = vld [vmem:[#allocation2 + $0x84] sm:$0xf] }
 0x65d   : > { %v3048_v4 = vor.u32 %v3158_v19, %v3047_v27  ;;  %v3052_v31 = vor.u32 %v3157_v52, %v3049_v44 }
 0x65e   : > { %2500 = vmatmul.bf16.vlgmr.msra.gmra.mxu3 %v2976_v18  ;;  %2472 = vmatmul.bf16.vlgmr.msrb.gmra.mxu0 %v2976_v18 }
 0x65f   : > { %2485 = vmatpush.bf16.msra.mxu1 %v3048_v4  ;;  %2513 = vmatpush.bf16.msrb.mxu2 %v3052_v31 }
 0x662   : > { %3054 = vmatmul.msk.bf16.vlgmr.msrb.gmra.mxu2 %vm4815_vm6, %v2980_v35  ;;  %3053 = vmatmul.msk.bf16.vlgmr.msra.gmra.mxu1 %vm4816_vm4, %v2980_v35 }
 0x687   : > { %v2356_v50 = vpop.permute.xlu2 %2355 }
 0x69e   : > { %v2530_v22 = vpop.permute.xlu2 %2529 }
 0x69f   : > { %v2360_v17 = vpop.permute.xlu0 %2359 }
 0x6b6   : > { %v2526_v32 = vpop.permute.xlu1 %2525 }
 0x6bf   : > { %v2553_v1 = vpop.permute.xlu1 %2552 }
 0x6db   : > { %v2473_v3 = vpop.f32.mrf.mxu0 }
 0x6dc   : > { %v2474_v8 = vadd.f32 %v2473_v3, %v2356_v50 }
 0x6df   : > { %v2487_v33 = vpop.f32.mrf.mxu1 }
 0x6e0   : > { %v2488_v60 = vadd.f32 %v2487_v33, %v2474_v8 }
 0x6e1   : > { %v2501_v34 = vpop.f32.mrf.mxu3 }
 0x6e2   : > { %v2502_v21 = vadd.f32 %v2501_v34, %v2356_v50  ;;  %v2520_v0 = vmax.f32 %v2488_v60, 0.0 }
 0x6e3   : > { %v2475_v48 = vpop.f32.mrf.mxu0 }
 0x6e4   : > { %v2476_v41 = vadd.f32 %v2475_v48, %v2360_v17  ;;  %v2532_v45 = vmul.f32 %v2526_v32, %v2520_v0 }
 0x6e5   : > { %v2515_v42 = vpop.f32.mrf.mxu2 }
 0x6e6   : > { %v2516_v30 = vadd.f32 %v2515_v42, %v2502_v21 }
 0x6e7   : > { %v2489_v37 = vpop.f32.mrf.mxu1 }
 0x6e8   : > { %v2490_v7 = vadd.f32 %v2489_v37, %v2476_v41  ;;  %v2521_v43 = vmax.f32 %v2516_v30, 0.0 }
 0x6e9   : > { %v2503_v57 = vpop.f32.mrf.mxu3 }
 0x6ea   : > { %v2522_v24 = vmax.f32 %v2490_v7, 0.0  ;;  %v2504_v59 = vadd.f32 %v2503_v57, %v2360_v17  ;;  %v2533_v16 = vmul.f32 %v2526_v32, %v2521_v43 }
 0x6ec   : > { %v2534_v63 = vmul.f32 %v2530_v22, %v2522_v24 }
 0x6ed   : > { %v2517_v46 = vpop.f32.mrf.mxu2 }
 0x6ee   : > { %v2518_v40 = vadd.f32 %v2517_v46, %v2504_v59  ;;  %v2536_v28 = vadd.f32 %v2534_v63, %v2532_v45 }
 0x6f0   : > { %v2523_v15 = vmax.f32 %v2518_v40, 0.0  ;;  %v2537_v61 = vrot.slane %v2536_v28, 4 }
 0x6f2   : > { %v2535_v54 = vmul.f32 %v2530_v22, %v2523_v15  ;;  %v2538_v49 = vadd.f32 %v2537_v61, %v2536_v28 }
 0x6f4   : > { %v2543_v25 = vadd.f32 %v2535_v54, %v2533_v16  ;;  %v2539_v38 = vrot.slane %v2538_v49, 2 }
 0x6f6   : > { %v2544_v10 = vrot.slane %v2543_v25, 4  ;;  %v2540_v5 = vadd.f32 %v2539_v38, %v2538_v49 }
 0x6f8   : > { %v2545_v14 = vadd.f32 %v2544_v10, %v2543_v25  ;;  %v2541_v13 = vrot.slane %v2540_v5, 1 }
 0x6fa   : > { %v2546_v62 = vrot.slane %v2545_v14, 2  ;;  %v2542_v51 = vadd.f32 %v2541_v13, %v2540_v5 }
 0x6fc   : > { %v2547_v55 = vadd.f32 %v2546_v62, %v2545_v14  ;;  %v2555_v12 = vadd.f32 %v2553_v1, %v2542_v51 }
 0x6fe   : > { %v2548_v26 = vrot.slane %v2547_v55, 1  ;;  %v2557_v29 = vmax.f32 %v2555_v12, 0.0 }
 0x700   : > { %v2549_v2 = vadd.f32 %v2548_v26, %v2547_v55 }
 0x702   : > { %v2556_v20 = vadd.f32 %v2553_v1, %v2549_v2 }
 0x704   : > { %v2558_v56 = vmax.f32 %v2556_v20, 0.0 }
 0x706   : > { %v2561_v47 = vrot.slane %v2558_v56, 7 }
 0x708   : > { %v2563_v23 = vsel %vm2562_vm13, %v2557_v29, %v2561_v47 }
 0x709   : > { %2569 = vst.msk [vmem:[%s276_s28] sm:$0x3] %vm2567_vm14, %v2563_v23 }
 0x70a PF: > { %s17_s24 = sadd.s32 1, %s3209_s24  }
 0x70b   : > { %p14_p4 = scmp.ge.s32.totalorder %s17_s24, 4  }
 0x70d   :  { %16 = sbr.rel (!%p14_p4) target bundleno = 1 (0x1), region = 79 }

</bundles_post_ra>
